<compile_context>
chip_gen: v7x
topology: tpu7x:2x2x1
jax: 0.10.0
libtpu: 0.0.40
codegen_flags: <defaults>
</compile_context>

<pallas_src>
import math

import jax
import jax.numpy as jnp
from jax.experimental import pallas as pl
from jax.experimental.pallas import tpu as pltpu


# ----------------------------------------------------------------------------
# Generic tiled matmul + bias kernel (hoisted input projection and decoder).
# ----------------------------------------------------------------------------
def _matmul_bias_kernel(x_ref, w_ref, b_ref, o_ref):
    o_ref[...] = (
        jnp.dot(x_ref[...], w_ref[...], preferred_element_type=jnp.float32)
        + b_ref[...]
    ).astype(o_ref.dtype)


def matmul_bias(x, w, b, *, tm=256, tn=512):
    """x: (M, K); w: (K, N); b: (1, N) -> (M, N) f32."""
    M, K = x.shape
    N = w.shape[1]
    tm = tm if (M >= tm and M % tm == 0) else M
    tn = tn if (N >= tn and N % tn == 0) else N
    grid = (M // tm, N // tn)
    return pl.pallas_call(
        _matmul_bias_kernel,
        out_shape=jax.ShapeDtypeStruct((M, N), jnp.float32),
        grid_spec=pltpu.PrefetchScalarGridSpec(
            num_scalar_prefetch=0,
            grid=grid,
            in_specs=[
                pl.BlockSpec((tm, K), lambda i, j: (i, 0)),
                pl.BlockSpec((K, tn), lambda i, j: (0, j)),
                pl.BlockSpec((1, tn), lambda i, j: (0, j)),
            ],
            out_specs=pl.BlockSpec((tm, tn), lambda i, j: (i, j)),
        ),
        compiler_params=pltpu.CompilerParams(
            dimension_semantics=("parallel", "parallel")),
    )(x, w, b)


# ----------------------------------------------------------------------------
# Fused 2-layer LSTM kernel: one grid step per time CHUNK, states carried in
# the constant-index hN/cN output blocks (VMEM resident across the time axis).
# ----------------------------------------------------------------------------
def _fused_lstm_kernel(gx1_ref, h0_ref, c0_ref,
                       wh1_ref, wx2_ref, wh2_ref, b2_ref,
                       out_ref, hN_ref, cN_ref):
    chunk = pl.program_id(0)

    @pl.when(chunk == 0)
    def _():
        hN_ref[...] = h0_ref[...]
        cN_ref[...] = c0_ref[...]

    H = hN_ref.shape[-1]
    h1 = hN_ref[0]
    c1 = cN_ref[0]
    h2 = hN_ref[1]
    c2 = cN_ref[1]

    wh1 = wh1_ref[...]
    wx2 = wx2_ref[...]
    wh2 = wh2_ref[...]
    b2 = b2_ref[...]

    def split_gates(g):
        # NOTE: for H a multiple of 128 these slices are vreg-aligned (free).
        i = jax.nn.sigmoid(g[:, 0 * H:1 * H])
        f = jax.nn.sigmoid(g[:, 1 * H:2 * H])
        cg = jnp.tanh(g[:, 2 * H:3 * H])
        o = jax.nn.sigmoid(g[:, 3 * H:4 * H])
        return i, f, cg, o

    Tc = out_ref.shape[1]
    for s in range(Tc):                       # static (unrolled) inner time loop
        # layer 1: x-projection was hoisted out of the loop (gx1 = x@Wx1 + b1)
        g1 = gx1_ref[:, s, :] + jnp.dot(h1, wh1,
                                        preferred_element_type=jnp.float32)
        i1, f1, cg1, o1 = split_gates(g1)
        c1 = c1 * f1 + i1 * cg1
        h1 = o1 * jnp.tanh(c1)

        # layer 2 (input = h1, inherently serial so its x-projection stays here)
        g2 = (jnp.dot(h1, wx2, preferred_element_type=jnp.float32) + b2
              + jnp.dot(h2, wh2, preferred_element_type=jnp.float32))
        i2, f2, cg2, o2 = split_gates(g2)
        c2 = c2 * f2 + i2 * cg2
        h2 = o2 * jnp.tanh(c2)

        out_ref[:, s, :] = h2

    # single store of each carried state per chunk
    hN_ref[0] = h1
    cN_ref[0] = c1
    hN_ref[1] = h2
    cN_ref[1] = c2


def _pick_time_chunk(T, max_chunk=32):
    if T <= max_chunk:
        return T
    for tc in range(max_chunk, 7, -8):
        if tc % 8 == 0 and T % tc == 0:
            return tc
    return T


def fused_lstm(gx1, h0, c0, wh1_t, wx2_t, wh2_t, b2, *, time_chunk=None):
    """gx1: (B, T, 4H) precomputed layer-1 gates; h0/c0: (2, B, H)."""
    B, T, G = gx1.shape
    H = G // 4
    Tc = _pick_time_chunk(T) if time_chunk is None else time_chunk
    assert T % Tc == 0
    grid = (T // Tc,)
    out, hN, cN = pl.pallas_call(
        _fused_lstm_kernel,
        out_shape=(jax.ShapeDtypeStruct((B, T, H), jnp.float32),
                   jax.ShapeDtypeStruct((2, B, H), jnp.float32),
                   jax.ShapeDtypeStruct((2, B, H), jnp.float32)),
        grid_spec=pltpu.PrefetchScalarGridSpec(
            num_scalar_prefetch=0,
            grid=grid,
            in_specs=[
                pl.BlockSpec((B, Tc, 4 * H), lambda t: (0, t, 0)),
                pl.BlockSpec((2, B, H), lambda t: (0, 0, 0)),
                pl.BlockSpec((2, B, H), lambda t: (0, 0, 0)),
                pl.BlockSpec((H, 4 * H), lambda t: (0, 0)),
                pl.BlockSpec((H, 4 * H), lambda t: (0, 0)),
                pl.BlockSpec((H, 4 * H), lambda t: (0, 0)),
                pl.BlockSpec((1, 4 * H), lambda t: (0, 0)),
            ],
            out_specs=[
                pl.BlockSpec((B, Tc, H), lambda t: (0, t, 0)),
                pl.BlockSpec((2, B, H), lambda t: (0, 0, 0)),
                pl.BlockSpec((2, B, H), lambda t: (0, 0, 0)),
            ],
        ),
        compiler_params=pltpu.CompilerParams(
            dimension_semantics=("arbitrary",)),
    )(gx1, h0, c0, wh1_t, wx2_t, wh2_t, b2)
    return out, hN, cN


# ----------------------------------------------------------------------------
# Full model forward (glue: embedding gather + reshapes only — no transposes).
# ----------------------------------------------------------------------------
@jax.jit
def rnn_forward(tokens, params, hidden=None):
    B, T = tokens.shape
    H = params["wh1_t"].shape[0]

    if hidden is None:
        h0 = jnp.zeros((2, B, H), jnp.float32)
        c0 = jnp.zeros((2, B, H), jnp.float32)
    else:
        ((h1_0, c1_0), (h2_0, c2_0)) = hidden
        h0 = jnp.stack([h1_0, h2_0])
        c0 = jnp.stack([c1_0, c2_0])

    # Embedding lookup (gather).  Dropout = identity (eval).
    emb = params["emb"][tokens]                              # (B, T, D)
    D = emb.shape[-1]

    # Hoisted layer-1 input projection: one big matmul over all B*T rows.
    gx1 = matmul_bias(emb.reshape(B * T, D), params["wx1_t"], params["b1"])
    gx1 = gx1.reshape(B, T, 4 * H)

    out2, hN, cN = fused_lstm(gx1, h0, c0,
                              params["wh1_t"], params["wx2_t"],
                              params["wh2_t"], params["b2"])

    # Decoder: tiled matmul + bias over the (B*T, H) activations (no transpose).
    logits = matmul_bias(out2.reshape(B * T, H), params["wdec_t"], params["bdec"])
    V = params["wdec_t"].shape[-1]
    logits = logits.reshape(B, T, V)
    return logits, ((hN[0], cN[0]), (hN[1], cN[1]))


# ----------------------------------------------------------------------------
# Pure-JAX reference (correctness check only).
# ----------------------------------------------------------------------------
def ref_forward(tokens, params):
    emb = params["emb"][tokens]
    B, T, D = emb.shape
    H = params["wh1_t"].shape[0]

    def cell(x, h, c, wx_t, wh_t, b):
        gates = x @ wx_t + h @ wh_t + b
        i, f, g, o = jnp.split(gates, 4, axis=1)
        i, f, g, o = (jax.nn.sigmoid(i), jax.nn.sigmoid(f),
                      jnp.tanh(g), jax.nn.sigmoid(o))
        c = c * f + i * g
        h = o * jnp.tanh(c)
        return h, c

    def run_layer(x_tbd, wx_t, wh_t, b):
        def step(carry, x):
            h, c = carry
            h, c = cell(x, h, c, wx_t, wh_t, b)
            return (h, c), h
        (h, c), out = jax.lax.scan(
            step, (jnp.zeros((B, H)), jnp.zeros((B, H))), x_tbd)
        return out, h, c

    x1 = jnp.transpose(emb, (1, 0, 2))
    out1, h1, c1 = run_layer(x1, params["wx1_t"], params["wh1_t"], params["b1"])
    out2, h2, c2 = run_layer(out1, params["wx2_t"], params["wh2_t"], params["b2"])
    out2 = jnp.transpose(out2, (1, 0, 2))
    logits = out2 @ params["wdec_t"] + params["bdec"]
    return logits, ((h1, c1), (h2, c2))


# ----------------------------------------------------------------------------
# Deterministic parameter init (mirrors the PyTorch module's shapes).
# ----------------------------------------------------------------------------
def init_params(key, vocab_size, input_dim, hidden_dim, init_scale=0.1):
    keys = jax.random.split(key, 12)
    std = 1.0 / math.sqrt(hidden_dim)

    def u(k, shape, s):
        return jax.random.uniform(k, shape, jnp.float32, -s, s)

    H, D, V = hidden_dim, input_dim, vocab_size
    return {
        "emb":    u(keys[0], (V, D), init_scale),
        # LSTMCell 1: x2h Linear(D,4H) + h2h Linear(H,4H); weights stored
        # transposed, the two biases folded into one (b = bx + bh).
        "wx1_t":  u(keys[1], (D, 4 * H), std),
        "wh1_t":  u(keys[2], (H, 4 * H), std),
        "b1":     u(keys[3], (1, 4 * H), std) + u(keys[4], (1, 4 * H), std),
        # LSTMCell 2 (its input is layer-1's h, size H).
        "wx2_t":  u(keys[5], (H, 4 * H), std),
        "wh2_t":  u(keys[6], (H, 4 * H), std),
        "b2":     u(keys[7], (1, 4 * H), std) + u(keys[8], (1, 4 * H), std),
        # decoder Linear(H, V) -- stored transposed.
        "wdec_t": u(keys[9], (H, V), init_scale),
        "bdec":   jnp.zeros((1, V), jnp.float32),
    }


if __name__ == "__main__":
    # Small shapes: batch=8, seq=8, hidden=input=32, vocab=64.
    B, T, H, V = 8, 8, 32, 64
    key = jax.random.PRNGKey(0)
    k_tok, k_par = jax.random.split(key)

    params = init_params(k_par, vocab_size=V, input_dim=H, hidden_dim=H)
    tokens = jax.random.randint(k_tok, (B, T), 0, V, dtype=jnp.int32)

    logits, ((h1, c1), (h2, c2)) = rnn_forward(tokens, params)
    jax.block_until_ready(logits)

    ref_logits, ((rh1, rc1), (rh2, rc2)) = ref_forward(tokens, params)
    assert logits.shape == (B, T, V)
    assert jnp.allclose(logits, ref_logits, rtol=2e-5, atol=2e-5)
    assert jnp.allclose(h1, rh1, rtol=2e-5, atol=2e-5)
    assert jnp.allclose(c1, rc1, rtol=2e-5, atol=2e-5)
    assert jnp.allclose(h2, rh2, rtol=2e-5, atol=2e-5)
    assert jnp.allclose(c2, rc2, rtol=2e-5, atol=2e-5)

    print("KERNEL_OK")
</pallas_src>

<mosaic_0001>
module attributes {stable_mosaic.version = 11 : i64} {
  func.func @_matmul_bias_kernel(%arg0: i32, %arg1: i32, %arg2: memref<64x32xf32, #tpu.memory_space<vmem>>, %arg3: memref<32x128xf32, #tpu.memory_space<vmem>>, %arg4: memref<1x128xf32, #tpu.memory_space<vmem>>, %arg5: memref<64x128xf32, #tpu.memory_space<vmem>>) attributes {dimension_semantics = [#tpu.dimension_semantics<parallel>, #tpu.dimension_semantics<parallel>], iteration_bounds = array<i64: 1, 1>, scalar_prefetch = 0 : i64, scratch_operands = 0 : i64, tpu.core_type = #tpu.core_type<tc>, window_params = [{transform_indices = @transform_0, window_bounds = array<i64: 64, 32>}, {transform_indices = @transform_1, window_bounds = array<i64: 32, 128>}, {transform_indices = @transform_2, window_bounds = array<i64: 1, 128>}, {transform_indices = @transform_3, window_bounds = array<i64: 64, 128>}]} {
    %c0 = arith.constant 0 : index
    %c0_0 = arith.constant 0 : index
    %0 = vector.load %arg2[%c0, %c0_0] : memref<64x32xf32, #tpu.memory_space<vmem>>, vector<64x32xf32>
    %c0_1 = arith.constant 0 : index
    %c0_2 = arith.constant 0 : index
    %1 = vector.load %arg3[%c0_1, %c0_2] : memref<32x128xf32, #tpu.memory_space<vmem>>, vector<32x128xf32>
    %cst = arith.constant dense<0.000000e+00> : vector<64x128xf32>
    %2 = tpu.matmul %0, %1, %cst {dimension_numbers = #tpu.dot_dimension_numbers<[1], [0], [0], [1], [0, 0, 1, 1], [], []>} : vector<64x32xf32>, vector<32x128xf32>, vector<64x128xf32> -> vector<64x128xf32>
    %c0_3 = arith.constant 0 : index
    %c0_4 = arith.constant 0 : index
    %3 = vector.load %arg4[%c0_3, %c0_4] : memref<1x128xf32, #tpu.memory_space<vmem>>, vector<1x128xf32>
    %4 = vector.broadcast %3 : vector<1x128xf32> to vector<64x128xf32>
    %5 = arith.addf %2, %4 : vector<64x128xf32>
    %c0_5 = arith.constant 0 : index
    %c0_6 = arith.constant 0 : index
    %6 = vector.load %arg5[%c0_5, %c0_6] : memref<64x128xf32, #tpu.memory_space<vmem>>, vector<64x128xf32>
    tpu.vector_store %arg5[%c0_5, %c0_6], %5 {strides = array<i32>} : memref<64x128xf32, #tpu.memory_space<vmem>>, vector<64x128xf32>,
    return
  }
  func.func @transform_0(%arg0: i32, %arg1: i32) -> (i32, i32) {
    %c0_i32 = arith.constant 0 : i32
    %c0_i32_0 = arith.constant 0 : i32
    return %arg0, %c0_i32 : i32, i32
  }
  func.func @transform_1(%arg0: i32, %arg1: i32) -> (i32, i32) {
    %c0_i32 = arith.constant 0 : i32
    %c0_i32_0 = arith.constant 0 : i32
    return %c0_i32, %arg1 : i32, i32
  }
  func.func @transform_2(%arg0: i32, %arg1: i32) -> (i32, i32) {
    %c0_i32 = arith.constant 0 : i32
    %c0_i32_0 = arith.constant 0 : i32
    return %c0_i32, %arg1 : i32, i32
  }
  func.func @transform_3(%arg0: i32, %arg1: i32) -> (i32, i32) {
    %c0_i32 = arith.constant 0 : i32
    return %arg0, %arg1 : i32, i32
  }
}

module attributes {stable_mosaic.version = 11 : i64} {
  func.func @_matmul_bias_kernel(%arg0: i32, %arg1: i32, %arg2: memref<64x32xf32, #tpu.memory_space<vmem>>, %arg3: memref<32x64xf32, #tpu.memory_space<vmem>>, %arg4: memref<1x64xf32, #tpu.memory_space<vmem>>, %arg5: memref<64x64xf32, #tpu.memory_space<vmem>>) attributes {dimension_semantics = [#tpu.dimension_semantics<parallel>, #tpu.dimension_semantics<parallel>], iteration_bounds = array<i64: 1, 1>, scalar_prefetch = 0 : i64, scratch_operands = 0 : i64, tpu.core_type = #tpu.core_type<tc>, window_params = [{transform_indices = @transform_0, window_bounds = array<i64: 64, 32>}, {transform_indices = @transform_1, window_bounds = array<i64: 32, 64>}, {transform_indices = @transform_2, window_bounds = array<i64: 1, 64>}, {transform_indices = @transform_3, window_bounds = array<i64: 64, 64>}]} {
    %c0 = arith.constant 0 : index
    %c0_0 = arith.constant 0 : index
    %0 = vector.load %arg2[%c0, %c0_0] : memref<64x32xf32, #tpu.memory_space<vmem>>, vector<64x32xf32>
    %c0_1 = arith.constant 0 : index
    %c0_2 = arith.constant 0 : index
    %1 = vector.load %arg3[%c0_1, %c0_2] : memref<32x64xf32, #tpu.memory_space<vmem>>, vector<32x64xf32>
    %cst = arith.constant dense<0.000000e+00> : vector<64x64xf32>
    %2 = tpu.matmul %0, %1, %cst {dimension_numbers = #tpu.dot_dimension_numbers<[1], [0], [0], [1], [0, 0, 1, 1], [], []>} : vector<64x32xf32>, vector<32x64xf32>, vector<64x64xf32> -> vector<64x64xf32>
    %c0_3 = arith.constant 0 : index
    %c0_4 = arith.constant 0 : index
    %3 = vector.load %arg4[%c0_3, %c0_4] : memref<1x64xf32, #tpu.memory_space<vmem>>, vector<1x64xf32>
    %4 = vector.broadcast %3 : vector<1x64xf32> to vector<64x64xf32>
    %5 = arith.addf %2, %4 : vector<64x64xf32>
    %c0_5 = arith.constant 0 : index
    %c0_6 = arith.constant 0 : index
    %6 = vector.load %arg5[%c0_5, %c0_6] : memref<64x64xf32, #tpu.memory_space<vmem>>, vector<64x64xf32>
    tpu.vector_store %arg5[%c0_5, %c0_6], %5 {strides = array<i32>} : memref<64x64xf32, #tpu.memory_space<vmem>>, vector<64x64xf32>,
    return
  }
  func.func @transform_0(%arg0: i32, %arg1: i32) -> (i32, i32) {
    %c0_i32 = arith.constant 0 : i32
    %c0_i32_0 = arith.constant 0 : i32
    return %arg0, %c0_i32 : i32, i32
  }
  func.func @transform_1(%arg0: i32, %arg1: i32) -> (i32, i32) {
    %c0_i32 = arith.constant 0 : i32
    %c0_i32_0 = arith.constant 0 : i32
    return %c0_i32, %arg1 : i32, i32
  }
  func.func @transform_2(%arg0: i32, %arg1: i32) -> (i32, i32) {
    %c0_i32 = arith.constant 0 : i32
    %c0_i32_0 = arith.constant 0 : i32
    return %c0_i32, %arg1 : i32, i32
  }
  func.func @transform_3(%arg0: i32, %arg1: i32) -> (i32, i32) {
    %c0_i32 = arith.constant 0 : i32
    return %arg0, %arg1 : i32, i32
  }
}

module attributes {stable_mosaic.version = 11 : i64} {
  func.func @_fused_lstm_kernel(%arg0: i32, %arg1: memref<8x8x128xf32, #tpu.memory_space<vmem>>, %arg2: memref<2x8x32xf32, #tpu.memory_space<vmem>>, %arg3: memref<2x8x32xf32, #tpu.memory_space<vmem>>, %arg4: memref<32x128xf32, #tpu.memory_space<vmem>>, %arg5: memref<32x128xf32, #tpu.memory_space<vmem>>, %arg6: memref<32x128xf32, #tpu.memory_space<vmem>>, %arg7: memref<1x128xf32, #tpu.memory_space<vmem>>, %arg8: memref<8x8x32xf32, #tpu.memory_space<vmem>>, %arg9: memref<2x8x32xf32, #tpu.memory_space<vmem>>, %arg10: memref<2x8x32xf32, #tpu.memory_space<vmem>>) attributes {dimension_semantics = [#tpu.dimension_semantics<arbitrary>], iteration_bounds = array<i64: 1>, scalar_prefetch = 0 : i64, scratch_operands = 0 : i64, tpu.core_type = #tpu.core_type<tc>, window_params = [{transform_indices = @transform_0, window_bounds = array<i64: 8, 8, 128>}, {pipeline_mode = #tpu.pipeline_mode<synchronous>, transform_indices = @transform_1, window_bounds = array<i64: 2, 8, 32>}, {pipeline_mode = #tpu.pipeline_mode<synchronous>, transform_indices = @transform_2, window_bounds = array<i64: 2, 8, 32>}, {pipeline_mode = #tpu.pipeline_mode<synchronous>, transform_indices = @transform_3, window_bounds = array<i64: 32, 128>}, {pipeline_mode = #tpu.pipeline_mode<synchronous>, transform_indices = @transform_4, window_bounds = array<i64: 32, 128>}, {pipeline_mode = #tpu.pipeline_mode<synchronous>, transform_indices = @transform_5, window_bounds = array<i64: 32, 128>}, {pipeline_mode = #tpu.pipeline_mode<synchronous>, transform_indices = @transform_6, window_bounds = array<i64: 1, 128>}, {transform_indices = @transform_7, window_bounds = array<i64: 8, 8, 32>}, {pipeline_mode = #tpu.pipeline_mode<synchronous>, transform_indices = @transform_8, window_bounds = array<i64: 2, 8, 32>}, {pipeline_mode = #tpu.pipeline_mode<synchronous>, transform_indices = @transform_9, window_bounds = array<i64: 2, 8, 32>}]} {
    %c0_i32 = arith.constant 0 : i32
    %0 = arith.cmpi eq, %arg0, %c0_i32 : i32
    %1 = arith.extui %0 : i1 to i32
    %c0_i32_0 = arith.constant 0 : i32
    %2 = arith.cmpi ne, %1, %c0_i32_0 : i32
    scf.if %2 {
      %c0_144 = arith.constant 0 : index
      %c0_145 = arith.constant 0 : index
      %c0_146 = arith.constant 0 : index
      %523 = vector.load %arg2[%c0_144, %c0_145, %c0_146] : memref<2x8x32xf32, #tpu.memory_space<vmem>>, vector<2x8x32xf32>
      %c0_147 = arith.constant 0 : index
      %c0_148 = arith.constant 0 : index
      %c0_149 = arith.constant 0 : index
      %524 = vector.load %arg9[%c0_147, %c0_148, %c0_149] : memref<2x8x32xf32, #tpu.memory_space<vmem>>, vector<2x8x32xf32>
      tpu.vector_store %arg9[%c0_147, %c0_148, %c0_149], %523 {strides = array<i32>} : memref<2x8x32xf32, #tpu.memory_space<vmem>>, vector<2x8x32xf32>,
      %c0_150 = arith.constant 0 : index
      %c0_151 = arith.constant 0 : index
      %c0_152 = arith.constant 0 : index
      %525 = vector.load %arg3[%c0_150, %c0_151, %c0_152] : memref<2x8x32xf32, #tpu.memory_space<vmem>>, vector<2x8x32xf32>
      %c0_153 = arith.constant 0 : index
      %c0_154 = arith.constant 0 : index
      %c0_155 = arith.constant 0 : index
      %526 = vector.load %arg10[%c0_153, %c0_154, %c0_155] : memref<2x8x32xf32, #tpu.memory_space<vmem>>, vector<2x8x32xf32>
      tpu.vector_store %arg10[%c0_153, %c0_154, %c0_155], %525 {strides = array<i32>} : memref<2x8x32xf32, #tpu.memory_space<vmem>>, vector<2x8x32xf32>,
    } else {
    }
    %c0 = arith.constant 0 : index
    %c0_1 = arith.constant 0 : index
    %c0_2 = arith.constant 0 : index
    %3 = vector.load %arg9[%c0, %c0_1, %c0_2] : memref<2x8x32xf32, #tpu.memory_space<vmem>>, vector<1x8x32xf32>
    %4 = vector.shape_cast %3 : vector<1x8x32xf32> to vector<8x32xf32>
    %c0_3 = arith.constant 0 : index
    %c0_4 = arith.constant 0 : index
    %c0_5 = arith.constant 0 : index
    %5 = vector.load %arg10[%c0_3, %c0_4, %c0_5] : memref<2x8x32xf32, #tpu.memory_space<vmem>>, vector<1x8x32xf32>
    %6 = vector.shape_cast %5 : vector<1x8x32xf32> to vector<8x32xf32>
    %c1 = arith.constant 1 : index
    %c0_6 = arith.constant 0 : index
    %c0_7 = arith.constant 0 : index
    %7 = vector.load %arg9[%c1, %c0_6, %c0_7] : memref<2x8x32xf32, #tpu.memory_space<vmem>>, vector<1x8x32xf32>
    %8 = vector.shape_cast %7 : vector<1x8x32xf32> to vector<8x32xf32>
    %c1_8 = arith.constant 1 : index
    %c0_9 = arith.constant 0 : index
    %c0_10 = arith.constant 0 : index
    %9 = vector.load %arg10[%c1_8, %c0_9, %c0_10] : memref<2x8x32xf32, #tpu.memory_space<vmem>>, vector<1x8x32xf32>
    %10 = vector.shape_cast %9 : vector<1x8x32xf32> to vector<8x32xf32>
    %c0_11 = arith.constant 0 : index
    %c0_12 = arith.constant 0 : index
    %11 = vector.load %arg4[%c0_11, %c0_12] : memref<32x128xf32, #tpu.memory_space<vmem>>, vector<32x128xf32>
    %c0_13 = arith.constant 0 : index
    %c0_14 = arith.constant 0 : index
    %12 = vector.load %arg5[%c0_13, %c0_14] : memref<32x128xf32, #tpu.memory_space<vmem>>, vector<32x128xf32>
    %c0_15 = arith.constant 0 : index
    %c0_16 = arith.constant 0 : index
    %13 = vector.load %arg6[%c0_15, %c0_16] : memref<32x128xf32, #tpu.memory_space<vmem>>, vector<32x128xf32>
    %c0_17 = arith.constant 0 : index
    %c0_18 = arith.constant 0 : index
    %14 = vector.load %arg7[%c0_17, %c0_18] : memref<1x128xf32, #tpu.memory_space<vmem>>, vector<1x128xf32>
    %c0_19 = arith.constant 0 : index
    %c0_20 = arith.constant 0 : index
    %c0_21 = arith.constant 0 : index
    %15 = vector.load %arg1[%c0_19, %c0_20, %c0_21] : memref<8x8x128xf32, #tpu.memory_space<vmem>>, vector<8x1x128xf32>
    %16 = vector.shape_cast %15 : vector<8x1x128xf32> to vector<8x128xf32>
    %cst = arith.constant dense<0.000000e+00> : vector<8x128xf32>
    %17 = tpu.matmul %4, %11, %cst {dimension_numbers = #tpu.dot_dimension_numbers<[1], [0], [0], [1], [0, 0, 1, 1], [], []>} : vector<8x32xf32>, vector<32x128xf32>, vector<8x128xf32> -> vector<8x128xf32>
    %18 = arith.addf %16, %17 : vector<8x128xf32>
    %19 = vector.extract_strided_slice %18 {offsets = [0, 0], sizes = [8, 32], strides = [1, 1]} : vector<8x128xf32> to vector<8x32xf32>
    %20 = arith.negf %19 : vector<8x32xf32>
    %21 = math.exp %20 : vector<8x32xf32>
    %cst_22 = arith.constant 1.000000e+00 : f32
    %22 = vector.broadcast %cst_22 : f32 to vector<8x32xf32>
    %23 = arith.addf %22, %21 : vector<8x32xf32>
    %24 = arith.divf %22, %23 : vector<8x32xf32>
    %25 = vector.extract_strided_slice %18 {offsets = [0, 32], sizes = [8, 32], strides = [1, 1]} : vector<8x128xf32> to vector<8x32xf32>
    %26 = arith.negf %25 : vector<8x32xf32>
    %27 = math.exp %26 : vector<8x32xf32>
    %cst_23 = arith.constant 1.000000e+00 : f32
    %28 = vector.broadcast %cst_23 : f32 to vector<8x32xf32>
    %29 = arith.addf %28, %27 : vector<8x32xf32>
    %30 = arith.divf %28, %29 : vector<8x32xf32>
    %31 = vector.extract_strided_slice %18 {offsets = [0, 64], sizes = [8, 32], strides = [1, 1]} : vector<8x128xf32> to vector<8x32xf32>
    %32 = math.tanh %31 : vector<8x32xf32>
    %33 = vector.extract_strided_slice %18 {offsets = [0, 96], sizes = [8, 32], strides = [1, 1]} : vector<8x128xf32> to vector<8x32xf32>
    %34 = arith.negf %33 : vector<8x32xf32>
    %35 = math.exp %34 : vector<8x32xf32>
    %cst_24 = arith.constant 1.000000e+00 : f32
    %36 = vector.broadcast %cst_24 : f32 to vector<8x32xf32>
    %37 = arith.addf %36, %35 : vector<8x32xf32>
    %38 = arith.divf %36, %37 : vector<8x32xf32>
    %39 = arith.mulf %6, %30 : vector<8x32xf32>
    %40 = arith.mulf %24, %32 : vector<8x32xf32>
    %41 = arith.addf %39, %40 : vector<8x32xf32>
    %42 = math.tanh %41 : vector<8x32xf32>
    %43 = arith.mulf %38, %42 : vector<8x32xf32>
    %cst_25 = arith.constant dense<0.000000e+00> : vector<8x128xf32>
    %44 = tpu.matmul %43, %12, %cst_25 {dimension_numbers = #tpu.dot_dimension_numbers<[1], [0], [0], [1], [0, 0, 1, 1], [], []>} : vector<8x32xf32>, vector<32x128xf32>, vector<8x128xf32> -> vector<8x128xf32>
    %45 = vector.broadcast %14 : vector<1x128xf32> to vector<8x128xf32>
    %46 = arith.addf %44, %45 : vector<8x128xf32>
    %cst_26 = arith.constant dense<0.000000e+00> : vector<8x128xf32>
    %47 = tpu.matmul %8, %13, %cst_26 {dimension_numbers = #tpu.dot_dimension_numbers<[1], [0], [0], [1], [0, 0, 1, 1], [], []>} : vector<8x32xf32>, vector<32x128xf32>, vector<8x128xf32> -> vector<8x128xf32>
    %48 = arith.addf %46, %47 : vector<8x128xf32>
    %49 = vector.extract_strided_slice %48 {offsets = [0, 0], sizes = [8, 32], strides = [1, 1]} : vector<8x128xf32> to vector<8x32xf32>
    %50 = arith.negf %49 : vector<8x32xf32>
    %51 = math.exp %50 : vector<8x32xf32>
    %cst_27 = arith.constant 1.000000e+00 : f32
    %52 = vector.broadcast %cst_27 : f32 to vector<8x32xf32>
    %53 = arith.addf %52, %51 : vector<8x32xf32>
    %54 = arith.divf %52, %53 : vector<8x32xf32>
    %55 = vector.extract_strided_slice %48 {offsets = [0, 32], sizes = [8, 32], strides = [1, 1]} : vector<8x128xf32> to vector<8x32xf32>
    %56 = arith.negf %55 : vector<8x32xf32>
    %57 = math.exp %56 : vector<8x32xf32>
    %cst_28 = arith.constant 1.000000e+00 : f32
    %58 = vector.broadcast %cst_28 : f32 to vector<8x32xf32>
    %59 = arith.addf %58, %57 : vector<8x32xf32>
    %60 = arith.divf %58, %59 : vector<8x32xf32>
    %61 = vector.extract_strided_slice %48 {offsets = [0, 64], sizes = [8, 32], strides = [1, 1]} : vector<8x128xf32> to vector<8x32xf32>
    %62 = math.tanh %61 : vector<8x32xf32>
    %63 = vector.extract_strided_slice %48 {offsets = [0, 96], sizes = [8, 32], strides = [1, 1]} : vector<8x128xf32> to vector<8x32xf32>
    %64 = arith.negf %63 : vector<8x32xf32>
    %65 = math.exp %64 : vector<8x32xf32>
    %cst_29 = arith.constant 1.000000e+00 : f32
    %66 = vector.broadcast %cst_29 : f32 to vector<8x32xf32>
    %67 = arith.addf %66, %65 : vector<8x32xf32>
    %68 = arith.divf %66, %67 : vector<8x32xf32>
    %69 = arith.mulf %10, %60 : vector<8x32xf32>
    %70 = arith.mulf %54, %62 : vector<8x32xf32>
    %71 = arith.addf %69, %70 : vector<8x32xf32>
    %72 = math.tanh %71 : vector<8x32xf32>
    %73 = arith.mulf %68, %72 : vector<8x32xf32>
    %c0_30 = arith.constant 0 : index
    %c0_31 = arith.constant 0 : index
    %c0_32 = arith.constant 0 : index
    %74 = vector.load %arg8[%c0_30, %c0_31, %c0_32] : memref<8x8x32xf32, #tpu.memory_space<vmem>>, vector<8x1x32xf32>
    %75 = vector.shape_cast %74 : vector<8x1x32xf32> to vector<8x32xf32>
    %76 = vector.shape_cast %73 : vector<8x32xf32> to vector<8x1x32xf32>
    tpu.vector_store %arg8[%c0_30, %c0_31, %c0_32], %76 {strides = array<i32>} : memref<8x8x32xf32, #tpu.memory_space<vmem>>, vector<8x1x32xf32>,
    %c0_33 = arith.constant 0 : index
    %c1_34 = arith.constant 1 : index
    %c0_35 = arith.constant 0 : index
    %77 = vector.load %arg1[%c0_33, %c1_34, %c0_35] : memref<8x8x128xf32, #tpu.memory_space<vmem>>, vector<8x1x128xf32>
    %78 = vector.shape_cast %77 : vector<8x1x128xf32> to vector<8x128xf32>
    %cst_36 = arith.constant dense<0.000000e+00> : vector<8x128xf32>
    %79 = tpu.matmul %43, %11, %cst_36 {dimension_numbers = #tpu.dot_dimension_numbers<[1], [0], [0], [1], [0, 0, 1, 1], [], []>} : vector<8x32xf32>, vector<32x128xf32>, vector<8x128xf32> -> vector<8x128xf32>
    %80 = arith.addf %78, %79 : vector<8x128xf32>
    %81 = vector.extract_strided_slice %80 {offsets = [0, 0], sizes = [8, 32], strides = [1, 1]} : vector<8x128xf32> to vector<8x32xf32>
    %82 = arith.negf %81 : vector<8x32xf32>
    %83 = math.exp %82 : vector<8x32xf32>
    %cst_37 = arith.constant 1.000000e+00 : f32
    %84 = vector.broadcast %cst_37 : f32 to vector<8x32xf32>
    %85 = arith.addf %84, %83 : vector<8x32xf32>
    %86 = arith.divf %84, %85 : vector<8x32xf32>
    %87 = vector.extract_strided_slice %80 {offsets = [0, 32], sizes = [8, 32], strides = [1, 1]} : vector<8x128xf32> to vector<8x32xf32>
    %88 = arith.negf %87 : vector<8x32xf32>
    %89 = math.exp %88 : vector<8x32xf32>
    %cst_38 = arith.constant 1.000000e+00 : f32
    %90 = vector.broadcast %cst_38 : f32 to vector<8x32xf32>
    %91 = arith.addf %90, %89 : vector<8x32xf32>
    %92 = arith.divf %90, %91 : vector<8x32xf32>
    %93 = vector.extract_strided_slice %80 {offsets = [0, 64], sizes = [8, 32], strides = [1, 1]} : vector<8x128xf32> to vector<8x32xf32>
    %94 = math.tanh %93 : vector<8x32xf32>
    %95 = vector.extract_strided_slice %80 {offsets = [0, 96], sizes = [8, 32], strides = [1, 1]} : vector<8x128xf32> to vector<8x32xf32>
    %96 = arith.negf %95 : vector<8x32xf32>
    %97 = math.exp %96 : vector<8x32xf32>
    %cst_39 = arith.constant 1.000000e+00 : f32
    %98 = vector.broadcast %cst_39 : f32 to vector<8x32xf32>
    %99 = arith.addf %98, %97 : vector<8x32xf32>
    %100 = arith.divf %98, %99 : vector<8x32xf32>
    %101 = arith.mulf %41, %92 : vector<8x32xf32>
    %102 = arith.mulf %86, %94 : vector<8x32xf32>
    %103 = arith.addf %101, %102 : vector<8x32xf32>
    %104 = math.tanh %103 : vector<8x32xf32>
    %105 = arith.mulf %100, %104 : vector<8x32xf32>
    %cst_40 = arith.constant dense<0.000000e+00> : vector<8x128xf32>
    %106 = tpu.matmul %105, %12, %cst_40 {dimension_numbers = #tpu.dot_dimension_numbers<[1], [0], [0], [1], [0, 0, 1, 1], [], []>} : vector<8x32xf32>, vector<32x128xf32>, vector<8x128xf32> -> vector<8x128xf32>
    %107 = vector.broadcast %14 : vector<1x128xf32> to vector<8x128xf32>
    %108 = arith.addf %106, %107 : vector<8x128xf32>
    %cst_41 = arith.constant dense<0.000000e+00> : vector<8x128xf32>
    %109 = tpu.matmul %73, %13, %cst_41 {dimension_numbers = #tpu.dot_dimension_numbers<[1], [0], [0], [1], [0, 0, 1, 1], [], []>} : vector<8x32xf32>, vector<32x128xf32>, vector<8x128xf32> -> vector<8x128xf32>
    %110 = arith.addf %108, %109 : vector<8x128xf32>
    %111 = vector.extract_strided_slice %110 {offsets = [0, 0], sizes = [8, 32], strides = [1, 1]} : vector<8x128xf32> to vector<8x32xf32>
    %112 = arith.negf %111 : vector<8x32xf32>
    %113 = math.exp %112 : vector<8x32xf32>
    %cst_42 = arith.constant 1.000000e+00 : f32
    %114 = vector.broadcast %cst_42 : f32 to vector<8x32xf32>
    %115 = arith.addf %114, %113 : vector<8x32xf32>
    %116 = arith.divf %114, %115 : vector<8x32xf32>
    %117 = vector.extract_strided_slice %110 {offsets = [0, 32], sizes = [8, 32], strides = [1, 1]} : vector<8x128xf32> to vector<8x32xf32>
    %118 = arith.negf %117 : vector<8x32xf32>
    %119 = math.exp %118 : vector<8x32xf32>
    %cst_43 = arith.constant 1.000000e+00 : f32
    %120 = vector.broadcast %cst_43 : f32 to vector<8x32xf32>
    %121 = arith.addf %120, %119 : vector<8x32xf32>
    %122 = arith.divf %120, %121 : vector<8x32xf32>
    %123 = vector.extract_strided_slice %110 {offsets = [0, 64], sizes = [8, 32], strides = [1, 1]} : vector<8x128xf32> to vector<8x32xf32>
    %124 = math.tanh %123 : vector<8x32xf32>
    %125 = vector.extract_strided_slice %110 {offsets = [0, 96], sizes = [8, 32], strides = [1, 1]} : vector<8x128xf32> to vector<8x32xf32>
    %126 = arith.negf %125 : vector<8x32xf32>
    %127 = math.exp %126 : vector<8x32xf32>
    %cst_44 = arith.constant 1.000000e+00 : f32
    %128 = vector.broadcast %cst_44 : f32 to vector<8x32xf32>
    %129 = arith.addf %128, %127 : vector<8x32xf32>
    %130 = arith.divf %128, %129 : vector<8x32xf32>
    %131 = arith.mulf %71, %122 : vector<8x32xf32>
    %132 = arith.mulf %116, %124 : vector<8x32xf32>
    %133 = arith.addf %131, %132 : vector<8x32xf32>
    %134 = math.tanh %133 : vector<8x32xf32>
    %135 = arith.mulf %130, %134 : vector<8x32xf32>
    %c0_45 = arith.constant 0 : index
    %c1_46 = arith.constant 1 : index
    %c0_47 = arith.constant 0 : index
    %136 = vector.load %arg8[%c0_45, %c1_46, %c0_47] : memref<8x8x32xf32, #tpu.memory_space<vmem>>, vector<8x1x32xf32>
    %137 = vector.shape_cast %136 : vector<8x1x32xf32> to vector<8x32xf32>
    %138 = vector.shape_cast %135 : vector<8x32xf32> to vector<8x1x32xf32>
    tpu.vector_store %arg8[%c0_45, %c1_46, %c0_47], %138 {strides = array<i32>} : memref<8x8x32xf32, #tpu.memory_space<vmem>>, vector<8x1x32xf32>,
    %c0_48 = arith.constant 0 : index
    %c2 = arith.constant 2 : index
    %c0_49 = arith.constant 0 : index
    %139 = vector.load %arg1[%c0_48, %c2, %c0_49] : memref<8x8x128xf32, #tpu.memory_space<vmem>>, vector<8x1x128xf32>
    %140 = vector.shape_cast %139 : vector<8x1x128xf32> to vector<8x128xf32>
    %cst_50 = arith.constant dense<0.000000e+00> : vector<8x128xf32>
    %141 = tpu.matmul %105, %11, %cst_50 {dimension_numbers = #tpu.dot_dimension_numbers<[1], [0], [0], [1], [0, 0, 1, 1], [], []>} : vector<8x32xf32>, vector<32x128xf32>, vector<8x128xf32> -> vector<8x128xf32>
    %142 = arith.addf %140, %141 : vector<8x128xf32>
    %143 = vector.extract_strided_slice %142 {offsets = [0, 0], sizes = [8, 32], strides = [1, 1]} : vector<8x128xf32> to vector<8x32xf32>
    %144 = arith.negf %143 : vector<8x32xf32>
    %145 = math.exp %144 : vector<8x32xf32>
    %cst_51 = arith.constant 1.000000e+00 : f32
    %146 = vector.broadcast %cst_51 : f32 to vector<8x32xf32>
    %147 = arith.addf %146, %145 : vector<8x32xf32>
    %148 = arith.divf %146, %147 : vector<8x32xf32>
    %149 = vector.extract_strided_slice %142 {offsets = [0, 32], sizes = [8, 32], strides = [1, 1]} : vector<8x128xf32> to vector<8x32xf32>
    %150 = arith.negf %149 : vector<8x32xf32>
    %151 = math.exp %150 : vector<8x32xf32>
    %cst_52 = arith.constant 1.000000e+00 : f32
    %152 = vector.broadcast %cst_52 : f32 to vector<8x32xf32>
    %153 = arith.addf %152, %151 : vector<8x32xf32>
    %154 = arith.divf %152, %153 : vector<8x32xf32>
    %155 = vector.extract_strided_slice %142 {offsets = [0, 64], sizes = [8, 32], strides = [1, 1]} : vector<8x128xf32> to vector<8x32xf32>
    %156 = math.tanh %155 : vector<8x32xf32>
    %157 = vector.extract_strided_slice %142 {offsets = [0, 96], sizes = [8, 32], strides = [1, 1]} : vector<8x128xf32> to vector<8x32xf32>
    %158 = arith.negf %157 : vector<8x32xf32>
    %159 = math.exp %158 : vector<8x32xf32>
    %cst_53 = arith.constant 1.000000e+00 : f32
    %160 = vector.broadcast %cst_53 : f32 to vector<8x32xf32>
    %161 = arith.addf %160, %159 : vector<8x32xf32>
    %162 = arith.divf %160, %161 : vector<8x32xf32>
    %163 = arith.mulf %103, %154 : vector<8x32xf32>
    %164 = arith.mulf %148, %156 : vector<8x32xf32>
    %165 = arith.addf %163, %164 : vector<8x32xf32>
    %166 = math.tanh %165 : vector<8x32xf32>
    %167 = arith.mulf %162, %166 : vector<8x32xf32>
    %cst_54 = arith.constant dense<0.000000e+00> : vector<8x128xf32>
    %168 = tpu.matmul %167, %12, %cst_54 {dimension_numbers = #tpu.dot_dimension_numbers<[1], [0], [0], [1], [0, 0, 1, 1], [], []>} : vector<8x32xf32>, vector<32x128xf32>, vector<8x128xf32> -> vector<8x128xf32>
    %169 = vector.broadcast %14 : vector<1x128xf32> to vector<8x128xf32>
    %170 = arith.addf %168, %169 : vector<8x128xf32>
    %cst_55 = arith.constant dense<0.000000e+00> : vector<8x128xf32>
    %171 = tpu.matmul %135, %13, %cst_55 {dimension_numbers = #tpu.dot_dimension_numbers<[1], [0], [0], [1], [0, 0, 1, 1], [], []>} : vector<8x32xf32>, vector<32x128xf32>, vector<8x128xf32> -> vector<8x128xf32>
    %172 = arith.addf %170, %171 : vector<8x128xf32>
    %173 = vector.extract_strided_slice %172 {offsets = [0, 0], sizes = [8, 32], strides = [1, 1]} : vector<8x128xf32> to vector<8x32xf32>
    %174 = arith.negf %173 : vector<8x32xf32>
    %175 = math.exp %174 : vector<8x32xf32>
    %cst_56 = arith.constant 1.000000e+00 : f32
    %176 = vector.broadcast %cst_56 : f32 to vector<8x32xf32>
    %177 = arith.addf %176, %175 : vector<8x32xf32>
    %178 = arith.divf %176, %177 : vector<8x32xf32>
    %179 = vector.extract_strided_slice %172 {offsets = [0, 32], sizes = [8, 32], strides = [1, 1]} : vector<8x128xf32> to vector<8x32xf32>
    %180 = arith.negf %179 : vector<8x32xf32>
    %181 = math.exp %180 : vector<8x32xf32>
    %cst_57 = arith.constant 1.000000e+00 : f32
    %182 = vector.broadcast %cst_57 : f32 to vector<8x32xf32>
    %183 = arith.addf %182, %181 : vector<8x32xf32>
    %184 = arith.divf %182, %183 : vector<8x32xf32>
    %185 = vector.extract_strided_slice %172 {offsets = [0, 64], sizes = [8, 32], strides = [1, 1]} : vector<8x128xf32> to vector<8x32xf32>
    %186 = math.tanh %185 : vector<8x32xf32>
    %187 = vector.extract_strided_slice %172 {offsets = [0, 96], sizes = [8, 32], strides = [1, 1]} : vector<8x128xf32> to vector<8x32xf32>
    %188 = arith.negf %187 : vector<8x32xf32>
    %189 = math.exp %188 : vector<8x32xf32>
    %cst_58 = arith.constant 1.000000e+00 : f32
    %190 = vector.broadcast %cst_58 : f32 to vector<8x32xf32>
    %191 = arith.addf %190, %189 : vector<8x32xf32>
    %192 = arith.divf %190, %191 : vector<8x32xf32>
    %193 = arith.mulf %133, %184 : vector<8x32xf32>
    %194 = arith.mulf %178, %186 : vector<8x32xf32>
    %195 = arith.addf %193, %194 : vector<8x32xf32>
    %196 = math.tanh %195 : vector<8x32xf32>
    %197 = arith.mulf %192, %196 : vector<8x32xf32>
    %c0_59 = arith.constant 0 : index
    %c2_60 = arith.constant 2 : index
    %c0_61 = arith.constant 0 : index
    %198 = vector.load %arg8[%c0_59, %c2_60, %c0_61] : memref<8x8x32xf32, #tpu.memory_space<vmem>>, vector<8x1x32xf32>
    %199 = vector.shape_cast %198 : vector<8x1x32xf32> to vector<8x32xf32>
    %200 = vector.shape_cast %197 : vector<8x32xf32> to vector<8x1x32xf32>
    tpu.vector_store %arg8[%c0_59, %c2_60, %c0_61], %200 {strides = array<i32>} : memref<8x8x32xf32, #tpu.memory_space<vmem>>, vector<8x1x32xf32>,
    %c0_62 = arith.constant 0 : index
    %c3 = arith.constant 3 : index
    %c0_63 = arith.constant 0 : index
    %201 = vector.load %arg1[%c0_62, %c3, %c0_63] : memref<8x8x128xf32, #tpu.memory_space<vmem>>, vector<8x1x128xf32>
    %202 = vector.shape_cast %201 : vector<8x1x128xf32> to vector<8x128xf32>
    %cst_64 = arith.constant dense<0.000000e+00> : vector<8x128xf32>
    %203 = tpu.matmul %167, %11, %cst_64 {dimension_numbers = #tpu.dot_dimension_numbers<[1], [0], [0], [1], [0, 0, 1, 1], [], []>} : vector<8x32xf32>, vector<32x128xf32>, vector<8x128xf32> -> vector<8x128xf32>
    %204 = arith.addf %202, %203 : vector<8x128xf32>
    %205 = vector.extract_strided_slice %204 {offsets = [0, 0], sizes = [8, 32], strides = [1, 1]} : vector<8x128xf32> to vector<8x32xf32>
    %206 = arith.negf %205 : vector<8x32xf32>
    %207 = math.exp %206 : vector<8x32xf32>
    %cst_65 = arith.constant 1.000000e+00 : f32
    %208 = vector.broadcast %cst_65 : f32 to vector<8x32xf32>
    %209 = arith.addf %208, %207 : vector<8x32xf32>
    %210 = arith.divf %208, %209 : vector<8x32xf32>
    %211 = vector.extract_strided_slice %204 {offsets = [0, 32], sizes = [8, 32], strides = [1, 1]} : vector<8x128xf32> to vector<8x32xf32>
    %212 = arith.negf %211 : vector<8x32xf32>
    %213 = math.exp %212 : vector<8x32xf32>
    %cst_66 = arith.constant 1.000000e+00 : f32
    %214 = vector.broadcast %cst_66 : f32 to vector<8x32xf32>
    %215 = arith.addf %214, %213 : vector<8x32xf32>
    %216 = arith.divf %214, %215 : vector<8x32xf32>
    %217 = vector.extract_strided_slice %204 {offsets = [0, 64], sizes = [8, 32], strides = [1, 1]} : vector<8x128xf32> to vector<8x32xf32>
    %218 = math.tanh %217 : vector<8x32xf32>
    %219 = vector.extract_strided_slice %204 {offsets = [0, 96], sizes = [8, 32], strides = [1, 1]} : vector<8x128xf32> to vector<8x32xf32>
    %220 = arith.negf %219 : vector<8x32xf32>
    %221 = math.exp %220 : vector<8x32xf32>
    %cst_67 = arith.constant 1.000000e+00 : f32
    %222 = vector.broadcast %cst_67 : f32 to vector<8x32xf32>
    %223 = arith.addf %222, %221 : vector<8x32xf32>
    %224 = arith.divf %222, %223 : vector<8x32xf32>
    %225 = arith.mulf %165, %216 : vector<8x32xf32>
    %226 = arith.mulf %210, %218 : vector<8x32xf32>
    %227 = arith.addf %225, %226 : vector<8x32xf32>
    %228 = math.tanh %227 : vector<8x32xf32>
    %229 = arith.mulf %224, %228 : vector<8x32xf32>
    %cst_68 = arith.constant dense<0.000000e+00> : vector<8x128xf32>
    %230 = tpu.matmul %229, %12, %cst_68 {dimension_numbers = #tpu.dot_dimension_numbers<[1], [0], [0], [1], [0, 0, 1, 1], [], []>} : vector<8x32xf32>, vector<32x128xf32>, vector<8x128xf32> -> vector<8x128xf32>
    %231 = vector.broadcast %14 : vector<1x128xf32> to vector<8x128xf32>
    %232 = arith.addf %230, %231 : vector<8x128xf32>
    %cst_69 = arith.constant dense<0.000000e+00> : vector<8x128xf32>
    %233 = tpu.matmul %197, %13, %cst_69 {dimension_numbers = #tpu.dot_dimension_numbers<[1], [0], [0], [1], [0, 0, 1, 1], [], []>} : vector<8x32xf32>, vector<32x128xf32>, vector<8x128xf32> -> vector<8x128xf32>
    %234 = arith.addf %232, %233 : vector<8x128xf32>
    %235 = vector.extract_strided_slice %234 {offsets = [0, 0], sizes = [8, 32], strides = [1, 1]} : vector<8x128xf32> to vector<8x32xf32>
    %236 = arith.negf %235 : vector<8x32xf32>
    %237 = math.exp %236 : vector<8x32xf32>
    %cst_70 = arith.constant 1.000000e+00 : f32
    %238 = vector.broadcast %cst_70 : f32 to vector<8x32xf32>
    %239 = arith.addf %238, %237 : vector<8x32xf32>
    %240 = arith.divf %238, %239 : vector<8x32xf32>
    %241 = vector.extract_strided_slice %234 {offsets = [0, 32], sizes = [8, 32], strides = [1, 1]} : vector<8x128xf32> to vector<8x32xf32>
    %242 = arith.negf %241 : vector<8x32xf32>
    %243 = math.exp %242 : vector<8x32xf32>
    %cst_71 = arith.constant 1.000000e+00 : f32
    %244 = vector.broadcast %cst_71 : f32 to vector<8x32xf32>
    %245 = arith.addf %244, %243 : vector<8x32xf32>
    %246 = arith.divf %244, %245 : vector<8x32xf32>
    %247 = vector.extract_strided_slice %234 {offsets = [0, 64], sizes = [8, 32], strides = [1, 1]} : vector<8x128xf32> to vector<8x32xf32>
    %248 = math.tanh %247 : vector<8x32xf32>
    %249 = vector.extract_strided_slice %234 {offsets = [0, 96], sizes = [8, 32], strides = [1, 1]} : vector<8x128xf32> to vector<8x32xf32>
    %250 = arith.negf %249 : vector<8x32xf32>
    %251 = math.exp %250 : vector<8x32xf32>
    %cst_72 = arith.constant 1.000000e+00 : f32
    %252 = vector.broadcast %cst_72 : f32 to vector<8x32xf32>
    %253 = arith.addf %252, %251 : vector<8x32xf32>
    %254 = arith.divf %252, %253 : vector<8x32xf32>
    %255 = arith.mulf %195, %246 : vector<8x32xf32>
    %256 = arith.mulf %240, %248 : vector<8x32xf32>
    %257 = arith.addf %255, %256 : vector<8x32xf32>
    %258 = math.tanh %257 : vector<8x32xf32>
    %259 = arith.mulf %254, %258 : vector<8x32xf32>
    %c0_73 = arith.constant 0 : index
    %c3_74 = arith.constant 3 : index
    %c0_75 = arith.constant 0 : index
    %260 = vector.load %arg8[%c0_73, %c3_74, %c0_75] : memref<8x8x32xf32, #tpu.memory_space<vmem>>, vector<8x1x32xf32>
    %261 = vector.shape_cast %260 : vector<8x1x32xf32> to vector<8x32xf32>
    %262 = vector.shape_cast %259 : vector<8x32xf32> to vector<8x1x32xf32>
    tpu.vector_store %arg8[%c0_73, %c3_74, %c0_75], %262 {strides = array<i32>} : memref<8x8x32xf32, #tpu.memory_space<vmem>>, vector<8x1x32xf32>,
    %c0_76 = arith.constant 0 : index
    %c4 = arith.constant 4 : index
    %c0_77 = arith.constant 0 : index
    %263 = vector.load %arg1[%c0_76, %c4, %c0_77] : memref<8x8x128xf32, #tpu.memory_space<vmem>>, vector<8x1x128xf32>
    %264 = vector.shape_cast %263 : vector<8x1x128xf32> to vector<8x128xf32>
    %cst_78 = arith.constant dense<0.000000e+00> : vector<8x128xf32>
    %265 = tpu.matmul %229, %11, %cst_78 {dimension_numbers = #tpu.dot_dimension_numbers<[1], [0], [0], [1], [0, 0, 1, 1], [], []>} : vector<8x32xf32>, vector<32x128xf32>, vector<8x128xf32> -> vector<8x128xf32>
    %266 = arith.addf %264, %265 : vector<8x128xf32>
    %267 = vector.extract_strided_slice %266 {offsets = [0, 0], sizes = [8, 32], strides = [1, 1]} : vector<8x128xf32> to vector<8x32xf32>
    %268 = arith.negf %267 : vector<8x32xf32>
    %269 = math.exp %268 : vector<8x32xf32>
    %cst_79 = arith.constant 1.000000e+00 : f32
    %270 = vector.broadcast %cst_79 : f32 to vector<8x32xf32>
    %271 = arith.addf %270, %269 : vector<8x32xf32>
    %272 = arith.divf %270, %271 : vector<8x32xf32>
    %273 = vector.extract_strided_slice %266 {offsets = [0, 32], sizes = [8, 32], strides = [1, 1]} : vector<8x128xf32> to vector<8x32xf32>
    %274 = arith.negf %273 : vector<8x32xf32>
    %275 = math.exp %274 : vector<8x32xf32>
    %cst_80 = arith.constant 1.000000e+00 : f32
    %276 = vector.broadcast %cst_80 : f32 to vector<8x32xf32>
    %277 = arith.addf %276, %275 : vector<8x32xf32>
    %278 = arith.divf %276, %277 : vector<8x32xf32>
    %279 = vector.extract_strided_slice %266 {offsets = [0, 64], sizes = [8, 32], strides = [1, 1]} : vector<8x128xf32> to vector<8x32xf32>
    %280 = math.tanh %279 : vector<8x32xf32>
    %281 = vector.extract_strided_slice %266 {offsets = [0, 96], sizes = [8, 32], strides = [1, 1]} : vector<8x128xf32> to vector<8x32xf32>
    %282 = arith.negf %281 : vector<8x32xf32>
    %283 = math.exp %282 : vector<8x32xf32>
    %cst_81 = arith.constant 1.000000e+00 : f32
    %284 = vector.broadcast %cst_81 : f32 to vector<8x32xf32>
    %285 = arith.addf %284, %283 : vector<8x32xf32>
    %286 = arith.divf %284, %285 : vector<8x32xf32>
    %287 = arith.mulf %227, %278 : vector<8x32xf32>
    %288 = arith.mulf %272, %280 : vector<8x32xf32>
    %289 = arith.addf %287, %288 : vector<8x32xf32>
    %290 = math.tanh %289 : vector<8x32xf32>
    %291 = arith.mulf %286, %290 : vector<8x32xf32>
    %cst_82 = arith.constant dense<0.000000e+00> : vector<8x128xf32>
    %292 = tpu.matmul %291, %12, %cst_82 {dimension_numbers = #tpu.dot_dimension_numbers<[1], [0], [0], [1], [0, 0, 1, 1], [], []>} : vector<8x32xf32>, vector<32x128xf32>, vector<8x128xf32> -> vector<8x128xf32>
    %293 = vector.broadcast %14 : vector<1x128xf32> to vector<8x128xf32>
    %294 = arith.addf %292, %293 : vector<8x128xf32>
    %cst_83 = arith.constant dense<0.000000e+00> : vector<8x128xf32>
    %295 = tpu.matmul %259, %13, %cst_83 {dimension_numbers = #tpu.dot_dimension_numbers<[1], [0], [0], [1], [0, 0, 1, 1], [], []>} : vector<8x32xf32>, vector<32x128xf32>, vector<8x128xf32> -> vector<8x128xf32>
    %296 = arith.addf %294, %295 : vector<8x128xf32>
    %297 = vector.extract_strided_slice %296 {offsets = [0, 0], sizes = [8, 32], strides = [1, 1]} : vector<8x128xf32> to vector<8x32xf32>
    %298 = arith.negf %297 : vector<8x32xf32>
    %299 = math.exp %298 : vector<8x32xf32>
    %cst_84 = arith.constant 1.000000e+00 : f32
    %300 = vector.broadcast %cst_84 : f32 to vector<8x32xf32>
    %301 = arith.addf %300, %299 : vector<8x32xf32>
    %302 = arith.divf %300, %301 : vector<8x32xf32>
    %303 = vector.extract_strided_slice %296 {offsets = [0, 32], sizes = [8, 32], strides = [1, 1]} : vector<8x128xf32> to vector<8x32xf32>
    %304 = arith.negf %303 : vector<8x32xf32>
    %305 = math.exp %304 : vector<8x32xf32>
    %cst_85 = arith.constant 1.000000e+00 : f32
    %306 = vector.broadcast %cst_85 : f32 to vector<8x32xf32>
    %307 = arith.addf %306, %305 : vector<8x32xf32>
    %308 = arith.divf %306, %307 : vector<8x32xf32>
    %309 = vector.extract_strided_slice %296 {offsets = [0, 64], sizes = [8, 32], strides = [1, 1]} : vector<8x128xf32> to vector<8x32xf32>
    %310 = math.tanh %309 : vector<8x32xf32>
    %311 = vector.extract_strided_slice %296 {offsets = [0, 96], sizes = [8, 32], strides = [1, 1]} : vector<8x128xf32> to vector<8x32xf32>
    %312 = arith.negf %311 : vector<8x32xf32>
    %313 = math.exp %312 : vector<8x32xf32>
    %cst_86 = arith.constant 1.000000e+00 : f32
    %314 = vector.broadcast %cst_86 : f32 to vector<8x32xf32>
    %315 = arith.addf %314, %313 : vector<8x32xf32>
    %316 = arith.divf %314, %315 : vector<8x32xf32>
    %317 = arith.mulf %257, %308 : vector<8x32xf32>
    %318 = arith.mulf %302, %310 : vector<8x32xf32>
    %319 = arith.addf %317, %318 : vector<8x32xf32>
    %320 = math.tanh %319 : vector<8x32xf32>
    %321 = arith.mulf %316, %320 : vector<8x32xf32>
    %c0_87 = arith.constant 0 : index
    %c4_88 = arith.constant 4 : index
    %c0_89 = arith.constant 0 : index
    %322 = vector.load %arg8[%c0_87, %c4_88, %c0_89] : memref<8x8x32xf32, #tpu.memory_space<vmem>>, vector<8x1x32xf32>
    %323 = vector.shape_cast %322 : vector<8x1x32xf32> to vector<8x32xf32>
    %324 = vector.shape_cast %321 : vector<8x32xf32> to vector<8x1x32xf32>
    tpu.vector_store %arg8[%c0_87, %c4_88, %c0_89], %324 {strides = array<i32>} : memref<8x8x32xf32, #tpu.memory_space<vmem>>, vector<8x1x32xf32>,
    %c0_90 = arith.constant 0 : index
    %c5 = arith.constant 5 : index
    %c0_91 = arith.constant 0 : index
    %325 = vector.load %arg1[%c0_90, %c5, %c0_91] : memref<8x8x128xf32, #tpu.memory_space<vmem>>, vector<8x1x128xf32>
    %326 = vector.shape_cast %325 : vector<8x1x128xf32> to vector<8x128xf32>
    %cst_92 = arith.constant dense<0.000000e+00> : vector<8x128xf32>
    %327 = tpu.matmul %291, %11, %cst_92 {dimension_numbers = #tpu.dot_dimension_numbers<[1], [0], [0], [1], [0, 0, 1, 1], [], []>} : vector<8x32xf32>, vector<32x128xf32>, vector<8x128xf32> -> vector<8x128xf32>
    %328 = arith.addf %326, %327 : vector<8x128xf32>
    %329 = vector.extract_strided_slice %328 {offsets = [0, 0], sizes = [8, 32], strides = [1, 1]} : vector<8x128xf32> to vector<8x32xf32>
    %330 = arith.negf %329 : vector<8x32xf32>
    %331 = math.exp %330 : vector<8x32xf32>
    %cst_93 = arith.constant 1.000000e+00 : f32
    %332 = vector.broadcast %cst_93 : f32 to vector<8x32xf32>
    %333 = arith.addf %332, %331 : vector<8x32xf32>
    %334 = arith.divf %332, %333 : vector<8x32xf32>
    %335 = vector.extract_strided_slice %328 {offsets = [0, 32], sizes = [8, 32], strides = [1, 1]} : vector<8x128xf32> to vector<8x32xf32>
    %336 = arith.negf %335 : vector<8x32xf32>
    %337 = math.exp %336 : vector<8x32xf32>
    %cst_94 = arith.constant 1.000000e+00 : f32
    %338 = vector.broadcast %cst_94 : f32 to vector<8x32xf32>
    %339 = arith.addf %338, %337 : vector<8x32xf32>
    %340 = arith.divf %338, %339 : vector<8x32xf32>
    %341 = vector.extract_strided_slice %328 {offsets = [0, 64], sizes = [8, 32], strides = [1, 1]} : vector<8x128xf32> to vector<8x32xf32>
    %342 = math.tanh %341 : vector<8x32xf32>
    %343 = vector.extract_strided_slice %328 {offsets = [0, 96], sizes = [8, 32], strides = [1, 1]} : vector<8x128xf32> to vector<8x32xf32>
    %344 = arith.negf %343 : vector<8x32xf32>
    %345 = math.exp %344 : vector<8x32xf32>
    %cst_95 = arith.constant 1.000000e+00 : f32
    %346 = vector.broadcast %cst_95 : f32 to vector<8x32xf32>
    %347 = arith.addf %346, %345 : vector<8x32xf32>
    %348 = arith.divf %346, %347 : vector<8x32xf32>
    %349 = arith.mulf %289, %340 : vector<8x32xf32>
    %350 = arith.mulf %334, %342 : vector<8x32xf32>
    %351 = arith.addf %349, %350 : vector<8x32xf32>
    %352 = math.tanh %351 : vector<8x32xf32>
    %353 = arith.mulf %348, %352 : vector<8x32xf32>
    %cst_96 = arith.constant dense<0.000000e+00> : vector<8x128xf32>
    %354 = tpu.matmul %353, %12, %cst_96 {dimension_numbers = #tpu.dot_dimension_numbers<[1], [0], [0], [1], [0, 0, 1, 1], [], []>} : vector<8x32xf32>, vector<32x128xf32>, vector<8x128xf32> -> vector<8x128xf32>
    %355 = vector.broadcast %14 : vector<1x128xf32> to vector<8x128xf32>
    %356 = arith.addf %354, %355 : vector<8x128xf32>
    %cst_97 = arith.constant dense<0.000000e+00> : vector<8x128xf32>
    %357 = tpu.matmul %321, %13, %cst_97 {dimension_numbers = #tpu.dot_dimension_numbers<[1], [0], [0], [1], [0, 0, 1, 1], [], []>} : vector<8x32xf32>, vector<32x128xf32>, vector<8x128xf32> -> vector<8x128xf32>
    %358 = arith.addf %356, %357 : vector<8x128xf32>
    %359 = vector.extract_strided_slice %358 {offsets = [0, 0], sizes = [8, 32], strides = [1, 1]} : vector<8x128xf32> to vector<8x32xf32>
    %360 = arith.negf %359 : vector<8x32xf32>
    %361 = math.exp %360 : vector<8x32xf32>
    %cst_98 = arith.constant 1.000000e+00 : f32
    %362 = vector.broadcast %cst_98 : f32 to vector<8x32xf32>
    %363 = arith.addf %362, %361 : vector<8x32xf32>
    %364 = arith.divf %362, %363 : vector<8x32xf32>
    %365 = vector.extract_strided_slice %358 {offsets = [0, 32], sizes = [8, 32], strides = [1, 1]} : vector<8x128xf32> to vector<8x32xf32>
    %366 = arith.negf %365 : vector<8x32xf32>
    %367 = math.exp %366 : vector<8x32xf32>
    %cst_99 = arith.constant 1.000000e+00 : f32
    %368 = vector.broadcast %cst_99 : f32 to vector<8x32xf32>
    %369 = arith.addf %368, %367 : vector<8x32xf32>
    %370 = arith.divf %368, %369 : vector<8x32xf32>
    %371 = vector.extract_strided_slice %358 {offsets = [0, 64], sizes = [8, 32], strides = [1, 1]} : vector<8x128xf32> to vector<8x32xf32>
    %372 = math.tanh %371 : vector<8x32xf32>
    %373 = vector.extract_strided_slice %358 {offsets = [0, 96], sizes = [8, 32], strides = [1, 1]} : vector<8x128xf32> to vector<8x32xf32>
    %374 = arith.negf %373 : vector<8x32xf32>
    %375 = math.exp %374 : vector<8x32xf32>
    %cst_100 = arith.constant 1.000000e+00 : f32
    %376 = vector.broadcast %cst_100 : f32 to vector<8x32xf32>
    %377 = arith.addf %376, %375 : vector<8x32xf32>
    %378 = arith.divf %376, %377 : vector<8x32xf32>
    %379 = arith.mulf %319, %370 : vector<8x32xf32>
    %380 = arith.mulf %364, %372 : vector<8x32xf32>
    %381 = arith.addf %379, %380 : vector<8x32xf32>
    %382 = math.tanh %381 : vector<8x32xf32>
    %383 = arith.mulf %378, %382 : vector<8x32xf32>
    %c0_101 = arith.constant 0 : index
    %c5_102 = arith.constant 5 : index
    %c0_103 = arith.constant 0 : index
    %384 = vector.load %arg8[%c0_101, %c5_102, %c0_103] : memref<8x8x32xf32, #tpu.memory_space<vmem>>, vector<8x1x32xf32>
    %385 = vector.shape_cast %384 : vector<8x1x32xf32> to vector<8x32xf32>
    %386 = vector.shape_cast %383 : vector<8x32xf32> to vector<8x1x32xf32>
    tpu.vector_store %arg8[%c0_101, %c5_102, %c0_103], %386 {strides = array<i32>} : memref<8x8x32xf32, #tpu.memory_space<vmem>>, vector<8x1x32xf32>,
    %c0_104 = arith.constant 0 : index
    %c6 = arith.constant 6 : index
    %c0_105 = arith.constant 0 : index
    %387 = vector.load %arg1[%c0_104, %c6, %c0_105] : memref<8x8x128xf32, #tpu.memory_space<vmem>>, vector<8x1x128xf32>
    %388 = vector.shape_cast %387 : vector<8x1x128xf32> to vector<8x128xf32>
    %cst_106 = arith.constant dense<0.000000e+00> : vector<8x128xf32>
    %389 = tpu.matmul %353, %11, %cst_106 {dimension_numbers = #tpu.dot_dimension_numbers<[1], [0], [0], [1], [0, 0, 1, 1], [], []>} : vector<8x32xf32>, vector<32x128xf32>, vector<8x128xf32> -> vector<8x128xf32>
    %390 = arith.addf %388, %389 : vector<8x128xf32>
    %391 = vector.extract_strided_slice %390 {offsets = [0, 0], sizes = [8, 32], strides = [1, 1]} : vector<8x128xf32> to vector<8x32xf32>
    %392 = arith.negf %391 : vector<8x32xf32>
    %393 = math.exp %392 : vector<8x32xf32>
    %cst_107 = arith.constant 1.000000e+00 : f32
    %394 = vector.broadcast %cst_107 : f32 to vector<8x32xf32>
    %395 = arith.addf %394, %393 : vector<8x32xf32>
    %396 = arith.divf %394, %395 : vector<8x32xf32>
    %397 = vector.extract_strided_slice %390 {offsets = [0, 32], sizes = [8, 32], strides = [1, 1]} : vector<8x128xf32> to vector<8x32xf32>
    %398 = arith.negf %397 : vector<8x32xf32>
    %399 = math.exp %398 : vector<8x32xf32>
    %cst_108 = arith.constant 1.000000e+00 : f32
    %400 = vector.broadcast %cst_108 : f32 to vector<8x32xf32>
    %401 = arith.addf %400, %399 : vector<8x32xf32>
    %402 = arith.divf %400, %401 : vector<8x32xf32>
    %403 = vector.extract_strided_slice %390 {offsets = [0, 64], sizes = [8, 32], strides = [1, 1]} : vector<8x128xf32> to vector<8x32xf32>
    %404 = math.tanh %403 : vector<8x32xf32>
    %405 = vector.extract_strided_slice %390 {offsets = [0, 96], sizes = [8, 32], strides = [1, 1]} : vector<8x128xf32> to vector<8x32xf32>
    %406 = arith.negf %405 : vector<8x32xf32>
    %407 = math.exp %406 : vector<8x32xf32>
    %cst_109 = arith.constant 1.000000e+00 : f32
    %408 = vector.broadcast %cst_109 : f32 to vector<8x32xf32>
    %409 = arith.addf %408, %407 : vector<8x32xf32>
    %410 = arith.divf %408, %409 : vector<8x32xf32>
    %411 = arith.mulf %351, %402 : vector<8x32xf32>
    %412 = arith.mulf %396, %404 : vector<8x32xf32>
    %413 = arith.addf %411, %412 : vector<8x32xf32>
    %414 = math.tanh %413 : vector<8x32xf32>
    %415 = arith.mulf %410, %414 : vector<8x32xf32>
    %cst_110 = arith.constant dense<0.000000e+00> : vector<8x128xf32>
    %416 = tpu.matmul %415, %12, %cst_110 {dimension_numbers = #tpu.dot_dimension_numbers<[1], [0], [0], [1], [0, 0, 1, 1], [], []>} : vector<8x32xf32>, vector<32x128xf32>, vector<8x128xf32> -> vector<8x128xf32>
    %417 = vector.broadcast %14 : vector<1x128xf32> to vector<8x128xf32>
    %418 = arith.addf %416, %417 : vector<8x128xf32>
    %cst_111 = arith.constant dense<0.000000e+00> : vector<8x128xf32>
    %419 = tpu.matmul %383, %13, %cst_111 {dimension_numbers = #tpu.dot_dimension_numbers<[1], [0], [0], [1], [0, 0, 1, 1], [], []>} : vector<8x32xf32>, vector<32x128xf32>, vector<8x128xf32> -> vector<8x128xf32>
    %420 = arith.addf %418, %419 : vector<8x128xf32>
    %421 = vector.extract_strided_slice %420 {offsets = [0, 0], sizes = [8, 32], strides = [1, 1]} : vector<8x128xf32> to vector<8x32xf32>
    %422 = arith.negf %421 : vector<8x32xf32>
    %423 = math.exp %422 : vector<8x32xf32>
    %cst_112 = arith.constant 1.000000e+00 : f32
    %424 = vector.broadcast %cst_112 : f32 to vector<8x32xf32>
    %425 = arith.addf %424, %423 : vector<8x32xf32>
    %426 = arith.divf %424, %425 : vector<8x32xf32>
    %427 = vector.extract_strided_slice %420 {offsets = [0, 32], sizes = [8, 32], strides = [1, 1]} : vector<8x128xf32> to vector<8x32xf32>
    %428 = arith.negf %427 : vector<8x32xf32>
    %429 = math.exp %428 : vector<8x32xf32>
    %cst_113 = arith.constant 1.000000e+00 : f32
    %430 = vector.broadcast %cst_113 : f32 to vector<8x32xf32>
    %431 = arith.addf %430, %429 : vector<8x32xf32>
    %432 = arith.divf %430, %431 : vector<8x32xf32>
    %433 = vector.extract_strided_slice %420 {offsets = [0, 64], sizes = [8, 32], strides = [1, 1]} : vector<8x128xf32> to vector<8x32xf32>
    %434 = math.tanh %433 : vector<8x32xf32>
    %435 = vector.extract_strided_slice %420 {offsets = [0, 96], sizes = [8, 32], strides = [1, 1]} : vector<8x128xf32> to vector<8x32xf32>
    %436 = arith.negf %435 : vector<8x32xf32>
    %437 = math.exp %436 : vector<8x32xf32>
    %cst_114 = arith.constant 1.000000e+00 : f32
    %438 = vector.broadcast %cst_114 : f32 to vector<8x32xf32>
    %439 = arith.addf %438, %437 : vector<8x32xf32>
    %440 = arith.divf %438, %439 : vector<8x32xf32>
    %441 = arith.mulf %381, %432 : vector<8x32xf32>
    %442 = arith.mulf %426, %434 : vector<8x32xf32>
    %443 = arith.addf %441, %442 : vector<8x32xf32>
    %444 = math.tanh %443 : vector<8x32xf32>
    %445 = arith.mulf %440, %444 : vector<8x32xf32>
    %c0_115 = arith.constant 0 : index
    %c6_116 = arith.constant 6 : index
    %c0_117 = arith.constant 0 : index
    %446 = vector.load %arg8[%c0_115, %c6_116, %c0_117] : memref<8x8x32xf32, #tpu.memory_space<vmem>>, vector<8x1x32xf32>
    %447 = vector.shape_cast %446 : vector<8x1x32xf32> to vector<8x32xf32>
    %448 = vector.shape_cast %445 : vector<8x32xf32> to vector<8x1x32xf32>
    tpu.vector_store %arg8[%c0_115, %c6_116, %c0_117], %448 {strides = array<i32>} : memref<8x8x32xf32, #tpu.memory_space<vmem>>, vector<8x1x32xf32>,
    %c0_118 = arith.constant 0 : index
    %c7 = arith.constant 7 : index
    %c0_119 = arith.constant 0 : index
    %449 = vector.load %arg1[%c0_118, %c7, %c0_119] : memref<8x8x128xf32, #tpu.memory_space<vmem>>, vector<8x1x128xf32>
    %450 = vector.shape_cast %449 : vector<8x1x128xf32> to vector<8x128xf32>
    %cst_120 = arith.constant dense<0.000000e+00> : vector<8x128xf32>
    %451 = tpu.matmul %415, %11, %cst_120 {dimension_numbers = #tpu.dot_dimension_numbers<[1], [0], [0], [1], [0, 0, 1, 1], [], []>} : vector<8x32xf32>, vector<32x128xf32>, vector<8x128xf32> -> vector<8x128xf32>
    %452 = arith.addf %450, %451 : vector<8x128xf32>
    %453 = vector.extract_strided_slice %452 {offsets = [0, 0], sizes = [8, 32], strides = [1, 1]} : vector<8x128xf32> to vector<8x32xf32>
    %454 = arith.negf %453 : vector<8x32xf32>
    %455 = math.exp %454 : vector<8x32xf32>
    %cst_121 = arith.constant 1.000000e+00 : f32
    %456 = vector.broadcast %cst_121 : f32 to vector<8x32xf32>
    %457 = arith.addf %456, %455 : vector<8x32xf32>
    %458 = arith.divf %456, %457 : vector<8x32xf32>
    %459 = vector.extract_strided_slice %452 {offsets = [0, 32], sizes = [8, 32], strides = [1, 1]} : vector<8x128xf32> to vector<8x32xf32>
    %460 = arith.negf %459 : vector<8x32xf32>
    %461 = math.exp %460 : vector<8x32xf32>
    %cst_122 = arith.constant 1.000000e+00 : f32
    %462 = vector.broadcast %cst_122 : f32 to vector<8x32xf32>
    %463 = arith.addf %462, %461 : vector<8x32xf32>
    %464 = arith.divf %462, %463 : vector<8x32xf32>
    %465 = vector.extract_strided_slice %452 {offsets = [0, 64], sizes = [8, 32], strides = [1, 1]} : vector<8x128xf32> to vector<8x32xf32>
    %466 = math.tanh %465 : vector<8x32xf32>
    %467 = vector.extract_strided_slice %452 {offsets = [0, 96], sizes = [8, 32], strides = [1, 1]} : vector<8x128xf32> to vector<8x32xf32>
    %468 = arith.negf %467 : vector<8x32xf32>
    %469 = math.exp %468 : vector<8x32xf32>
    %cst_123 = arith.constant 1.000000e+00 : f32
    %470 = vector.broadcast %cst_123 : f32 to vector<8x32xf32>
    %471 = arith.addf %470, %469 : vector<8x32xf32>
    %472 = arith.divf %470, %471 : vector<8x32xf32>
    %473 = arith.mulf %413, %464 : vector<8x32xf32>
    %474 = arith.mulf %458, %466 : vector<8x32xf32>
    %475 = arith.addf %473, %474 : vector<8x32xf32>
    %476 = math.tanh %475 : vector<8x32xf32>
    %477 = arith.mulf %472, %476 : vector<8x32xf32>
    %cst_124 = arith.constant dense<0.000000e+00> : vector<8x128xf32>
    %478 = tpu.matmul %477, %12, %cst_124 {dimension_numbers = #tpu.dot_dimension_numbers<[1], [0], [0], [1], [0, 0, 1, 1], [], []>} : vector<8x32xf32>, vector<32x128xf32>, vector<8x128xf32> -> vector<8x128xf32>
    %479 = vector.broadcast %14 : vector<1x128xf32> to vector<8x128xf32>
    %480 = arith.addf %478, %479 : vector<8x128xf32>
    %cst_125 = arith.constant dense<0.000000e+00> : vector<8x128xf32>
    %481 = tpu.matmul %445, %13, %cst_125 {dimension_numbers = #tpu.dot_dimension_numbers<[1], [0], [0], [1], [0, 0, 1, 1], [], []>} : vector<8x32xf32>, vector<32x128xf32>, vector<8x128xf32> -> vector<8x128xf32>
    %482 = arith.addf %480, %481 : vector<8x128xf32>
    %483 = vector.extract_strided_slice %482 {offsets = [0, 0], sizes = [8, 32], strides = [1, 1]} : vector<8x128xf32> to vector<8x32xf32>
    %484 = arith.negf %483 : vector<8x32xf32>
    %485 = math.exp %484 : vector<8x32xf32>
    %cst_126 = arith.constant 1.000000e+00 : f32
    %486 = vector.broadcast %cst_126 : f32 to vector<8x32xf32>
    %487 = arith.addf %486, %485 : vector<8x32xf32>
    %488 = arith.divf %486, %487 : vector<8x32xf32>
    %489 = vector.extract_strided_slice %482 {offsets = [0, 32], sizes = [8, 32], strides = [1, 1]} : vector<8x128xf32> to vector<8x32xf32>
    %490 = arith.negf %489 : vector<8x32xf32>
    %491 = math.exp %490 : vector<8x32xf32>
    %cst_127 = arith.constant 1.000000e+00 : f32
    %492 = vector.broadcast %cst_127 : f32 to vector<8x32xf32>
    %493 = arith.addf %492, %491 : vector<8x32xf32>
    %494 = arith.divf %492, %493 : vector<8x32xf32>
    %495 = vector.extract_strided_slice %482 {offsets = [0, 64], sizes = [8, 32], strides = [1, 1]} : vector<8x128xf32> to vector<8x32xf32>
    %496 = math.tanh %495 : vector<8x32xf32>
    %497 = vector.extract_strided_slice %482 {offsets = [0, 96], sizes = [8, 32], strides = [1, 1]} : vector<8x128xf32> to vector<8x32xf32>
    %498 = arith.negf %497 : vector<8x32xf32>
    %499 = math.exp %498 : vector<8x32xf32>
    %cst_128 = arith.constant 1.000000e+00 : f32
    %500 = vector.broadcast %cst_128 : f32 to vector<8x32xf32>
    %501 = arith.addf %500, %499 : vector<8x32xf32>
    %502 = arith.divf %500, %501 : vector<8x32xf32>
    %503 = arith.mulf %443, %494 : vector<8x32xf32>
    %504 = arith.mulf %488, %496 : vector<8x32xf32>
    %505 = arith.addf %503, %504 : vector<8x32xf32>
    %506 = math.tanh %505 : vector<8x32xf32>
    %507 = arith.mulf %502, %506 : vector<8x32xf32>
    %c0_129 = arith.constant 0 : index
    %c7_130 = arith.constant 7 : index
    %c0_131 = arith.constant 0 : index
    %508 = vector.load %arg8[%c0_129, %c7_130, %c0_131] : memref<8x8x32xf32, #tpu.memory_space<vmem>>, vector<8x1x32xf32>
    %509 = vector.shape_cast %508 : vector<8x1x32xf32> to vector<8x32xf32>
    %510 = vector.shape_cast %507 : vector<8x32xf32> to vector<8x1x32xf32>
    tpu.vector_store %arg8[%c0_129, %c7_130, %c0_131], %510 {strides = array<i32>} : memref<8x8x32xf32, #tpu.memory_space<vmem>>, vector<8x1x32xf32>,
    %c0_132 = arith.constant 0 : index
    %c0_133 = arith.constant 0 : index
    %c0_134 = arith.constant 0 : index
    %511 = vector.load %arg9[%c0_132, %c0_133, %c0_134] : memref<2x8x32xf32, #tpu.memory_space<vmem>>, vector<1x8x32xf32>
    %512 = vector.shape_cast %511 : vector<1x8x32xf32> to vector<8x32xf32>
    %513 = vector.shape_cast %477 : vector<8x32xf32> to vector<1x8x32xf32>
    tpu.vector_store %arg9[%c0_132, %c0_133, %c0_134], %513 {strides = array<i32>} : memref<2x8x32xf32, #tpu.memory_space<vmem>>, vector<1x8x32xf32>,
    %c0_135 = arith.constant 0 : index
    %c0_136 = arith.constant 0 : index
    %c0_137 = arith.constant 0 : index
    %514 = vector.load %arg10[%c0_135, %c0_136, %c0_137] : memref<2x8x32xf32, #tpu.memory_space<vmem>>, vector<1x8x32xf32>
    %515 = vector.shape_cast %514 : vector<1x8x32xf32> to vector<8x32xf32>
    %516 = vector.shape_cast %475 : vector<8x32xf32> to vector<1x8x32xf32>
    tpu.vector_store %arg10[%c0_135, %c0_136, %c0_137], %516 {strides = array<i32>} : memref<2x8x32xf32, #tpu.memory_space<vmem>>, vector<1x8x32xf32>,
    %c1_138 = arith.constant 1 : index
    %c0_139 = arith.constant 0 : index
    %c0_140 = arith.constant 0 : index
    %517 = vector.load %arg9[%c1_138, %c0_139, %c0_140] : memref<2x8x32xf32, #tpu.memory_space<vmem>>, vector<1x8x32xf32>
    %518 = vector.shape_cast %517 : vector<1x8x32xf32> to vector<8x32xf32>
    %519 = vector.shape_cast %507 : vector<8x32xf32> to vector<1x8x32xf32>
    tpu.vector_store %arg9[%c1_138, %c0_139, %c0_140], %519 {strides = array<i32>} : memref<2x8x32xf32, #tpu.memory_space<vmem>>, vector<1x8x32xf32>,
    %c1_141 = arith.constant 1 : index
    %c0_142 = arith.constant 0 : index
    %c0_143 = arith.constant 0 : index
    %520 = vector.load %arg10[%c1_141, %c0_142, %c0_143] : memref<2x8x32xf32, #tpu.memory_space<vmem>>, vector<1x8x32xf32>
    %521 = vector.shape_cast %520 : vector<1x8x32xf32> to vector<8x32xf32>
    %522 = vector.shape_cast %505 : vector<8x32xf32> to vector<1x8x32xf32>
    tpu.vector_store %arg10[%c1_141, %c0_142, %c0_143], %522 {strides = array<i32>} : memref<2x8x32xf32, #tpu.memory_space<vmem>>, vector<1x8x32xf32>,
    return
  }
  func.func @transform_0(%arg0: i32) -> (i32, i32, i32) {
    %c0_i32 = arith.constant 0 : i32
    %c0_i32_0 = arith.constant 0 : i32
    %c0_i32_1 = arith.constant 0 : i32
    return %c0_i32, %arg0, %c0_i32_0 : i32, i32, i32
  }
  func.func @transform_1(%arg0: i32) -> (i32, i32, i32) {
    %c0_i32 = arith.constant 0 : i32
    %c0_i32_0 = arith.constant 0 : i32
    %c0_i32_1 = arith.constant 0 : i32
    %c0_i32_2 = arith.constant 0 : i32
    return %c0_i32, %c0_i32_0, %c0_i32_1 : i32, i32, i32
  }
  func.func @transform_2(%arg0: i32) -> (i32, i32, i32) {
    %c0_i32 = arith.constant 0 : i32
    %c0_i32_0 = arith.constant 0 : i32
    %c0_i32_1 = arith.constant 0 : i32
    %c0_i32_2 = arith.constant 0 : i32
    return %c0_i32, %c0_i32_0, %c0_i32_1 : i32, i32, i32
  }
  func.func @transform_3(%arg0: i32) -> (i32, i32) {
    %c0_i32 = arith.constant 0 : i32
    %c0_i32_0 = arith.constant 0 : i32
    %c0_i32_1 = arith.constant 0 : i32
    return %c0_i32, %c0_i32_0 : i32, i32
  }
  func.func @transform_4(%arg0: i32) -> (i32, i32) {
    %c0_i32 = arith.constant 0 : i32
    %c0_i32_0 = arith.constant 0 : i32
    %c0_i32_1 = arith.constant 0 : i32
    return %c0_i32, %c0_i32_0 : i32, i32
  }
  func.func @transform_5(%arg0: i32) -> (i32, i32) {
    %c0_i32 = arith.constant 0 : i32
    %c0_i32_0 = arith.constant 0 : i32
    %c0_i32_1 = arith.constant 0 : i32
    return %c0_i32, %c0_i32_0 : i32, i32
  }
  func.func @transform_6(%arg0: i32) -> (i32, i32) {
    %c0_i32 = arith.constant 0 : i32
    %c0_i32_0 = arith.constant 0 : i32
    %c0_i32_1 = arith.constant 0 : i32
    return %c0_i32, %c0_i32_0 : i32, i32
  }
  func.func @transform_7(%arg0: i32) -> (i32, i32, i32) {
    %c0_i32 = arith.constant 0 : i32
    %c0_i32_0 = arith.constant 0 : i32
    %c0_i32_1 = arith.constant 0 : i32
    return %c0_i32, %arg0, %c0_i32_0 : i32, i32, i32
  }
  func.func @transform_8(%arg0: i32) -> (i32, i32, i32) {
    %c0_i32 = arith.constant 0 : i32
    %c0_i32_0 = arith.constant 0 : i32
    %c0_i32_1 = arith.constant 0 : i32
    %c0_i32_2 = arith.constant 0 : i32
    return %c0_i32, %c0_i32_0, %c0_i32_1 : i32, i32, i32
  }
  func.func @transform_9(%arg0: i32) -> (i32, i32, i32) {
    %c0_i32 = arith.constant 0 : i32
    %c0_i32_0 = arith.constant 0 : i32
    %c0_i32_1 = arith.constant 0 : i32
    %c0_i32_2 = arith.constant 0 : i32
    return %c0_i32, %c0_i32_0, %c0_i32_1 : i32, i32, i32
  }
}

</mosaic_0001>

<bundles_post_ra>
// kernel: rnn_forward.3
= control target key start
LH: loop header
LB: loop body
LE: loop exit
PB: predicated region body
PF: predicated region fallthrough
CT: control target
= control target key end

     0   :  { %vm33_vm0 = vcmask 261120   ;;  %s319_s1 = inlined_call_operand.vmem [shape: f32[32,128], index: 1, kind: input, shape index: {}]   ;;  %s320_s0 = inlined_call_operand.vmem [shape: f32[64,32], index: 0, kind: input, shape index: {}]   ;;  %s321_s2 = inlined_call_operand.vmem [shape: f32[1,128], index: 2, kind: input, shape index: {}]   ;;  %s322_s3 = inlined_call_operand.vmem [shape: f32[64,128], index: 3, kind: output, shape index: {}]  }
   0x1   :  { %v22_v0 = vld [vmem:[%s319_s1] sm:$0xff]  ;;  %v23_v1 = vld [vmem:[%s319_s1 + $0x8] sm:$0xff]  ;;  %v24_v2 = vld [vmem:[%s319_s1 + $0x10] sm:$0xff] }
   0x2   :  { %v216_v3 = vpack.c.bf16 %v23_v1, %v22_v0  ;;  %v25_v4 = vld [vmem:[%s319_s1 + $0x18] sm:$0xff]  ;;  %v14_v5 = vld [vmem:[%s320_s0] sm:$0xff]  ;;  %v15_v8 = vld [vmem:[%s320_s0 + $0x8] sm:$0xff] }
   0x3   :  { %v18_v6 = vld [vmem:[%s320_s0 + $0x20] sm:$0xff]  ;;  %v220_v7 = vpack.c.bf16 %v25_v4, %v24_v2  ;;  %204 = vmatprep.mubr.msk.f32.mxu0 %vm33_vm0, %v14_v5  ;;  %v19_v9 = vld [vmem:[%s320_s0 + $0x28] sm:$0xff]  ;;  %v16_v10 = vld [vmem:[%s320_s0 + $0x10] sm:$0xff] }
   0x4   :  { %210 = vmatprep.mubr.msk.f32.mxu1 %vm33_vm0, %v18_v6  ;;  %217 = vmatprep.subr.bf16.mxu0 %v216_v3  ;;  %v20_v11 = vld [vmem:[%s320_s0 + $0x30] sm:$0xff]  ;;  %v17_v12 = vld [vmem:[%s320_s0 + $0x18] sm:$0xff]  ;;  %v175_v14 = vld [vmem:[%s321_s2] ss:$0 sm:$0xff] }
   0x5   :  { %224 = vmatprep.subr.bf16.mxu1 %v216_v3  ;;  %219 = vmatpush3.bf16.msra.mxu0 %v216_v3  ;;  %v21_v13 = vld [vmem:[%s320_s0 + $0x38] sm:$0xff] }
   0x6   :  { %226 = vmatpush3.bf16.msra.mxu1 %v216_v3  ;;  %221 = vmatprep.subr.bf16.mxu0 %v220_v7 }
   0x7   :  { %225 = vmatprep.subr.bf16.mxu1 %v220_v7 }
   0x9   :  { %223 = vmatpush3.bf16.msra.mxu0 %v220_v7 }
   0xa   :  { %227 = vmatpush3.bf16.msra.mxu1 %v220_v7 }
   0xc   :  { %205 = vmatmul.mubr.msk.f32.vlgmr.msra.gmra.mrb[0].mxu0 %vm33_vm0, %v15_v8 }
   0xd   :  { %211 = vmatmul.mubr.msk.f32.vlgmr.msra.gmra.mrb[0].mxu1 %vm33_vm0, %v19_v9  ;;  %207 = vmatprep.mubr.msk.f32.mxu0 %vm33_vm0, %v16_v10 }
   0xe   :  { %213 = vmatprep.mubr.msk.f32.mxu1 %vm33_vm0, %v20_v11 }
  0x10   :  { %208 = vmatmul.mubr.msk.f32.gmra.mrb[2].mxu0 %vm33_vm0, %v17_v12 }
  0x11   :  { %214 = vmatmul.mubr.msk.f32.gmra.mrb[2].mxu1 %vm33_vm0, %v21_v13 }
  0xdf   :  { %v206_v15 = vpop.f32.mrb[0].mxu0 }
  0xe0   :  { %v212_v16 = vpop.f32.mrb[0].mxu1  ;;  %v130_v17 = vadd.f32 %v206_v15, %v175_v14  ;;  %v124_v19 = vpop.f32.mrb[1].mxu0 }
  0xe1   :  { %v150_v18 = vadd.f32 %v212_v16, %v175_v14  ;;  %v144_v20 = vpop.f32.mrb[1].mxu1  ;;  %v125_v21 = vadd.f32 %v175_v14, %v124_v19 }
  0xe2   :  { %v145_v22 = vadd.f32 %v175_v14, %v144_v20  ;;  %164 = vst [vmem:[%s322_s3 + $0x8] sm:$0xff] %v130_v17 }
  0xe3   :  { %168 = vst [vmem:[%s322_s3 + $0x28] sm:$0xff] %v150_v18  ;;  %163 = vst [vmem:[%s322_s3] sm:$0xff] %v125_v21  ;;  %v209_v23 = vpop.f32.mrb[2].mxu0 }
  0xe4   :  { %167 = vst [vmem:[%s322_s3 + $0x20] sm:$0xff] %v145_v22  ;;  %v215_v24 = vpop.f32.mrb[2].mxu1  ;;  %v140_v25 = vadd.f32 %v209_v23, %v175_v14  ;;  %v134_v27 = vpop.f32.mrb[3].mxu0 }
  0xe5   :  { %v160_v26 = vadd.f32 %v215_v24, %v175_v14  ;;  %v154_v28 = vpop.f32.mrb[3].mxu1  ;;  %v135_v29 = vadd.f32 %v175_v14, %v134_v27 }
  0xe6   :  { %v155_v30 = vadd.f32 %v175_v14, %v154_v28  ;;  %166 = vst [vmem:[%s322_s3 + $0x18] sm:$0xff] %v140_v25 }
  0xe7   :  { %170 = vst [vmem:[%s322_s3 + $0x38] sm:$0xff] %v160_v26  ;;  %165 = vst [vmem:[%s322_s3 + $0x10] sm:$0xff] %v135_v29 }
  0xe8   :  { %169 = vst [vmem:[%s322_s3 + $0x30] sm:$0xff] %v155_v30 }

// kernel: rnn_forward.5
= control target key start
LH: loop header
LB: loop body
LE: loop exit
PB: predicated region body
PF: predicated region fallthrough
CT: control target
= control target key end

     0   :  { %vm34_vm0 = vcmask 261120   ;;  %s359_s0 = inlined_call_operand.vmem [shape: f32[64,32], index: 0, kind: input, shape index: {}]   ;;  %s360_s1 = inlined_call_operand.vmem [shape: f32[32,64], index: 1, kind: input, shape index: {}]   ;;  %s361_s2 = inlined_call_operand.vmem [shape: f32[1,64], index: 2, kind: input, shape index: {}]   ;;  %s362_s3 = inlined_call_operand.hbm [shape: f32[64,64], index: 3, kind: output, shape index: {}]  }
   0x1   :  { %v23_v0 = vld [vmem:[%s360_s1] sm:$0xff]  ;;  %v24_v1 = vld [vmem:[%s360_s1 + $0x8] sm:$0xff]  ;;  %v25_v2 = vld [vmem:[%s360_s1 + $0x10] sm:$0xff] }
   0x2   :  { %v230_v3 = vpack.c.bf16 %v24_v1, %v23_v0  ;;  %v26_v4 = vld [vmem:[%s360_s1 + $0x18] sm:$0xff]  ;;  %v15_v5 = vld [vmem:[%s359_s0] sm:$0xff] }
   0x3   :  { %v19_v6 = vld [vmem:[%s359_s0 + $0x20] sm:$0xff]  ;;  %v234_v7 = vpack.c.bf16 %v26_v4, %v25_v2  ;;  %218 = vmatprep.mubr.msk.f32.mxu0 %vm34_vm0, %v15_v5 }
   0x4   :  { %224 = vmatprep.mubr.msk.f32.mxu1 %vm34_vm0, %v19_v6  ;;  %231 = vmatprep.subr.bf16.mxu0 %v230_v3 }
   0x5   :  { %238 = vmatprep.subr.bf16.mxu1 %v230_v3  ;;  %233 = vmatpush3.bf16.msra.mxu0 %v230_v3 }
   0x6   :  { %240 = vmatpush3.bf16.msra.mxu1 %v230_v3 }
   0x7   :  { %8 = vsyncpa [#allocation3], 0  ;;  %235 = vmatprep.subr.bf16.mxu0 %v234_v7  ;;  %239 = vmatprep.subr.bf16.mxu1 %v234_v7  ;;  %v16_v8 = vld [vmem:[%s359_s0 + $0x8] sm:$0xff]  ;;  %v17_v10 = vld [vmem:[%s359_s0 + $0x10] sm:$0xff]  ;;  %vm164_vm1 = vcmask 523264   ;;  %s269_s10 = smov [#allocation2]  }
   0x8   :  { %v20_v9 = vld [vmem:[%s359_s0 + $0x28] sm:$0xff]  ;;  %v21_v11 = vld [vmem:[%s359_s0 + $0x30] sm:$0xff]  ;;  %v18_v12 = vld [vmem:[%s359_s0 + $0x18] sm:$0xff]  ;;  %s178_s11 = sshll.u32 %s269_s10, 4  ;;  %s179_s11 = int_to_ptr.vmem [resolvable:$true] %s178_s11 }
   0x9   :  { %237 = vmatpush3.bf16.msra.mxu0 %v234_v7  ;;  %v22_v13 = vld [vmem:[%s359_s0 + $0x38] sm:$0xff]  ;;  %v189_v14 = vld [vmem:[%s361_s2] ss:$0 sm:$0xff]  ;;  %s245_s0 = scalar_lea.vmem %s179_s11, 1024  ;;  %p250_p1 = scmp.lt.s32.totalorder %s179_s11, %s179_s11 }
   0xa   :  { %241 = vmatpush3.bf16.msra.mxu1 %v234_v7  ;;  %p246_p0 = scmp.ne.s32.totalorder %s179_s11, %s245_s0  ;;  %p251_p2 = scmp.lt.s32.totalorder %s245_s0, %s245_s0 }
   0xc   :  { %219 = vmatmul.mubr.msk.f32.vlgmr.msra.gmra.mrb[0].mxu0 %vm34_vm0, %v16_v8  ;;  %p252_p3 = por %p251_p2, %p250_p1 }
   0xd   :  { %225 = vmatmul.mubr.msk.f32.vlgmr.msra.gmra.mrb[0].mxu1 %vm34_vm0, %v20_v9  ;;  %221 = vmatprep.mubr.msk.f32.mxu0 %vm34_vm0, %v17_v10 }
   0xe   :  { %227 = vmatprep.mubr.msk.f32.mxu1 %vm34_vm0, %v21_v11  ;;  %p253_p4 = pnand %p252_p3, %p246_p0 }
  0x10   :  { %222 = vmatmul.mubr.msk.f32.gmra.mrb[2].mxu0 %vm34_vm0, %v18_v12 }
  0x11   :  { %228 = vmatmul.mubr.msk.f32.gmra.mrb[2].mxu1 %vm34_vm0, %v22_v13 }
  0xdf   :  { %v220_v15 = vpop.f32.mrb[0].mxu0 }
  0xe0   :  { %v226_v16 = vpop.f32.mrb[0].mxu1  ;;  %v131_v17 = vadd.f32 %v220_v15, %v189_v14  ;;  %v125_v19 = vpop.f32.mrb[1].mxu0 }
  0xe1   :  { %v151_v18 = vadd.f32 %v226_v16, %v189_v14  ;;  %v145_v20 = vpop.f32.mrb[1].mxu1  ;;  %v126_v21 = vadd.f32 %v189_v14, %v125_v19 }
  0xe2   :  { %v146_v22 = vadd.f32 %v189_v14, %v145_v20  ;;  %166 = vst.msk [vmem:[#allocation2 + $0x8] sm:$0xff] %vm164_vm1, %v131_v17 }
  0xe3   :  { %170 = vst.msk [vmem:[#allocation2 + $0x28] sm:$0xff] %vm164_vm1, %v151_v18  ;;  %165 = vst.msk [vmem:[#allocation2] sm:$0xff] %vm164_vm1, %v126_v21  ;;  %v223_v23 = vpop.f32.mrb[2].mxu0 }
  0xe4   :  { %169 = vst.msk [vmem:[#allocation2 + $0x20] sm:$0xff] %vm164_vm1, %v146_v22  ;;  %v229_v24 = vpop.f32.mrb[2].mxu1  ;;  %v141_v25 = vadd.f32 %v223_v23, %v189_v14  ;;  %v135_v27 = vpop.f32.mrb[3].mxu0 }
  0xe5   :  { %v161_v26 = vadd.f32 %v229_v24, %v189_v14  ;;  %v155_v28 = vpop.f32.mrb[3].mxu1  ;;  %v136_v29 = vadd.f32 %v189_v14, %v135_v27 }
  0xe6   :  { %v156_v30 = vadd.f32 %v189_v14, %v155_v28  ;;  %168 = vst.msk [vmem:[#allocation2 + $0x18] sm:$0xff] %vm164_vm1, %v141_v25 }
  0xe7   :  { %172 = vst.msk [vmem:[#allocation2 + $0x38] sm:$0xff] %vm164_vm1, %v161_v26  ;;  %167 = vst.msk [vmem:[#allocation2 + $0x10] sm:$0xff] %vm164_vm1, %v136_v29 }
  0xe8   :  { %171 = vst.msk [vmem:[#allocation2 + $0x30] sm:$0xff] %vm164_vm1, %v156_v30 }
  0xe9   :  { %256 = shalt.err (!%p253_p4)
}
  0xea   :  { %s257_s13 = scalar_lea.hbm %s362_s3, 1024 }
  0xeb   :  { %p258_p5 = scmp.ne.s32.totalorder %s362_s3, %s257_s13  ;;  %p261_p6 = scmp.lt.u32.totalorder %s257_s13, %s362_s3 }
  0xed   :  { %p263_p7 = pnand %p261_p6, %p258_p5 }
  0xef   :  { %266 = shalt.err (!%p263_p7)
}
  0xf0   :  { %s270_s18 = smov 128   ;;  %s271_s19 = smov 8  }
  0xf1   :  { %184 = dma.vmem_to_hbm [thread:$0]  %s179_s11, 1024, %s362_s3, [#allocation3], %s270_s18, %s270_s18, %s271_s19  }
  0xf2   :  { %267 = dma.done.wait [#allocation3], 1024  }
  0xf3   :  { %268 = vsyncadd [#allocation3], 4294966272 }
  0xf4   :  { %188 = vsyncpa [#allocation3], 1 }

// kernel: rnn_forward.4
= control target key start
LH: loop header
LB: loop body
LE: loop exit
PB: predicated region body
PF: predicated region fallthrough
CT: control target
= control target key end

     0   :  { %vm35_vm0 = vcmask 261120   ;;  %v6008_v0 = vmov 0.0|0.0   ;;  %vm6009_vm1 = vmmov 0   ;;  %v6010_v4 = vmov 0.0   ;;  %s6011_s20 = smov 64   ;;  %s7807_s3 = inlined_call_operand.vmem [shape: f32[32,128], index: 3, kind: input, shape index: {}]   ;;  %s7808_s1 = inlined_call_operand.vmem [shape: f32[2,8,32], index: 1, kind: input, shape index: {}, may-alias: {1,2}]   ;;  %s7809_s8 = inlined_call_operand.vmem [shape: f32[2,8,32], index: 8, kind: output, shape index: {1}]   ;;  %s7810_s0 = inlined_call_operand.vmem [shape: f32[8,8,128], index: 0, kind: input, shape index: {}]   ;;  %s7811_s2 = inlined_call_operand.vmem [shape: f32[2,8,32], index: 2, kind: input, shape index: {}, may-alias: {1,2}]   ;;  %s7812_s9 = inlined_call_operand.vmem [shape: f32[2,8,32], index: 9, kind: output, shape index: {2}]   ;;  %s7813_s4 = inlined_call_operand.vmem [shape: f32[32,128], index: 4, kind: input, shape index: {}]   ;;  %s7814_s5 = inlined_call_operand.vmem [shape: f32[32,128], index: 5, kind: input, shape index: {}]   ;;  %s7815_s6 = inlined_call_operand.vmem [shape: f32[1,128], index: 6, kind: input, shape index: {}]   ;;  %s7816_s7 = inlined_call_operand.vmem [shape: f32[8,8,32], index: 7, kind: output, shape index: {0}]  }
   0x1   :  { %5367 = vmatprep.subr.bf16.mxu1 %v6008_v0  ;;  %v48_v1 = vld [vmem:[%s7807_s3] sm:$0xff]  ;;  %v49_v2 = vld [vmem:[%s7807_s3 + $0x8] sm:$0xff]  ;;  %v50_v3 = vld [vmem:[%s7807_s3 + $0x10] sm:$0xff]  ;;  %5111 = vmatprep.mubr.msk.f32.mxu1 %vm6009_vm1, %v6010_v4  ;;  %vm232_vm2 = vcmask 1041409   ;;  %vm235_vm3 = vcmask 1042434   ;;  %vm238_vm4 = vcmask 1043459  }
   0x2   :  { %v6077_v5 = vpack.c.bf16 %v49_v2, %v48_v1  ;;  %v51_v6 = vld [vmem:[%s7807_s3 + $0x18] sm:$0xff]  ;;  %v33_v7 = vld [vmem:[%s7808_s1] sm:$0xff]  ;;  %v34_v8 = vld [vmem:[%s7808_s1 + $0x8] sm:$0xff]  ;;  %5385 = vmatprep.subr.bf16.mxu0 %v6008_v0  ;;  %5144 = vmatprep.mubr.msk.f32.mxu0 %vm6009_vm1, %v6010_v4  ;;  %vm241_vm5 = vcmask 1044484   ;;  %vm244_vm6 = vcmask 1045509   ;;  %vm247_vm7 = vcmask 1046534  }
   0x3   :  { %36 = vst.msk [vmem:[%s7809_s8] sm:$0xff] %vm35_vm0, %v33_v7  ;;  %37 = vst.msk [vmem:[%s7809_s8 + $0x8] sm:$0xff] %vm35_vm0, %v34_v8  ;;  %v6100_v9 = vpack.c.bf16 %v51_v6, %v50_v3  ;;  %v63_v11 = vld [vmem:[%s7810_s0 + $0x10] sm:$0x1]  ;;  %v64_v12 = vld [vmem:[%s7810_s0 + $0x18] sm:$0x1] }
   0x4   :  { %5369 = vmatpush3.bf16.msra.mxu1 %v6077_v5  ;;  %5387 = vmatpush3.bf16.msra.mxu0 %v6077_v5  ;;  %v61_v13 = vld [vmem:[%s7810_s0] sm:$0x1]  ;;  %v66_v15 = vld [vmem:[%s7810_s0 + $0x28] sm:$0x1]  ;;  %v67_v22 = vld [vmem:[%s7810_s0 + $0x30] sm:$0x1] }
   0x5   :  { %5370 = vmatprep.subr.bf16.mxu1 %v6008_v0  ;;  %5388 = vmatprep.subr.bf16.mxu0 %v6008_v0  ;;  %v65_v14 = vld [vmem:[%s7810_s0 + $0x20] sm:$0x1]  ;;  %v68_v29 = vld [vmem:[%s7810_s0 + $0x38] sm:$0x1]  ;;  %v62_v38 = vld [vmem:[%s7810_s0 + $0x8] sm:$0x1] }
   0x6   :  { %v38_v1 = vld [vmem:[%s7811_s2] sm:$0xff]  ;;  %v39_v6 = vld [vmem:[%s7811_s2 + $0x8] sm:$0xff]  ;;  %vm250_vm8 = vcmask 1047559   ;;  %s6012_s2 = smov 96   ;;  %vm667_vm9 = vcmask 253952  }
   0x7   :  { %40 = vst.msk [vmem:[%s7812_s9] sm:$0xff] %vm35_vm0, %v38_v1  ;;  %41 = vst.msk [vmem:[%s7812_s9 + $0x8] sm:$0xff] %vm35_vm0, %v39_v6 }
   0x8   :  { %5372 = vmatpush3.bf16.msra.mxu1 %v6100_v9  ;;  %5390 = vmatpush3.bf16.msra.mxu0 %v6100_v9 }
   0x9   :  { %5373 = vmatprep.subr.bf16.mxu1 %v6008_v0  ;;  %5391 = vmatprep.subr.bf16.mxu0 %v6008_v0 }
   0xa   :  { %v42_v10 = vld [vmem:[%s7809_s8] sm:$0xff] }
   0xb   :  { %5112 = vmatmul.mubr.msk.f32.vlgmr.msra.gmra.mrb[0].mxu1 %vm35_vm0, %v42_v10 }
   0xc   :  { %5122 = vmatprep.mubr.msk.f32.mxu1 %vm6009_vm1, %v6010_v4 }
  0xde   :  { %v139_v16 = vpop.f32.mrb[0].mxu1 }
  0xdf   :  { %v145_v17 = vrot.slane %v139_v16, 2  ;;  %v146_v18 = vrot.slane %v139_v16, 3  ;;  %v147_v19 = vrot.slane %v139_v16, 4  ;;  %v148_v20 = vrot.slane %v139_v16, 5  ;;  %v5113_v21 = vpop.f32.mrb[1].mxu1 }
  0xe0   :  { %v149_v23 = vrot.slane %v139_v16, 6  ;;  %v159_v24 = vadd.f32 %v139_v16, %v61_v13  ;;  %v150_v25 = vrot.slane %v139_v16, 7  ;;  %v144_v36 = vrot.slane %v139_v16, 1 }
  0xe1   :  { %v161_v26 = vadd.f32 %v145_v17, %v63_v11  ;;  %v162_v27 = vadd.f32 %v146_v18, %v64_v12  ;;  %v163_v28 = vadd.f32 %v147_v19, %v65_v14  ;;  %v164_v30 = vadd.f32 %v148_v20, %v66_v15 }
  0xe2   :  { %5542 = vtanh.f32 %v159_v24  ;;  %v165_v31 = vadd.f32 %v149_v23, %v67_v22  ;;  %v166_v34 = vadd.f32 %v150_v25, %v68_v29  ;;  %v160_v41 = vadd.f32 %v144_v36, %v62_v38 }
  0xe3   :  { %v4887_v32 = vmul.f32 -1.442695, %v161_v26  ;;  %v4888_v33 = vmul.f32 -1.442695, %v162_v27  ;;  %v4889_v35 = vmul.f32 -1.442695, %v163_v28  ;;  %5544 = vtanh.f32 %v162_v27 }
  0xe4   :  { %v4890_v37 = vmul.f32 -1.442695, %v164_v30  ;;  %v4891_v39 = vmul.f32 -1.442695, %v165_v31  ;;  %v4892_v40 = vmul.f32 -1.442695, %v166_v34 }
  0xe5   :  { %5546 = vpow2.f32 %v4887_v32  ;;  %v4885_v42 = vmul.f32 -1.442695, %v159_v24  ;;  %v4886_v44 = vmul.f32 -1.442695, %v160_v41 }
  0xe6   :  { %5548 = vpow2.f32 %v4888_v33 }
  0xe7   :  { %5550 = vpow2.f32 %v4889_v35 }
  0xe8   :  { %5552 = vpow2.f32 %v4890_v37 }
  0xe9   :  { %5554 = vpow2.f32 %v4891_v39 }
  0xea   :  { %5556 = vtanh.f32 %v164_v30 }
  0xeb   :  { %5558 = vpow2.f32 %v4892_v40 }
  0xec   :  { %v5543_v43 = vpop.eup %5542  ;;  %5560 = vtanh.f32 %v166_v34 }
  0xed   :  { %264 = vrot.lane.b32.xlu1 %v5543_v43, %s6011_s20  ;;  %5562 = vpow2.f32 %v4885_v42  ;;  %v5545_v45 = vpop.eup %5544 }
  0xee   :  { %5564 = vtanh.f32 %v160_v41 }
  0xef   :  { %v5547_v46 = vpop.eup %5546  ;;  %5566 = vpow2.f32 %v4886_v44 }
  0xf0   :  { %v5549_v47 = vpop.eup %5548  ;;  %5568 = vtanh.f32 %v161_v26  ;;  %v193_v53 = vadd.f32 1.0, %v5547_v46 }
  0xf1   :  { %270 = vrot.lane.b32.xlu1 %v5545_v45, %s6011_s20  ;;  %v5551_v48 = vpop.eup %5550  ;;  %v194_v55 = vadd.f32 1.0, %v5549_v47  ;;  %5570 = vtanh.f32 %v163_v28 }
  0xf2   :  { %v5553_v49 = vpop.eup %5552  ;;  %v195_v57 = vadd.f32 1.0, %v5551_v48  ;;  %5572 = vtanh.f32 %v165_v31 }
  0xf3   :  { %v5555_v50 = vpop.eup %5554  ;;  %v196_v60 = vadd.f32 1.0, %v5553_v49  ;;  %5574 = vrcp.f32 %v193_v53 }
  0xf4   :  { %v5557_v51 = vpop.eup %5556  ;;  %5576 = vrcp.f32 %v194_v55  ;;  %v197_v63 = vadd.f32 1.0, %v5555_v50 }
  0xf5   :  { %v5559_v52 = vpop.eup %5558  ;;  %274 = vrot.lane.b32.xlu1 %v5557_v51, %s6011_s20  ;;  %5578 = vrcp.f32 %v195_v57 }
  0xf6   :  { %v5561_v54 = vpop.eup %5560  ;;  %v198_v3 = vadd.f32 1.0, %v5559_v52 }
  0xf7   :  { %v5563_v56 = vpop.eup %5562 }
  0xf8   :  { %v5565_v58 = vpop.eup %5564  ;;  %v191_v61 = vadd.f32 1.0, %v5563_v56 }
  0xf9   :  { %v5567_v59 = vpop.eup %5566  ;;  %266 = vrot.lane.b32.xlu0 %v5565_v58, %s6011_s20  ;;  %278 = vrot.lane.b32.xlu1 %v5561_v54, %s6011_s20 }
  0xfa   :  { %v192_v62 = vadd.f32 1.0, %v5567_v59  ;;  %v5569_v2 = vpop.eup %5568  ;;  %v43_v59 = vld [vmem:[%s7812_s9] sm:$0xff] }
  0xfb   :  { %v5571_v7 = vpop.eup %5570 }
  0xfc   :  { %5580 = vrcp.f32 %v192_v62  ;;  %v5573_v8 = vpop.eup %5572 }
  0xfd   :  { %5582 = vrcp.f32 %v196_v60  ;;  %268 = vrot.lane.b32.xlu0 %v5569_v2, %s6011_s20  ;;  %v6160_v10 = vpop.eup %5574 }
  0xfe   :  { %5584 = vrcp.f32 %v191_v61  ;;  %v6162_v11 = vpop.eup %5576  ;;  %v234_v14 = vrot.slane %v6160_v10, 6 }
  0xff   :  { %5586 = vrcp.f32 %v197_v63  ;;  %v6164_v12 = vpop.eup %5578  ;;  %v237_v20 = vrot.slane %v6162_v11, 5 }
 0x100   :  { %5588 = vrcp.f32 %v198_v3  ;;  %v240_v23 = vrot.slane %v6164_v12, 4 }
 0x101   :  { %272 = vrot.lane.b32.xlu0 %v5571_v7, %s6011_s20 }
 0x105   :  { %276 = vrot.lane.b32.xlu0 %v5573_v8, %s6011_s20 }
 0x106   :  { %v6167_v13 = vpop.eup %5580 }
 0x107   :  { %v6170_v15 = vpop.eup %5582  ;;  %v231_v16 = vrot.slane %v6167_v13, 7 }
 0x108   :  { %v6173_v17 = vpop.eup %5584  ;;  %v243_v25 = vrot.slane %v6170_v15, 3 }
 0x109   :  { %v6175_v18 = vpop.eup %5586  ;;  %v233_v19 = vsel %vm232_vm2, %v231_v16, %v6173_v17  ;;  %v52_v16 = vld [vmem:[%s7813_s4] sm:$0xff] }
 0x10a   :  { %v6180_v21 = vpop.eup %5588  ;;  %v236_v22 = vsel %vm235_vm3, %v234_v14, %v233_v19  ;;  %v246_v27 = vrot.slane %v6175_v18, 2  ;;  %v53_v19 = vld [vmem:[%s7813_s4 + $0x8] sm:$0xff] }
 0x10b   :  { %v239_v24 = vsel %vm238_vm4, %v237_v20, %v236_v22  ;;  %v249_v29 = vrot.slane %v6180_v21, 1  ;;  %v54_v20 = vld [vmem:[%s7813_s4 + $0x10] sm:$0xff] }
 0x10c   :  { %v242_v26 = vsel %vm241_vm5, %v240_v23, %v239_v24  ;;  %v6228_v23 = vpack.c.bf16 %v53_v19, %v52_v16  ;;  %v55_v24 = vld [vmem:[%s7813_s4 + $0x18] sm:$0xff]  ;;  %s6013_s4 = smov 32  }
 0x10d   :  { %v245_v28 = vsel %vm244_vm6, %v243_v25, %v242_v26  ;;  %v6235_v26 = vpack.c.bf16 %v55_v24, %v54_v20 }
 0x10e   :  { %v248_v30 = vsel %vm247_vm7, %v246_v27, %v245_v28  ;;  %5375 = vmatpush3.bf16.msra.mxu1 %v6228_v23 }
 0x10f   :  { %v251_v31 = vsel %vm250_vm8, %v249_v29, %v248_v30  ;;  %5376 = vmatprep.subr.bf16.mxu1 %v6008_v0 }
 0x110   :  { %252 = vrot.lane.b32.xlu0 %v251_v31, %s6012_s2 }
 0x112   :  { %5378 = vmatpush3.bf16.msra.mxu1 %v6235_v26 }
 0x113   :  { %5379 = vmatprep.subr.bf16.mxu1 %v6008_v0 }
 0x15f   :  { %v265_v32 = vpop.permute.xlu1 %264 }
 0x160   :  { %v288_v43 = vmul.f32 %v6173_v17, %v265_v32 }
 0x163   :  { %v271_v34 = vpop.permute.xlu1 %270 }
 0x164   :  { %v291_v44 = vmul.f32 %v6162_v11, %v271_v34 }
 0x166   :  { %v308_v50 = vrot.slane %v291_v44, 5 }
 0x167   :  { %v275_v41 = vpop.permute.xlu1 %274 }
 0x168   :  { %v293_v51 = vmul.f32 %v6170_v15, %v275_v41 }
 0x16a   :  { %v312_v56 = vrot.slane %v293_v51, 3 }
 0x16b   :  { %v267_v33 = vpop.permute.xlu0 %266  ;;  %v279_v52 = vpop.permute.xlu1 %278 }
 0x16c   :  { %v289_v36 = vmul.f32 %v6167_v13, %v267_v33  ;;  %v295_v57 = vmul.f32 %v6180_v21, %v279_v52 }
 0x16e   :  { %v304_v39 = vrot.slane %v289_v36, 7  ;;  %v316_v61 = vrot.slane %v295_v57, 1  ;;  %v4882_v57 = vld [vmem:[%s7809_s8 + $0x8] sm:$0xff] }
 0x16f   :  { %v269_v35 = vpop.permute.xlu0 %268 }
 0x170   :  { %v290_v37 = vmul.f32 %v6160_v10, %v269_v35  ;;  %v305_v46 = vsel %vm232_vm2, %v304_v39, %v288_v43 }
 0x172   :  { %v306_v40 = vrot.slane %v290_v37, 6 }
 0x173   :  { %v273_v38 = vpop.permute.xlu0 %272 }
 0x174   :  { %v292_v42 = vmul.f32 %v6164_v12, %v273_v38  ;;  %v307_v47 = vsel %vm235_vm3, %v306_v40, %v305_v46 }
 0x175   :  { %v309_v53 = vsel %vm238_vm4, %v308_v50, %v307_v47 }
 0x176   :  { %v310_v48 = vrot.slane %v292_v42, 4 }
 0x177   :  { %v277_v45 = vpop.permute.xlu0 %276 }
 0x178   :  { %v294_v49 = vmul.f32 %v6175_v18, %v277_v45  ;;  %v311_v54 = vsel %vm241_vm5, %v310_v48, %v309_v53 }
 0x179   :  { %v313_v58 = vsel %vm244_vm6, %v312_v56, %v311_v54  ;;  %v59_v54 = vld [vmem:[%s7814_s5 + $0x18] sm:$0xff] }
 0x17a   :  { %v314_v55 = vrot.slane %v294_v49, 2 }
 0x17c   :  { %v315_v60 = vsel %vm247_vm7, %v314_v55, %v313_v58  ;;  %v676_v58 = vld [vmem:[%s7810_s0 + $0x1] sm:$0x1] }
 0x17d   :  { %v317_v1 = vsel %vm250_vm8, %v316_v61, %v315_v60  ;;  %v678_v60 = vld [vmem:[%s7810_s0 + $0x11] sm:$0x1]  ;;  %v679_v61 = vld [vmem:[%s7810_s0 + $0x19] sm:$0x1] }
 0x182   :  { %v253_v62 = vpop.permute.xlu0 %252 }
 0x183   :  { %v255_v63 = vmul.f32 %v253_v62, %v43_v59  ;;  %v677_v59 = vld [vmem:[%s7810_s0 + $0x9] sm:$0x1]  ;;  %v680_v62 = vld [vmem:[%s7810_s0 + $0x21] sm:$0x1] }
 0x185   :  { %v6211_v2 = vadd.f32 %v317_v1, %v255_v63  ;;  %v681_v63 = vld [vmem:[%s7810_s0 + $0x29] sm:$0x1]  ;;  %v682_v1 = vld [vmem:[%s7810_s0 + $0x31] sm:$0x1] }
 0x187   :  { %5590 = vtanh.f32 %v6211_v2 }
 0x191   :  { %v5591_v3 = vpop.eup %5590 }
 0x192   :  { %329 = vrot.lane.b32.xlu1 %v5591_v3, %s6012_s2  ;;  %v323_v6 = vrot.slane %v5591_v3, 2  ;;  %v322_v7 = vrot.slane %v5591_v3, 1  ;;  %v324_v8 = vrot.slane %v5591_v3, 3  ;;  %v325_v14 = vrot.slane %v5591_v3, 4 }
 0x193   :  { %v326_v22 = vrot.slane %v5591_v3, 5  ;;  %v327_v25 = vrot.slane %v5591_v3, 6  ;;  %v328_v27 = vrot.slane %v5591_v3, 7  ;;  %v683_v3 = vld [vmem:[%s7810_s0 + $0x39] sm:$0x1] }
 0x194   :  { %333 = vrot.lane.b32.xlu0 %v323_v6, %s6012_s2 }
 0x196   :  { %331 = vrot.lane.b32.xlu1 %v322_v7, %s6012_s2 }
 0x198   :  { %335 = vrot.lane.b32.xlu0 %v324_v8, %s6012_s2 }
 0x19a   :  { %337 = vrot.lane.b32.xlu1 %v325_v14, %s6012_s2 }
 0x19c   :  { %339 = vrot.lane.b32.xlu0 %v326_v22, %s6012_s2 }
 0x19e   :  { %341 = vrot.lane.b32.xlu1 %v327_v25, %s6012_s2 }
 0x1a0   :  { %343 = vrot.lane.b32.xlu0 %v328_v27, %s6012_s2 }
 0x204   :  { %v330_v28 = vpop.permute.xlu1 %329 }
 0x205   :  { %v353_v34 = vmul.f32 %v6173_v17, %v330_v28 }
 0x206   :  { %v334_v29 = vpop.permute.xlu0 %333 }
 0x207   :  { %v355_v30 = vmul.f32 %v6160_v10, %v334_v29 }
 0x208   :  { %v332_v31 = vpop.permute.xlu1 %331 }
 0x209   :  { %v354_v32 = vmul.f32 %v6167_v13, %v332_v31  ;;  %v377_v37 = vrot.slane %v355_v30, 6 }
 0x20a   :  { %v336_v33 = vpop.permute.xlu0 %335 }
 0x20b   :  { %v375_v35 = vrot.slane %v354_v32, 7  ;;  %v356_v36 = vmul.f32 %v6162_v11, %v336_v33 }
 0x20c   :  { %v338_v38 = vpop.permute.xlu1 %337 }
 0x20d   :  { %v376_v39 = vsel %vm232_vm2, %v375_v35, %v353_v34  ;;  %v379_v40 = vrot.slane %v356_v36, 5  ;;  %v357_v41 = vmul.f32 %v6164_v12, %v338_v38 }
 0x20e   :  { %v378_v42 = vsel %vm235_vm3, %v377_v37, %v376_v39  ;;  %v340_v43 = vpop.permute.xlu0 %339 }
 0x20f   :  { %v380_v10 = vsel %vm238_vm4, %v379_v40, %v378_v42  ;;  %v381_v44 = vrot.slane %v357_v41, 4  ;;  %v358_v13 = vmul.f32 %v6170_v15, %v340_v43  ;;  %v56_v15 = vld [vmem:[%s7814_s5] sm:$0xff] }
 0x210   :  { %v342_v45 = vpop.permute.xlu1 %341 }
 0x211   :  { %v382_v17 = vsel %vm241_vm5, %v381_v44, %v380_v10  ;;  %v383_v46 = vrot.slane %v358_v13, 3  ;;  %v359_v11 = vmul.f32 %v6175_v18, %v342_v45  ;;  %v57_v18 = vld [vmem:[%s7814_s5 + $0x8] sm:$0xff] }
 0x212   :  { %v344_v47 = vpop.permute.xlu0 %343  ;;  %v6264_v53 = vpack.c.bf16 %v57_v18, %v56_v15 }
 0x213   :  { %v385_v48 = vrot.slane %v359_v11, 2  ;;  %v360_v49 = vmul.f32 %v6180_v21, %v344_v47  ;;  %v384_v12 = vsel %vm244_vm6, %v383_v46, %v382_v17  ;;  %v58_v21 = vld [vmem:[%s7814_s5 + $0x10] sm:$0xff] }
 0x214   :  { %v6275_v56 = vpack.c.bf16 %v59_v54, %v58_v21 }
 0x215   :  { %v387_v50 = vrot.slane %v360_v49, 1  ;;  %v386_v51 = vsel %vm247_vm7, %v385_v48, %v384_v12 }
 0x217   :  { %v388_v52 = vsel %vm250_vm8, %v387_v50, %v386_v51 }
 0x218   :  { %389 = vrot.lane.b32.xlu1 %v388_v52, %s6013_s4 }
 0x28a   :  { %v390_v55 = vpop.permute.xlu1 %389 }
 0x28b   :  { %5123 = vmatmul.mubr.msk.f32.vlgmr.msra.gmra.mrb[2].mxu1 %vm35_vm0, %v390_v55  ;;  %5145 = vmatmul.mubr.msk.f32.vlgmr.msra.gmra.mrb[0].mxu0 %vm35_vm0, %v390_v55 }
 0x28c   :  { %5381 = vmatpush3.bf16.msra.mxu1 %v6264_v53  ;;  %5133 = vmatprep.mubr.msk.f32.mxu1 %vm6009_vm1, %v6010_v4 }
 0x28d   :  { %5382 = vmatprep.subr.bf16.mxu1 %v6008_v0  ;;  %5393 = vmatpush3.bf16.msra.mxu0 %v6228_v23 }
 0x28e   :  { %5394 = vmatprep.subr.bf16.mxu0 %v6008_v0  ;;  %5155 = vmatprep.mubr.msk.f32.mxu0 %vm6009_vm1, %v6010_v4 }
 0x290   :  { %5384 = vmatpush3.bf16.msra.mxu1 %v6275_v56 }
 0x291   :  { %5403 = vmatprep.subr.bf16.mxu1 %v6008_v0  ;;  %5396 = vmatpush3.bf16.msra.mxu0 %v6235_v26 }
 0x292   :  { %5397 = vmatprep.subr.bf16.mxu0 %v6008_v0 }
 0x293   :  { %5134 = vmatmul.mubr.msk.f32.vlgmr.msra.gmra.mrb[2].mxu1 %vm35_vm0, %v4882_v57 }
 0x294   :  { %5405 = vmatpush3.bf16.msra.mxu1 %v6077_v5  ;;  %5177 = vmatprep.mubr.msk.f32.mxu1 %vm6009_vm1, %v6010_v4 }
 0x295   :  { %5406 = vmatprep.subr.bf16.mxu1 %v6008_v0 }
 0x298   :  { %5408 = vmatpush3.bf16.msra.mxu1 %v6100_v9 }
 0x299   :  { %5409 = vmatprep.subr.bf16.mxu1 %v6008_v0 }
 0x35e   :  { %v750_v6 = vpop.f32.mrb[0].mxu0 }
 0x35f   :  { %v755_v7 = vrot.slane %v750_v6, 1  ;;  %v756_v8 = vrot.slane %v750_v6, 2  ;;  %v757_v14 = vrot.slane %v750_v6, 3  ;;  %v758_v16 = vrot.slane %v750_v6, 4  ;;  %v5146_v19 = vpop.f32.mrb[1].mxu0 }
 0x360   :  { %v759_v20 = vrot.slane %v750_v6, 5  ;;  %v760_v22 = vrot.slane %v750_v6, 6  ;;  %v761_v24 = vrot.slane %v750_v6, 7  ;;  %v770_v25 = vadd.f32 %v750_v6, %v676_v58 }
 0x361   :  { %v771_v27 = vadd.f32 %v755_v7, %v677_v59  ;;  %v772_v28 = vadd.f32 %v756_v8, %v678_v60  ;;  %v773_v29 = vadd.f32 %v757_v14, %v679_v61  ;;  %v774_v30 = vadd.f32 %v758_v16, %v680_v62 }
 0x362   :  { %v775_v31 = vadd.f32 %v759_v20, %v681_v63  ;;  %v776_v32 = vadd.f32 %v760_v22, %v682_v1  ;;  %v777_v33 = vadd.f32 %v761_v24, %v683_v3  ;;  %v4898_v34 = vmul.f32 -1.442695, %v770_v25 }
 0x363   :  { %v4899_v35 = vmul.f32 -1.442695, %v771_v27  ;;  %v4900_v36 = vmul.f32 -1.442695, %v772_v28  ;;  %v4901_v37 = vmul.f32 -1.442695, %v773_v29  ;;  %5592 = vtanh.f32 %v770_v25 }
 0x364   :  { %5594 = vpow2.f32 %v4898_v34  ;;  %v4902_v38 = vmul.f32 -1.442695, %v774_v30  ;;  %v4903_v39 = vmul.f32 -1.442695, %v775_v31  ;;  %v4904_v40 = vmul.f32 -1.442695, %v776_v32 }
 0x365   :  { %5596 = vpow2.f32 %v4899_v35  ;;  %v4905_v42 = vmul.f32 -1.442695, %v777_v33 }
 0x366   :  { %5598 = vpow2.f32 %v4900_v36  ;;  %v6322_v41 = vpop.f32.mrb[2].mxu1 }
 0x367   :  { %5600 = vpow2.f32 %v4901_v37  ;;  %v5135_v43 = vpop.f32.mrb[3].mxu1 }
 0x368   :  { %5602 = vpow2.f32 %v4902_v38 }
 0x369   :  { %5604 = vpow2.f32 %v4903_v39 }
 0x36a   :  { %5606 = vpow2.f32 %v4904_v40 }
 0x36b   :  { %5608 = vpow2.f32 %v4905_v42 }
 0x36c   :  { %5610 = vtanh.f32 %v771_v27 }
 0x36d   :  { %v5593_v10 = vpop.eup %5592  ;;  %5612 = vtanh.f32 %v772_v28 }
 0x36e   :  { %v5595_v44 = vpop.eup %5594  ;;  %5614 = vtanh.f32 %v773_v29  ;;  %868 = vrot.lane.b32.xlu0 %v5593_v10, %s6011_s20 }
 0x36f   :  { %v5597_v13 = vpop.eup %5596  ;;  %v802_v45 = vadd.f32 1.0, %v5595_v44  ;;  %5616 = vtanh.f32 %v774_v30 }
 0x370   :  { %v5599_v17 = vpop.eup %5598  ;;  %v803_v46 = vadd.f32 1.0, %v5597_v13  ;;  %5618 = vtanh.f32 %v775_v31 }
 0x371   :  { %v5601_v11 = vpop.eup %5600  ;;  %v804_v47 = vadd.f32 1.0, %v5599_v17  ;;  %5620 = vrcp.f32 %v802_v45 }
 0x372   :  { %v5603_v48 = vpop.eup %5602  ;;  %v805_v49 = vadd.f32 1.0, %v5601_v11  ;;  %5622 = vrcp.f32 %v803_v46 }
 0x373   :  { %v5605_v12 = vpop.eup %5604  ;;  %v806_v50 = vadd.f32 1.0, %v5603_v48  ;;  %5624 = vrcp.f32 %v804_v47 }
 0x374   :  { %v5607_v51 = vpop.eup %5606  ;;  %v807_v52 = vadd.f32 1.0, %v5605_v12  ;;  %5626 = vrcp.f32 %v805_v49 }
 0x375   :  { %v5609_v15 = vpop.eup %5608  ;;  %v808_v18 = vadd.f32 1.0, %v5607_v51  ;;  %5628 = vrcp.f32 %v806_v50  ;;  %v6376_v50 = vld [vmem:[%s7815_s6] ss:$0 sm:$0xff] }
 0x376   :  { %v5611_v21 = vpop.eup %5610  ;;  %v809_v54 = vadd.f32 1.0, %v5609_v15  ;;  %5630 = vrcp.f32 %v807_v52 }
 0x377   :  { %v5613_v55 = vpop.eup %5612  ;;  %5632 = vrcp.f32 %v808_v18  ;;  %870 = vrot.lane.b32.xlu0 %v5611_v21, %s6011_s20 }
 0x378   :  { %v5615_v57 = vpop.eup %5614  ;;  %5634 = vrcp.f32 %v809_v54  ;;  %872 = vrot.lane.b32.xlu1 %v5613_v55, %s6011_s20  ;;  %v5511_v54 = vadd.f32 %v6376_v50, %v6322_v41 }
 0x379   :  { %v5617_v58 = vpop.eup %5616  ;;  %5636 = vtanh.f32 %v776_v32 }
 0x37a   :  { %v5619_v59 = vpop.eup %5618  ;;  %5638 = vtanh.f32 %v777_v33 }
 0x37b   :  { %v6327_v60 = vpop.eup %5620  ;;  %876 = vrot.lane.b32.xlu0 %v5617_v58, %s6011_s20 }
 0x37c   :  { %v6330_v61 = vpop.eup %5622  ;;  %874 = vrot.lane.b32.xlu1 %v5615_v57, %s6011_s20 }
 0x37d   :  { %v6333_v62 = vpop.eup %5624  ;;  %v842_v63 = vrot.slane %v6330_v61, 7 }
 0x37e   :  { %v6336_v1 = vpop.eup %5626  ;;  %v844_v3 = vrot.slane %v6333_v62, 6 }
 0x37f   :  { %v6339_v6 = vpop.eup %5628  ;;  %v843_v7 = vsel %vm232_vm2, %v842_v63, %v6327_v60  ;;  %v846_v8 = vrot.slane %v6336_v1, 5 }
 0x380   :  { %v6344_v14 = vpop.eup %5630  ;;  %878 = vrot.lane.b32.xlu1 %v5619_v59, %s6011_s20  ;;  %v845_v16 = vsel %vm235_vm3, %v844_v3, %v843_v7  ;;  %v848_v19 = vrot.slane %v6339_v6, 4 }
 0x381   :  { %v6349_v20 = vpop.eup %5632  ;;  %v847_v22 = vsel %vm238_vm4, %v846_v8, %v845_v16  ;;  %v850_v24 = vrot.slane %v6344_v14, 3  ;;  %v4896_v8 = vmul.f32 -1.442695, %v5511_v54 }
 0x382   :  { %v6353_v25 = vpop.eup %5634  ;;  %v849_v27 = vsel %vm241_vm5, %v848_v19, %v847_v22  ;;  %v852_v28 = vrot.slane %v6349_v20, 2 }
 0x383   :  { %v5637_v29 = vpop.eup %5636  ;;  %v851_v30 = vsel %vm244_vm6, %v850_v24, %v849_v27  ;;  %v854_v31 = vrot.slane %v6353_v25, 1 }
 0x384   :  { %v5639_v32 = vpop.eup %5638  ;;  %880 = vrot.lane.b32.xlu0 %v5637_v29, %s6011_s20  ;;  %v853_v33 = vsel %vm247_vm7, %v852_v28, %v851_v30 }
 0x385   :  { %882 = vrot.lane.b32.xlu1 %v5639_v32, %s6011_s20  ;;  %v855_v34 = vsel %vm250_vm8, %v854_v31, %v853_v33 }
 0x388   :  { %856 = vrot.lane.b32.xlu0 %v855_v34, %s6012_s2 }
 0x3e0   :  { %v869_v35 = vpop.permute.xlu0 %868 }
 0x3e1   :  { %v892_v40 = vmul.f32 %v6327_v60, %v869_v35 }
 0x3e9   :  { %v871_v36 = vpop.permute.xlu0 %870 }
 0x3ea   :  { %v873_v37 = vpop.permute.xlu1 %872  ;;  %v893_v38 = vmul.f32 %v6330_v61, %v871_v36 }
 0x3eb   :  { %v894_v39 = vmul.f32 %v6333_v62, %v873_v37 }
 0x3ec   :  { %v908_v42 = vrot.slane %v893_v38, 7 }
 0x3ed   :  { %v877_v43 = vpop.permute.xlu0 %876  ;;  %v910_v10 = vrot.slane %v894_v39, 6 }
 0x3ee   :  { %v909_v44 = vsel %vm232_vm2, %v908_v42, %v892_v40  ;;  %v875_v13 = vpop.permute.xlu1 %874  ;;  %v896_v45 = vmul.f32 %v6339_v6, %v877_v43 }
 0x3ef   :  { %v895_v17 = vmul.f32 %v6336_v1, %v875_v13  ;;  %v911_v46 = vsel %vm235_vm3, %v910_v10, %v909_v44 }
 0x3f0   :  { %v914_v47 = vrot.slane %v896_v45, 4 }
 0x3f1   :  { %v912_v11 = vrot.slane %v895_v17, 5 }
 0x3f2   :  { %v879_v48 = vpop.permute.xlu1 %878 }
 0x3f3   :  { %v913_v49 = vsel %vm238_vm4, %v912_v11, %v911_v46  ;;  %v897_v12 = vmul.f32 %v6344_v14, %v879_v48 }
 0x3f4   :  { %v915_v51 = vsel %vm241_vm5, %v914_v47, %v913_v49 }
 0x3f5   :  { %v916_v52 = vrot.slane %v897_v12, 3 }
 0x3f6   :  { %v881_v15 = vpop.permute.xlu0 %880 }
 0x3f7   :  { %v898_v18 = vmul.f32 %v6349_v20, %v881_v15  ;;  %v883_v21 = vpop.permute.xlu1 %882  ;;  %v917_v55 = vsel %vm244_vm6, %v916_v52, %v915_v51 }
 0x3f8   :  { %v899_v57 = vmul.f32 %v6353_v25, %v883_v21 }
 0x3f9   :  { %v918_v58 = vrot.slane %v898_v18, 2 }
 0x3fa   :  { %v920_v59 = vrot.slane %v899_v57, 1  ;;  %v857_v63 = vpop.permute.xlu0 %856 }
 0x3fb   :  { %v919_v3 = vsel %vm247_vm7, %v918_v58, %v917_v55  ;;  %v859_v7 = vmul.f32 %v857_v63, %v6211_v2 }
 0x3fc   :  { %v921_v16 = vsel %vm250_vm8, %v920_v59, %v919_v3 }
 0x3fd   :  { %v6387_v19 = vadd.f32 %v921_v16, %v859_v7  ;;  %v1275_v16 = vld [vmem:[%s7810_s0 + $0xa] sm:$0x1] }
 0x3ff   :  { %5640 = vtanh.f32 %v6387_v19 }
 0x400   :  { %5642 = vpow2.f32 %v4896_v8  ;;  %v1274_v8 = vld [vmem:[%s7810_s0 + $0x2] sm:$0x1] }
 0x409   :  { %v5641_v41 = vpop.eup %5640 }
 0x40a   :  { %v5643_v22 = vpop.eup %5642  ;;  %933 = vrot.lane.b32.xlu1 %v5641_v41, %s6012_s2  ;;  %v927_v24 = vrot.slane %v5641_v41, 2  ;;  %v926_v27 = vrot.slane %v5641_v41, 1  ;;  %v928_v2 = vrot.slane %v5641_v41, 3  ;;  %v929_v29 = vrot.slane %v5641_v41, 4 }
 0x40b   :  { %v540_v28 = vadd.f32 1.0, %v5643_v22  ;;  %v930_v30 = vrot.slane %v5641_v41, 5  ;;  %v931_v31 = vrot.slane %v5641_v41, 6  ;;  %v932_v32 = vrot.slane %v5641_v41, 7  ;;  %v1276_v41 = vld [vmem:[%s7810_s0 + $0x12] sm:$0x1] }
 0x40c   :  { %937 = vrot.lane.b32.xlu0 %v927_v24, %s6012_s2  ;;  %v1277_v22 = vld [vmem:[%s7810_s0 + $0x1a] sm:$0x1]  ;;  %v1278_v24 = vld [vmem:[%s7810_s0 + $0x22] sm:$0x1] }
 0x40d   :  { %5644 = vrcp.f32 %v540_v28  ;;  %v1280_v28 = vld [vmem:[%s7810_s0 + $0x32] sm:$0x1] }
 0x40e   :  { %935 = vrot.lane.b32.xlu1 %v926_v27, %s6012_s2  ;;  %5646 = vtanh.f32 %v5511_v54  ;;  %v1279_v27 = vld [vmem:[%s7810_s0 + $0x2a] sm:$0x1] }
 0x410   :  { %939 = vrot.lane.b32.xlu0 %v928_v2, %s6012_s2  ;;  %v1281_v2 = vld [vmem:[%s7810_s0 + $0x3a] sm:$0x1] }
 0x412   :  { %941 = vrot.lane.b32.xlu1 %v929_v29, %s6012_s2 }
 0x414   :  { %943 = vrot.lane.b32.xlu0 %v930_v30, %s6012_s2 }
 0x416   :  { %945 = vrot.lane.b32.xlu1 %v931_v31, %s6012_s2 }
 0x417   :  { %v5645_v33 = vpop.eup %5644 }
 0x418   :  { %947 = vrot.lane.b32.xlu0 %v932_v32, %s6012_s2 }
 0x41c   :  { %545 = vrot.lane.b32.xlu0 %v5645_v33, %s6012_s2 }
 0x47c   :  { %v934_v34 = vpop.permute.xlu1 %933 }
 0x47d   :  { %v957_v40 = vmul.f32 %v6327_v60, %v934_v34 }
 0x47e   :  { %v938_v35 = vpop.permute.xlu0 %937 }
 0x47f   :  { %v959_v36 = vmul.f32 %v6333_v62, %v938_v35 }
 0x480   :  { %v936_v37 = vpop.permute.xlu1 %935 }
 0x481   :  { %v958_v38 = vmul.f32 %v6330_v61, %v936_v37  ;;  %v975_v10 = vrot.slane %v959_v36, 6 }
 0x482   :  { %v940_v39 = vpop.permute.xlu0 %939 }
 0x483   :  { %v973_v42 = vrot.slane %v958_v38, 7  ;;  %v960_v43 = vmul.f32 %v6336_v1, %v940_v39 }
 0x484   :  { %v942_v44 = vpop.permute.xlu1 %941 }
 0x485   :  { %v974_v13 = vsel %vm232_vm2, %v973_v42, %v957_v40  ;;  %v977_v45 = vrot.slane %v960_v43, 5  ;;  %v961_v17 = vmul.f32 %v6339_v6, %v942_v44 }
 0x486   :  { %v976_v46 = vsel %vm235_vm3, %v975_v10, %v974_v13  ;;  %v944_v11 = vpop.permute.xlu0 %943 }
 0x487   :  { %v978_v62 = vsel %vm238_vm4, %v977_v45, %v976_v46  ;;  %v979_v47 = vrot.slane %v961_v17, 4  ;;  %v962_v61 = vmul.f32 %v6344_v14, %v944_v11  ;;  %v5647_v14 = vpop.eup %5646 }
 0x488   :  { %v946_v48 = vpop.permute.xlu1 %945 }
 0x489   :  { %v980_v60 = vsel %vm241_vm5, %v979_v47, %v978_v62  ;;  %v981_v1 = vrot.slane %v962_v61, 3  ;;  %v963_v49 = vmul.f32 %v6349_v20, %v946_v48  ;;  %v4883_v20 = vld [vmem:[%s7812_s9 + $0x8] sm:$0xff] }
 0x48a   :  { %v948_v12 = vpop.permute.xlu0 %947 }
 0x48b   :  { %v983_v51 = vrot.slane %v963_v49, 2  ;;  %v964_v52 = vmul.f32 %v6353_v25, %v948_v12  ;;  %v982_v6 = vsel %vm244_vm6, %v981_v1, %v980_v60 }
 0x48d   :  { %v985_v15 = vrot.slane %v964_v52, 1  ;;  %v984_v18 = vsel %vm247_vm7, %v983_v51, %v982_v6 }
 0x48e   :  { %v546_v25 = vpop.permute.xlu0 %545 }
 0x48f   :  { %v986_v21 = vsel %vm250_vm8, %v985_v15, %v984_v18  ;;  %v548_v57 = vmul.f32 %v4883_v20, %v546_v25 }
 0x490   :  { %987 = vrot.lane.b32.xlu1 %v986_v21, %s6013_s4 }
 0x494   :  { %550 = vrot.lane.b32.xlu1 %v5647_v14, %s6011_s20 }
 0x502   :  { %v988_v54 = vpop.permute.xlu1 %987 }
 0x503   :  { %5156 = vmatmul.mubr.msk.f32.vlgmr.msra.gmra.mrb[2].mxu0 %vm35_vm0, %v988_v54  ;;  %5178 = vmatmul.mubr.msk.f32.vlgmr.msra.gmra.mrb[4].mxu1 %vm35_vm0, %v988_v54 }
 0x504   :  { %5399 = vmatpush3.bf16.msra.mxu0 %v6264_v53  ;;  %5166 = vmatprep.mubr.msk.f32.mxu0 %vm6009_vm1, %v6010_v4 }
 0x505   :  { %5400 = vmatprep.subr.bf16.mxu0 %v6008_v0  ;;  %5411 = vmatpush3.bf16.msra.mxu1 %v6228_v23 }
 0x506   :  { %v551_v55 = vpop.permute.xlu1 %550  ;;  %5412 = vmatprep.subr.bf16.mxu1 %v6008_v0  ;;  %5188 = vmatprep.mubr.msk.f32.mxu1 %vm6009_vm1, %v6010_v4 }
 0x507   :  { %v553_v58 = vmul.f32 %v5645_v33, %v551_v55 }
 0x508   :  { %5402 = vmatpush3.bf16.msra.mxu0 %v6275_v56 }
 0x509   :  { %v6430_v59 = vadd.f32 %v553_v58, %v548_v57  ;;  %5421 = vmatprep.subr.bf16.mxu0 %v6008_v0  ;;  %5414 = vmatpush3.bf16.msra.mxu1 %v6235_v26 }
 0x50a   :  { %5415 = vmatprep.subr.bf16.mxu1 %v6008_v0 }
 0x50b   :  { %5648 = vtanh.f32 %v6430_v59 }
 0x515   :  { %v5649_v63 = vpop.eup %5648 }
 0x516   :  { %557 = vrot.lane.b32.xlu0 %v5649_v63, %s6012_s2 }
 0x588   :  { %v558_v3 = vpop.permute.xlu0 %557 }
 0x589   :  { %v6437_v7 = vmul.f32 %v5645_v33, %v558_v3 }
 0x58b   :  { %1061 = vrot.lane.b32.xlu1 %v6437_v7, %s6013_s4 }
 0x5d6   :  { %v1348_v29 = vpop.f32.mrb[4].mxu1 }
 0x5d7   :  { %v1353_v30 = vrot.slane %v1348_v29, 1  ;;  %v1354_v31 = vrot.slane %v1348_v29, 2  ;;  %v1355_v32 = vrot.slane %v1348_v29, 3  ;;  %v1356_v33 = vrot.slane %v1348_v29, 4  ;;  %v5179_v34 = vpop.f32.mrb[5].mxu1 }
 0x5d8   :  { %v1357_v35 = vrot.slane %v1348_v29, 5  ;;  %v1358_v36 = vrot.slane %v1348_v29, 6  ;;  %v1359_v37 = vrot.slane %v1348_v29, 7  ;;  %v1368_v38 = vadd.f32 %v1348_v29, %v1274_v8 }
 0x5d9   :  { %v1369_v39 = vadd.f32 %v1353_v30, %v1275_v16  ;;  %v1370_v40 = vadd.f32 %v1354_v31, %v1276_v41  ;;  %v1371_v42 = vadd.f32 %v1355_v32, %v1277_v22  ;;  %v1372_v43 = vadd.f32 %v1356_v33, %v1278_v24 }
 0x5da   :  { %v1373_v10 = vadd.f32 %v1357_v35, %v1279_v27  ;;  %v1374_v44 = vadd.f32 %v1358_v36, %v1280_v28  ;;  %v1375_v13 = vadd.f32 %v1359_v37, %v1281_v2  ;;  %v4910_v45 = vmul.f32 -1.442695, %v1368_v38 }
 0x5db   :  { %v4911_v17 = vmul.f32 -1.442695, %v1369_v39  ;;  %v4912_v46 = vmul.f32 -1.442695, %v1370_v40  ;;  %v4913_v11 = vmul.f32 -1.442695, %v1371_v42  ;;  %5650 = vtanh.f32 %v1368_v38 }
 0x5dc   :  { %5652 = vpow2.f32 %v4910_v45  ;;  %v4914_v62 = vmul.f32 -1.442695, %v1372_v43  ;;  %v4915_v47 = vmul.f32 -1.442695, %v1373_v10  ;;  %v4916_v61 = vmul.f32 -1.442695, %v1374_v44 }
 0x5dd   :  { %5654 = vpow2.f32 %v4911_v17  ;;  %v4917_v48 = vmul.f32 -1.442695, %v1375_v13 }
 0x5de   :  { %5656 = vpow2.f32 %v4912_v46 }
 0x5df   :  { %5658 = vpow2.f32 %v4913_v11 }
 0x5e0   :  { %5660 = vpow2.f32 %v4914_v62 }
 0x5e1   :  { %5662 = vpow2.f32 %v4915_v47 }
 0x5e2   :  { %5664 = vpow2.f32 %v4916_v61 }
 0x5e3   :  { %5666 = vpow2.f32 %v4917_v48 }
 0x5e4   :  { %5668 = vtanh.f32 %v1369_v39 }
 0x5e5   :  { %v5651_v60 = vpop.eup %5650  ;;  %5670 = vtanh.f32 %v1370_v40 }
 0x5e6   :  { %v5653_v1 = vpop.eup %5652  ;;  %5672 = vtanh.f32 %v1371_v42  ;;  %1466 = vrot.lane.b32.xlu0 %v5651_v60, %s6011_s20 }
 0x5e7   :  { %v5655_v49 = vpop.eup %5654  ;;  %v1400_v12 = vadd.f32 1.0, %v5653_v1  ;;  %5674 = vtanh.f32 %v1372_v43 }
 0x5e8   :  { %v5657_v51 = vpop.eup %5656  ;;  %v1401_v52 = vadd.f32 1.0, %v5655_v49  ;;  %5676 = vtanh.f32 %v1373_v10 }
 0x5e9   :  { %v5659_v6 = vpop.eup %5658  ;;  %v1402_v15 = vadd.f32 1.0, %v5657_v51  ;;  %5678 = vrcp.f32 %v1400_v12 }
 0x5ea   :  { %v5661_v18 = vpop.eup %5660  ;;  %v1403_v21 = vadd.f32 1.0, %v5659_v6  ;;  %5680 = vrcp.f32 %v1401_v52 }
 0x5eb   :  { %v5663_v14 = vpop.eup %5662  ;;  %v1404_v54 = vadd.f32 1.0, %v5661_v18  ;;  %5682 = vrcp.f32 %v1402_v15 }
 0x5ec   :  { %v5665_v20 = vpop.eup %5664  ;;  %v1405_v25 = vadd.f32 1.0, %v5663_v14  ;;  %5684 = vrcp.f32 %v1403_v21 }
 0x5ed   :  { %v5667_v55 = vpop.eup %5666  ;;  %v1406_v57 = vadd.f32 1.0, %v5665_v20  ;;  %5686 = vrcp.f32 %v1404_v54 }
 0x5ee   :  { %v5669_v58 = vpop.eup %5668  ;;  %v1407_v63 = vadd.f32 1.0, %v5667_v55  ;;  %5688 = vrcp.f32 %v1405_v25 }
 0x5ef   :  { %v5671_v3 = vpop.eup %5670  ;;  %5690 = vrcp.f32 %v1406_v57  ;;  %1468 = vrot.lane.b32.xlu0 %v5669_v58, %s6011_s20 }
 0x5f0   :  { %v5673_v8 = vpop.eup %5672  ;;  %5692 = vrcp.f32 %v1407_v63  ;;  %1470 = vrot.lane.b32.xlu1 %v5671_v3, %s6011_s20 }
 0x5f1   :  { %v5675_v16 = vpop.eup %5674  ;;  %5694 = vtanh.f32 %v1374_v44 }
 0x5f2   :  { %v5677_v41 = vpop.eup %5676  ;;  %5696 = vtanh.f32 %v1375_v13 }
 0x5f3   :  { %v6468_v22 = vpop.eup %5678  ;;  %1474 = vrot.lane.b32.xlu0 %v5675_v16, %s6011_s20 }
 0x5f4   :  { %v6471_v24 = vpop.eup %5680  ;;  %1472 = vrot.lane.b32.xlu1 %v5673_v8, %s6011_s20 }
 0x5f5   :  { %v6474_v27 = vpop.eup %5682  ;;  %v1440_v28 = vrot.slane %v6471_v24, 7 }
 0x5f6   :  { %v6477_v2 = vpop.eup %5684  ;;  %v1442_v29 = vrot.slane %v6474_v27, 6 }
 0x5f7   :  { %v6480_v30 = vpop.eup %5686  ;;  %v1441_v31 = vsel %vm232_vm2, %v1440_v28, %v6468_v22  ;;  %v1444_v32 = vrot.slane %v6477_v2, 5 }
 0x5f8   :  { %v6485_v33 = vpop.eup %5688  ;;  %1476 = vrot.lane.b32.xlu1 %v5677_v41, %s6011_s20  ;;  %v1443_v34 = vsel %vm235_vm3, %v1442_v29, %v1441_v31  ;;  %v1446_v35 = vrot.slane %v6480_v30, 4 }
 0x5f9   :  { %v6490_v36 = vpop.eup %5690  ;;  %v1445_v37 = vsel %vm238_vm4, %v1444_v32, %v1443_v34  ;;  %v1448_v38 = vrot.slane %v6485_v33, 3 }
 0x5fa   :  { %v6494_v39 = vpop.eup %5692  ;;  %v1447_v40 = vsel %vm241_vm5, %v1446_v35, %v1445_v37  ;;  %v1450_v42 = vrot.slane %v6490_v36, 2 }
 0x5fb   :  { %v5695_v43 = vpop.eup %5694  ;;  %v1449_v10 = vsel %vm244_vm6, %v1448_v38, %v1447_v40  ;;  %v1452_v44 = vrot.slane %v6494_v39, 1 }
 0x5fc   :  { %v5697_v13 = vpop.eup %5696  ;;  %1478 = vrot.lane.b32.xlu0 %v5695_v43, %s6011_s20  ;;  %v1451_v45 = vsel %vm247_vm7, %v1450_v42, %v1449_v10 }
 0x5fd   :  { %1480 = vrot.lane.b32.xlu1 %v5697_v13, %s6011_s20  ;;  %v1062_v17 = vpop.permute.xlu1 %1061  ;;  %v1453_v46 = vsel %vm250_vm8, %v1452_v44, %v1451_v45 }
 0x5fe   :  { %5167 = vmatmul.mubr.msk.f32.vlgmr.msra.gmra.mrb[2].mxu0 %vm35_vm0, %v1062_v17 }
 0x5ff   :  { %5423 = vmatpush3.bf16.msra.mxu0 %v6077_v5  ;;  %5210 = vmatprep.mubr.msk.f32.mxu0 %vm6009_vm1, %v6010_v4 }
 0x600   :  { %1454 = vrot.lane.b32.xlu0 %v1453_v46, %s6012_s2  ;;  %5424 = vmatprep.subr.bf16.mxu0 %v6008_v0 }
 0x603   :  { %5426 = vmatpush3.bf16.msra.mxu0 %v6100_v9 }
 0x604   :  { %5427 = vmatprep.subr.bf16.mxu0 %v6008_v0 }
 0x658   :  { %v1467_v11 = vpop.permute.xlu0 %1466 }
 0x659   :  { %v1490_v60 = vmul.f32 %v6468_v22, %v1467_v11 }
 0x661   :  { %v1469_v62 = vpop.permute.xlu0 %1468 }
 0x662   :  { %v1471_v47 = vpop.permute.xlu1 %1470  ;;  %v1491_v61 = vmul.f32 %v6471_v24, %v1469_v62 }
 0x663   :  { %v1492_v48 = vmul.f32 %v6474_v27, %v1471_v47 }
 0x664   :  { %v1506_v1 = vrot.slane %v1491_v61, 7 }
 0x665   :  { %v1475_v49 = vpop.permute.xlu0 %1474  ;;  %v1508_v12 = vrot.slane %v1492_v48, 6 }
 0x666   :  { %v1507_v51 = vsel %vm232_vm2, %v1506_v1, %v1490_v60  ;;  %v1473_v52 = vpop.permute.xlu1 %1472  ;;  %v1494_v6 = vmul.f32 %v6480_v30, %v1475_v49 }
 0x667   :  { %v1493_v15 = vmul.f32 %v6477_v2, %v1473_v52  ;;  %v1509_v18 = vsel %vm235_vm3, %v1508_v12, %v1507_v51 }
 0x668   :  { %v1512_v14 = vrot.slane %v1494_v6, 4 }
 0x669   :  { %v1510_v21 = vrot.slane %v1493_v15, 5 }
 0x66a   :  { %v1477_v54 = vpop.permute.xlu1 %1476 }
 0x66b   :  { %v1511_v20 = vsel %vm238_vm4, %v1510_v21, %v1509_v18  ;;  %v1495_v25 = vmul.f32 %v6485_v33, %v1477_v54 }
 0x66c   :  { %v1513_v55 = vsel %vm241_vm5, %v1512_v14, %v1511_v20 }
 0x66d   :  { %v1514_v57 = vrot.slane %v1495_v25, 3 }
 0x66e   :  { %v1479_v58 = vpop.permute.xlu0 %1478 }
 0x66f   :  { %v1496_v63 = vmul.f32 %v6490_v36, %v1479_v58  ;;  %v1481_v3 = vpop.permute.xlu1 %1480  ;;  %v1515_v8 = vsel %vm244_vm6, %v1514_v57, %v1513_v55 }
 0x670   :  { %v1497_v16 = vmul.f32 %v6494_v39, %v1481_v3 }
 0x671   :  { %v1516_v41 = vrot.slane %v1496_v63, 2 }
 0x672   :  { %v1518_v28 = vrot.slane %v1497_v16, 1  ;;  %v1455_v29 = vpop.permute.xlu0 %1454 }
 0x673   :  { %v1517_v31 = vsel %vm247_vm7, %v1516_v41, %v1515_v8  ;;  %v1457_v32 = vmul.f32 %v1455_v29, %v6387_v19 }
 0x674   :  { %v1519_v34 = vsel %vm250_vm8, %v1518_v28, %v1517_v31 }
 0x675   :  { %v6528_v35 = vadd.f32 %v1519_v34, %v1457_v32 }
 0x677   :  { %5698 = vtanh.f32 %v6528_v35 }
 0x681   :  { %v5699_v37 = vpop.eup %5698 }
 0x682   :  { %1531 = vrot.lane.b32.xlu1 %v5699_v37, %s6012_s2  ;;  %v1525_v38 = vrot.slane %v5699_v37, 2  ;;  %v1524_v40 = vrot.slane %v5699_v37, 1  ;;  %v1526_v42 = vrot.slane %v5699_v37, 3  ;;  %v1527_v43 = vrot.slane %v5699_v37, 4 }
 0x683   :  { %v1528_v19 = vrot.slane %v5699_v37, 5  ;;  %v1529_v10 = vrot.slane %v5699_v37, 6  ;;  %v1530_v44 = vrot.slane %v5699_v37, 7 }
 0x684   :  { %1535 = vrot.lane.b32.xlu0 %v1525_v38, %s6012_s2 }
 0x686   :  { %1533 = vrot.lane.b32.xlu1 %v1524_v40, %s6012_s2  ;;  %v1872_v40 = vld [vmem:[%s7810_s0 + $0x3] sm:$0x1] }
 0x688   :  { %1537 = vrot.lane.b32.xlu0 %v1526_v42, %s6012_s2  ;;  %v1873_v42 = vld [vmem:[%s7810_s0 + $0xb] sm:$0x1] }
 0x68a   :  { %1539 = vrot.lane.b32.xlu1 %v1527_v43, %s6012_s2  ;;  %v1874_v43 = vld [vmem:[%s7810_s0 + $0x13] sm:$0x1] }
 0x68c   :  { %1541 = vrot.lane.b32.xlu0 %v1528_v19, %s6012_s2  ;;  %v1875_v19 = vld [vmem:[%s7810_s0 + $0x1b] sm:$0x1] }
 0x68e   :  { %1543 = vrot.lane.b32.xlu1 %v1529_v10, %s6012_s2  ;;  %v1876_v10 = vld [vmem:[%s7810_s0 + $0x23] sm:$0x1] }
 0x690   :  { %1545 = vrot.lane.b32.xlu0 %v1530_v44, %s6012_s2  ;;  %v1877_v44 = vld [vmem:[%s7810_s0 + $0x2b] sm:$0x1] }
 0x6d1   :  { %v1131_v13 = vpop.f32.mrb[2].mxu0 }
 0x6d2   :  { %v5512_v45 = vadd.f32 %v6376_v50, %v1131_v13  ;;  %v5168_v17 = vpop.f32.mrb[3].mxu0  ;;  %v1878_v13 = vld [vmem:[%s7810_s0 + $0x33] sm:$0x1] }
 0x6d4   :  { %v4908_v46 = vmul.f32 -1.442695, %v5512_v45  ;;  %5700 = vtanh.f32 %v5512_v45  ;;  %v1879_v45 = vld [vmem:[%s7810_s0 + $0x3b] sm:$0x1] }
 0x6d6   :  { %5702 = vpow2.f32 %v4908_v46 }
 0x6de   :  { %v5701_v11 = vpop.eup %5700 }
 0x6df   :  { %1149 = vrot.lane.b32.xlu0 %v5701_v11, %s6011_s20 }
 0x6e0   :  { %v5703_v62 = vpop.eup %5702 }
 0x6e1   :  { %v1139_v47 = vadd.f32 1.0, %v5703_v62 }
 0x6e3   :  { %5704 = vrcp.f32 %v1139_v47 }
 0x6ed   :  { %v5705_v61 = vpop.eup %5704 }
 0x6ee   :  { %1144 = vrot.lane.b32.xlu1 %v5705_v61, %s6012_s2 }
 0x6f4   :  { %v1532_v48 = vpop.permute.xlu1 %1531 }
 0x6f5   :  { %v1555_v52 = vmul.f32 %v6468_v22, %v1532_v48 }
 0x6f6   :  { %v1536_v60 = vpop.permute.xlu0 %1535 }
 0x6f7   :  { %v1557_v1 = vmul.f32 %v6474_v27, %v1536_v60 }
 0x6f8   :  { %v1534_v49 = vpop.permute.xlu1 %1533 }
 0x6f9   :  { %v1556_v12 = vmul.f32 %v6471_v24, %v1534_v49  ;;  %v1573_v18 = vrot.slane %v1557_v1, 6 }
 0x6fa   :  { %v1538_v51 = vpop.permute.xlu0 %1537 }
 0x6fb   :  { %v1571_v6 = vrot.slane %v1556_v12, 7  ;;  %v1558_v15 = vmul.f32 %v6477_v2, %v1538_v51 }
 0x6fc   :  { %v1540_v21 = vpop.permute.xlu1 %1539 }
 0x6fd   :  { %v1572_v14 = vsel %vm232_vm2, %v1571_v6, %v1555_v52  ;;  %v1575_v54 = vrot.slane %v1558_v15, 5  ;;  %v1559_v20 = vmul.f32 %v6480_v30, %v1540_v21 }
 0x6fe   :  { %v1574_v25 = vsel %vm235_vm3, %v1573_v18, %v1572_v14  ;;  %v1542_v55 = vpop.permute.xlu0 %1541 }
 0x6ff   :  { %v1576_v27 = vsel %vm238_vm4, %v1575_v54, %v1574_v25  ;;  %v1577_v57 = vrot.slane %v1559_v20, 4  ;;  %v1560_v24 = vmul.f32 %v6485_v33, %v1542_v55 }
 0x700   :  { %v1544_v58 = vpop.permute.xlu1 %1543 }
 0x701   :  { %v1578_v22 = vsel %vm241_vm5, %v1577_v57, %v1576_v27  ;;  %v1579_v63 = vrot.slane %v1560_v24, 3  ;;  %v1561_v2 = vmul.f32 %v6490_v36, %v1544_v58 }
 0x702   :  { %v1546_v3 = vpop.permute.xlu0 %1545 }
 0x703   :  { %v1581_v8 = vrot.slane %v1561_v2, 2  ;;  %v1562_v16 = vmul.f32 %v6494_v39, %v1546_v3  ;;  %v1580_v30 = vsel %vm244_vm6, %v1579_v63, %v1578_v22 }
 0x705   :  { %v1583_v41 = vrot.slane %v1562_v16, 1  ;;  %v1582_v28 = vsel %vm247_vm7, %v1581_v8, %v1580_v30 }
 0x707   :  { %v1584_v29 = vsel %vm250_vm8, %v1583_v41, %v1582_v28 }
 0x708   :  { %1585 = vrot.lane.b32.xlu1 %v1584_v29, %s6013_s4 }
 0x751   :  { %v1150_v33 = vpop.permute.xlu0 %1149 }
 0x752   :  { %v1152_v32 = vmul.f32 %v5705_v61, %v1150_v33 }
 0x760   :  { %v1145_v31 = vpop.permute.xlu1 %1144 }
 0x761   :  { %v1147_v34 = vmul.f32 %v1145_v31, %v6430_v59 }
 0x763   :  { %v6559_v37 = vadd.f32 %v1152_v32, %v1147_v34 }
 0x765   :  { %5706 = vtanh.f32 %v6559_v37 }
 0x76f   :  { %v5707_v36 = vpop.eup %5706 }
 0x770   :  { %1156 = vrot.lane.b32.xlu0 %v5707_v36, %s6012_s2 }
 0x77a   :  { %v1586_v39 = vpop.permute.xlu1 %1585 }
 0x77b   :  { %5189 = vmatmul.mubr.msk.f32.vlgmr.msra.gmra.mrb[6].mxu1 %vm35_vm0, %v1586_v39  ;;  %5211 = vmatmul.mubr.msk.f32.vlgmr.msra.gmra.mrb[4].mxu0 %vm35_vm0, %v1586_v39 }
 0x77c   :  { %5417 = vmatpush3.bf16.msra.mxu1 %v6264_v53  ;;  %5199 = vmatprep.mubr.msk.f32.mxu1 %vm6009_vm1, %v6010_v4 }
 0x77d   :  { %5418 = vmatprep.subr.bf16.mxu1 %v6008_v0  ;;  %5429 = vmatpush3.bf16.msra.mxu0 %v6228_v23 }
 0x77e   :  { %5430 = vmatprep.subr.bf16.mxu0 %v6008_v0  ;;  %5221 = vmatprep.mubr.msk.f32.mxu0 %vm6009_vm1, %v6010_v4 }
 0x780   :  { %5420 = vmatpush3.bf16.msra.mxu1 %v6275_v56 }
 0x781   :  { %5439 = vmatprep.subr.bf16.mxu1 %v6008_v0  ;;  %5432 = vmatpush3.bf16.msra.mxu0 %v6235_v26 }
 0x782   :  { %5433 = vmatprep.subr.bf16.mxu0 %v6008_v0 }
 0x7e2   :  { %v1157_v59 = vpop.permute.xlu0 %1156 }
 0x7e3   :  { %v6577_v38 = vmul.f32 %v5705_v61, %v1157_v59 }
 0x7e5   :  { %1659 = vrot.lane.b32.xlu1 %v6577_v38, %s6013_s4 }
 0x84e   :  { %v1946_v17 = vpop.f32.mrb[4].mxu0 }
 0x84f   :  { %v1951_v46 = vrot.slane %v1946_v17, 1  ;;  %v1952_v11 = vrot.slane %v1946_v17, 2  ;;  %v1953_v62 = vrot.slane %v1946_v17, 3  ;;  %v1954_v47 = vrot.slane %v1946_v17, 4  ;;  %v5212_v61 = vpop.f32.mrb[5].mxu0 }
 0x850   :  { %v1955_v48 = vrot.slane %v1946_v17, 5  ;;  %v1956_v60 = vrot.slane %v1946_v17, 6  ;;  %v1957_v1 = vrot.slane %v1946_v17, 7  ;;  %v1966_v49 = vadd.f32 %v1946_v17, %v1872_v40 }
 0x851   :  { %v1967_v12 = vadd.f32 %v1951_v46, %v1873_v42  ;;  %v1968_v51 = vadd.f32 %v1952_v11, %v1874_v43  ;;  %v1969_v52 = vadd.f32 %v1953_v62, %v1875_v19  ;;  %v1970_v6 = vadd.f32 %v1954_v47, %v1876_v10 }
 0x852   :  { %v1971_v15 = vadd.f32 %v1955_v48, %v1877_v44  ;;  %v1972_v18 = vadd.f32 %v1956_v60, %v1878_v13  ;;  %v6605_v21 = vadd.f32 %v1957_v1, %v1879_v45  ;;  %v4922_v14 = vmul.f32 -1.442695, %v1966_v49 }
 0x853   :  { %v4923_v54 = vmul.f32 -1.442695, %v1967_v12  ;;  %v4924_v20 = vmul.f32 -1.442695, %v1968_v51  ;;  %v4925_v25 = vmul.f32 -1.442695, %v1969_v52  ;;  %5708 = vtanh.f32 %v1966_v49 }
 0x854   :  { %5710 = vpow2.f32 %v4922_v14  ;;  %v4926_v55 = vmul.f32 -1.442695, %v1970_v6  ;;  %v4927_v27 = vmul.f32 -1.442695, %v1971_v15  ;;  %v4928_v57 = vmul.f32 -1.442695, %v1972_v18 }
 0x855   :  { %5712 = vpow2.f32 %v4923_v54  ;;  %v4929_v24 = vmul.f32 -1.442695, %v6605_v21 }
 0x856   :  { %5714 = vpow2.f32 %v4924_v20 }
 0x857   :  { %5716 = vpow2.f32 %v4925_v25  ;;  %v1660_v58 = vpop.permute.xlu1 %1659 }
 0x858   :  { %5718 = vpow2.f32 %v4926_v55  ;;  %5200 = vmatmul.mubr.msk.f32.vlgmr.msra.gmra.mrb[6].mxu1 %vm35_vm0, %v1660_v58 }
 0x859   :  { %5720 = vpow2.f32 %v4927_v27  ;;  %5441 = vmatpush3.bf16.msra.mxu1 %v6077_v5  ;;  %5243 = vmatprep.mubr.msk.f32.mxu1 %vm6009_vm1, %v6010_v4 }
 0x85a   :  { %5722 = vpow2.f32 %v4928_v57  ;;  %5442 = vmatprep.subr.bf16.mxu1 %v6008_v0 }
 0x85b   :  { %5724 = vpow2.f32 %v4929_v24 }
 0x85c   :  { %5726 = vtanh.f32 %v1967_v12 }
 0x85d   :  { %v5709_v22 = vpop.eup %5708  ;;  %5728 = vtanh.f32 %v1968_v51  ;;  %5444 = vmatpush3.bf16.msra.mxu1 %v6100_v9 }
 0x85e   :  { %v5711_v63 = vpop.eup %5710  ;;  %5730 = vtanh.f32 %v1969_v52  ;;  %2064 = vrot.lane.b32.xlu0 %v5709_v22, %s6011_s20  ;;  %5445 = vmatprep.subr.bf16.mxu1 %v6008_v0 }
 0x85f   :  { %v5713_v2 = vpop.eup %5712  ;;  %v1998_v3 = vadd.f32 1.0, %v5711_v63  ;;  %5732 = vtanh.f32 %v1970_v6 }
 0x860   :  { %v5715_v8 = vpop.eup %5714  ;;  %v1999_v16 = vadd.f32 1.0, %v5713_v2  ;;  %5734 = vtanh.f32 %v1971_v15 }
 0x861   :  { %v5717_v30 = vpop.eup %5716  ;;  %v2000_v41 = vadd.f32 1.0, %v5715_v8  ;;  %5736 = vrcp.f32 %v1998_v3 }
 0x862   :  { %v5719_v28 = vpop.eup %5718  ;;  %v2001_v29 = vadd.f32 1.0, %v5717_v30  ;;  %5738 = vrcp.f32 %v1999_v16 }
 0x863   :  { %v5721_v33 = vpop.eup %5720  ;;  %v2002_v31 = vadd.f32 1.0, %v5719_v28  ;;  %5740 = vrcp.f32 %v2000_v41 }
 0x864   :  { %v5723_v32 = vpop.eup %5722  ;;  %v2003_v34 = vadd.f32 1.0, %v5721_v33  ;;  %5742 = vrcp.f32 %v2001_v29 }
 0x865   :  { %v5725_v36 = vpop.eup %5724  ;;  %v2004_v39 = vadd.f32 1.0, %v5723_v32  ;;  %5744 = vrcp.f32 %v2002_v31 }
 0x866   :  { %v5727_v59 = vpop.eup %5726  ;;  %v2005_v40 = vadd.f32 1.0, %v5725_v36  ;;  %5746 = vrcp.f32 %v2003_v34 }
 0x867   :  { %v5729_v42 = vpop.eup %5728  ;;  %5748 = vrcp.f32 %v2004_v39  ;;  %2066 = vrot.lane.b32.xlu0 %v5727_v59, %s6011_s20 }
 0x868   :  { %v5731_v43 = vpop.eup %5730  ;;  %5750 = vrcp.f32 %v2005_v40  ;;  %2068 = vrot.lane.b32.xlu1 %v5729_v42, %s6011_s20 }
 0x869   :  { %v5733_v19 = vpop.eup %5732  ;;  %5752 = vtanh.f32 %v1972_v18 }
 0x86a   :  { %v5735_v10 = vpop.eup %5734  ;;  %5754 = vtanh.f32 %v6605_v21 }
 0x86b   :  { %v6619_v44 = vpop.eup %5736  ;;  %2072 = vrot.lane.b32.xlu0 %v5733_v19, %s6011_s20 }
 0x86c   :  { %v6622_v13 = vpop.eup %5738  ;;  %2070 = vrot.lane.b32.xlu1 %v5731_v43, %s6011_s20 }
 0x86d   :  { %v6625_v45 = vpop.eup %5740  ;;  %v2038_v17 = vrot.slane %v6622_v13, 7 }
 0x86e   :  { %v6628_v46 = vpop.eup %5742  ;;  %v2040_v11 = vrot.slane %v6625_v45, 6 }
 0x86f   :  { %v6631_v62 = vpop.eup %5744  ;;  %v2039_v47 = vsel %vm232_vm2, %v2038_v17, %v6619_v44  ;;  %v2042_v61 = vrot.slane %v6628_v46, 5 }
 0x870   :  { %v6636_v48 = vpop.eup %5746  ;;  %2074 = vrot.lane.b32.xlu1 %v5735_v10, %s6011_s20  ;;  %v2041_v60 = vsel %vm235_vm3, %v2040_v11, %v2039_v47  ;;  %v2044_v1 = vrot.slane %v6631_v62, 4 }
 0x871   :  { %v6641_v49 = vpop.eup %5748  ;;  %v2043_v12 = vsel %vm238_vm4, %v2042_v61, %v2041_v60  ;;  %v2046_v51 = vrot.slane %v6636_v48, 3 }
 0x872   :  { %v6645_v52 = vpop.eup %5750  ;;  %v2045_v6 = vsel %vm241_vm5, %v2044_v1, %v2043_v12  ;;  %v2048_v15 = vrot.slane %v6641_v49, 2 }
 0x873   :  { %v5753_v18 = vpop.eup %5752  ;;  %v2047_v21 = vsel %vm244_vm6, %v2046_v51, %v2045_v6  ;;  %v2050_v14 = vrot.slane %v6645_v52, 1 }
 0x874   :  { %v5755_v54 = vpop.eup %5754  ;;  %2076 = vrot.lane.b32.xlu0 %v5753_v18, %s6011_s20  ;;  %v2049_v20 = vsel %vm247_vm7, %v2048_v15, %v2047_v21 }
 0x875   :  { %2078 = vrot.lane.b32.xlu1 %v5755_v54, %s6011_s20  ;;  %v2051_v25 = vsel %vm250_vm8, %v2050_v14, %v2049_v20 }
 0x878   :  { %2052 = vrot.lane.b32.xlu0 %v2051_v25, %s6012_s2 }
 0x8d0   :  { %v2065_v55 = vpop.permute.xlu0 %2064 }
 0x8d1   :  { %v2088_v22 = vmul.f32 %v6619_v44, %v2065_v55 }
 0x8d9   :  { %v2067_v27 = vpop.permute.xlu0 %2066 }
 0x8da   :  { %v2069_v57 = vpop.permute.xlu1 %2068  ;;  %v2089_v24 = vmul.f32 %v6622_v13, %v2067_v27 }
 0x8db   :  { %v2090_v58 = vmul.f32 %v6625_v45, %v2069_v57 }
 0x8dc   :  { %v2104_v63 = vrot.slane %v2089_v24, 7 }
 0x8dd   :  { %v2073_v2 = vpop.permute.xlu0 %2072  ;;  %v2106_v3 = vrot.slane %v2090_v58, 6 }
 0x8de   :  { %v2105_v8 = vsel %vm232_vm2, %v2104_v63, %v2088_v22  ;;  %v2071_v16 = vpop.permute.xlu1 %2070  ;;  %v2092_v30 = vmul.f32 %v6631_v62, %v2073_v2 }
 0x8df   :  { %v2091_v41 = vmul.f32 %v6628_v46, %v2071_v16  ;;  %v2107_v28 = vsel %vm235_vm3, %v2106_v3, %v2105_v8 }
 0x8e0   :  { %v2110_v33 = vrot.slane %v2092_v30, 4 }
 0x8e1   :  { %v2108_v29 = vrot.slane %v2091_v41, 5 }
 0x8e2   :  { %v2075_v31 = vpop.permute.xlu1 %2074 }
 0x8e3   :  { %v2109_v32 = vsel %vm238_vm4, %v2108_v29, %v2107_v28  ;;  %v2093_v34 = vmul.f32 %v6636_v48, %v2075_v31 }
 0x8e4   :  { %v2111_v36 = vsel %vm241_vm5, %v2110_v33, %v2109_v32 }
 0x8e5   :  { %v2112_v39 = vrot.slane %v2093_v34, 3 }
 0x8e6   :  { %v2077_v59 = vpop.permute.xlu0 %2076 }
 0x8e7   :  { %v2094_v40 = vmul.f32 %v6641_v49, %v2077_v59  ;;  %v2079_v42 = vpop.permute.xlu1 %2078  ;;  %v2113_v43 = vsel %vm244_vm6, %v2112_v39, %v2111_v36 }
 0x8e8   :  { %v2095_v19 = vmul.f32 %v6645_v52, %v2079_v42 }
 0x8e9   :  { %v2114_v10 = vrot.slane %v2094_v40, 2 }
 0x8ea   :  { %v2116_v17 = vrot.slane %v2095_v19, 1  ;;  %v2053_v11 = vpop.permute.xlu0 %2052 }
 0x8eb   :  { %v2115_v47 = vsel %vm247_vm7, %v2114_v10, %v2113_v43  ;;  %v2055_v61 = vmul.f32 %v2053_v11, %v6528_v35 }
 0x8ec   :  { %v2117_v60 = vsel %vm250_vm8, %v2116_v17, %v2115_v47 }
 0x8ed   :  { %v6672_v1 = vadd.f32 %v2117_v60, %v2055_v61 }
 0x8ef   :  { %5756 = vtanh.f32 %v6672_v1 }
 0x8f9   :  { %v5757_v12 = vpop.eup %5756 }
 0x8fa   :  { %2129 = vrot.lane.b32.xlu1 %v5757_v12, %s6012_s2  ;;  %v2123_v51 = vrot.slane %v5757_v12, 2  ;;  %v2122_v6 = vrot.slane %v5757_v12, 1  ;;  %v2124_v15 = vrot.slane %v5757_v12, 3  ;;  %v2125_v18 = vrot.slane %v5757_v12, 4 }
 0x8fb   :  { %v2126_v35 = vrot.slane %v5757_v12, 5  ;;  %v2127_v21 = vrot.slane %v5757_v12, 6  ;;  %v2128_v14 = vrot.slane %v5757_v12, 7 }
 0x8fc   :  { %2133 = vrot.lane.b32.xlu0 %v2123_v51, %s6012_s2 }
 0x8fe   :  { %2131 = vrot.lane.b32.xlu1 %v2122_v6, %s6012_s2 }
 0x900   :  { %2135 = vrot.lane.b32.xlu0 %v2124_v15, %s6012_s2  ;;  %v2470_v15 = vld [vmem:[%s7810_s0 + $0x4] sm:$0x1] }
 0x902   :  { %2137 = vrot.lane.b32.xlu1 %v2125_v18, %s6012_s2  ;;  %v2471_v18 = vld [vmem:[%s7810_s0 + $0xc] sm:$0x1] }
 0x904   :  { %2139 = vrot.lane.b32.xlu0 %v2126_v35, %s6012_s2  ;;  %v2472_v35 = vld [vmem:[%s7810_s0 + $0x14] sm:$0x1] }
 0x906   :  { %2141 = vrot.lane.b32.xlu1 %v2127_v21, %s6012_s2  ;;  %v2473_v21 = vld [vmem:[%s7810_s0 + $0x1c] sm:$0x1] }
 0x908   :  { %2143 = vrot.lane.b32.xlu0 %v2128_v14, %s6012_s2  ;;  %v2474_v14 = vld [vmem:[%s7810_s0 + $0x24] sm:$0x1] }
 0x92b   :  { %v1729_v54 = vpop.f32.mrb[6].mxu1 }
 0x92c   :  { %v5513_v20 = vadd.f32 %v6376_v50, %v1729_v54  ;;  %v5201_v25 = vpop.f32.mrb[7].mxu1  ;;  %v2475_v54 = vld [vmem:[%s7810_s0 + $0x2c] sm:$0x1] }
 0x92d   :  { %v2477_v25 = vld [vmem:[%s7810_s0 + $0x3c] sm:$0x1] }
 0x92e   :  { %v4920_v55 = vmul.f32 -1.442695, %v5513_v20  ;;  %5758 = vtanh.f32 %v5513_v20  ;;  %v2476_v20 = vld [vmem:[%s7810_s0 + $0x34] sm:$0x1] }
 0x930   :  { %5760 = vpow2.f32 %v4920_v55 }
 0x938   :  { %v5759_v27 = vpop.eup %5758 }
 0x939   :  { %1747 = vrot.lane.b32.xlu0 %v5759_v27, %s6011_s20 }
 0x93a   :  { %v5761_v57 = vpop.eup %5760 }
 0x93b   :  { %v1737_v24 = vadd.f32 1.0, %v5761_v57 }
 0x93d   :  { %5762 = vrcp.f32 %v1737_v24 }
 0x947   :  { %v5763_v58 = vpop.eup %5762 }
 0x948   :  { %1742 = vrot.lane.b32.xlu1 %v5763_v58, %s6012_s2 }
 0x96c   :  { %v2130_v22 = vpop.permute.xlu1 %2129 }
 0x96d   :  { %v2153_v16 = vmul.f32 %v6619_v44, %v2130_v22 }
 0x96e   :  { %v2134_v63 = vpop.permute.xlu0 %2133 }
 0x96f   :  { %v2155_v2 = vmul.f32 %v6625_v45, %v2134_v63 }
 0x970   :  { %v2132_v3 = vpop.permute.xlu1 %2131 }
 0x971   :  { %v2154_v50 = vmul.f32 %v6622_v13, %v2132_v3  ;;  %v2171_v28 = vrot.slane %v2155_v2, 6 }
 0x972   :  { %v2136_v8 = vpop.permute.xlu0 %2135 }
 0x973   :  { %v2169_v30 = vrot.slane %v2154_v50, 7  ;;  %v2156_v41 = vmul.f32 %v6628_v46, %v2136_v8 }
 0x974   :  { %v2138_v29 = vpop.permute.xlu1 %2137 }
 0x975   :  { %v2170_v33 = vsel %vm232_vm2, %v2169_v30, %v2153_v16  ;;  %v2173_v31 = vrot.slane %v2156_v41, 5  ;;  %v2157_v32 = vmul.f32 %v6631_v62, %v2138_v29 }
 0x976   :  { %v2172_v34 = vsel %vm235_vm3, %v2171_v28, %v2170_v33  ;;  %v2140_v36 = vpop.permute.xlu0 %2139 }
 0x977   :  { %v2174_v45 = vsel %vm238_vm4, %v2173_v31, %v2172_v34  ;;  %v2175_v39 = vrot.slane %v2157_v32, 4  ;;  %v2158_v13 = vmul.f32 %v6636_v48, %v2140_v36 }
 0x978   :  { %v2142_v59 = vpop.permute.xlu1 %2141 }
 0x979   :  { %v2176_v44 = vsel %vm241_vm5, %v2175_v39, %v2174_v45  ;;  %v2177_v40 = vrot.slane %v2158_v13, 3  ;;  %v2159_v46 = vmul.f32 %v6641_v49, %v2142_v59 }
 0x97a   :  { %v2144_v42 = vpop.permute.xlu0 %2143 }
 0x97b   :  { %v2179_v43 = vrot.slane %v2159_v46, 2  ;;  %v2160_v19 = vmul.f32 %v6645_v52, %v2144_v42  ;;  %v2178_v62 = vsel %vm244_vm6, %v2177_v40, %v2176_v44 }
 0x97d   :  { %v2181_v10 = vrot.slane %v2160_v19, 1  ;;  %v2180_v17 = vsel %vm247_vm7, %v2179_v43, %v2178_v62 }
 0x97f   :  { %v2182_v11 = vsel %vm250_vm8, %v2181_v10, %v2180_v17 }
 0x980   :  { %2183 = vrot.lane.b32.xlu1 %v2182_v11, %s6013_s4 }
 0x9ab   :  { %v1748_v48 = vpop.permute.xlu0 %1747 }
 0x9ac   :  { %v1750_v61 = vmul.f32 %v5763_v58, %v1748_v48 }
 0x9ba   :  { %v1743_v47 = vpop.permute.xlu1 %1742 }
 0x9bb   :  { %v1745_v60 = vmul.f32 %v1743_v47, %v6559_v37 }
 0x9bd   :  { %v6703_v12 = vadd.f32 %v1750_v61, %v1745_v60 }
 0x9bf   :  { %5764 = vtanh.f32 %v6703_v12 }
 0x9c9   :  { %v5765_v49 = vpop.eup %5764 }
 0x9ca   :  { %1754 = vrot.lane.b32.xlu0 %v5765_v49, %s6012_s2 }
 0x9f2   :  { %v2184_v52 = vpop.permute.xlu1 %2183 }
 0x9f3   :  { %5222 = vmatmul.mubr.msk.f32.vlgmr.msra.gmra.mrb[6].mxu0 %vm35_vm0, %v2184_v52  ;;  %5244 = vmatmul.mubr.msk.f32.vlgmr.msra.gmra.mrb[8].mxu1 %vm35_vm0, %v2184_v52 }
 0x9f4   :  { %5435 = vmatpush3.bf16.msra.mxu0 %v6264_v53  ;;  %5232 = vmatprep.mubr.msk.f32.mxu0 %vm6009_vm1, %v6010_v4 }
 0x9f5   :  { %5436 = vmatprep.subr.bf16.mxu0 %v6008_v0  ;;  %5447 = vmatpush3.bf16.msra.mxu1 %v6228_v23 }
 0x9f6   :  { %5448 = vmatprep.subr.bf16.mxu1 %v6008_v0  ;;  %5254 = vmatprep.mubr.msk.f32.mxu1 %vm6009_vm1, %v6010_v4 }
 0x9f8   :  { %5438 = vmatpush3.bf16.msra.mxu0 %v6275_v56 }
 0x9f9   :  { %5457 = vmatprep.subr.bf16.mxu0 %v6008_v0  ;;  %5450 = vmatpush3.bf16.msra.mxu1 %v6235_v26 }
 0x9fa   :  { %5451 = vmatprep.subr.bf16.mxu1 %v6008_v0 }
 0xa3c   :  { %v1755_v37 = vpop.permute.xlu0 %1754 }
 0xa3d   :  { %v6721_v51 = vmul.f32 %v5763_v58, %v1755_v37 }
 0xa3f   :  { %2257 = vrot.lane.b32.xlu1 %v6721_v51, %s6013_s4 }
 0xab1   :  { %v2258_v6 = vpop.permute.xlu1 %2257 }
 0xab2   :  { %5233 = vmatmul.mubr.msk.f32.vlgmr.msra.gmra.mrb[6].mxu0 %vm35_vm0, %v2258_v6 }
 0xab3   :  { %5459 = vmatpush3.bf16.msra.mxu0 %v6077_v5  ;;  %5276 = vmatprep.mubr.msk.f32.mxu0 %vm6009_vm1, %v6010_v4 }
 0xab4   :  { %5460 = vmatprep.subr.bf16.mxu0 %v6008_v0 }
 0xab7   :  { %5462 = vmatpush3.bf16.msra.mxu0 %v6100_v9 }
 0xab8   :  { %5463 = vmatprep.subr.bf16.mxu0 %v6008_v0 }
 0xac6   :  { %v2544_v55 = vpop.f32.mrb[8].mxu1 }
 0xac7   :  { %v2549_v27 = vrot.slane %v2544_v55, 1  ;;  %v2550_v57 = vrot.slane %v2544_v55, 2  ;;  %v2551_v24 = vrot.slane %v2544_v55, 3  ;;  %v2552_v58 = vrot.slane %v2544_v55, 4  ;;  %v5245_v22 = vpop.f32.mrb[9].mxu1 }
 0xac8   :  { %v2553_v63 = vrot.slane %v2544_v55, 5  ;;  %v2554_v2 = vrot.slane %v2544_v55, 6  ;;  %v2555_v3 = vrot.slane %v2544_v55, 7  ;;  %v2564_v50 = vadd.f32 %v2544_v55, %v2470_v15 }
 0xac9   :  { %v2565_v8 = vadd.f32 %v2549_v27, %v2471_v18  ;;  %v2566_v16 = vadd.f32 %v2550_v57, %v2472_v35  ;;  %v2567_v30 = vadd.f32 %v2551_v24, %v2473_v21  ;;  %v2568_v41 = vadd.f32 %v2552_v58, %v2474_v14 }
 0xaca   :  { %v2569_v28 = vadd.f32 %v2553_v63, %v2475_v54  ;;  %v2570_v29 = vadd.f32 %v2554_v2, %v2476_v20  ;;  %v2571_v33 = vadd.f32 %v2555_v3, %v2477_v25  ;;  %v4934_v31 = vmul.f32 -1.442695, %v2564_v50 }
 0xacb   :  { %v4935_v32 = vmul.f32 -1.442695, %v2565_v8  ;;  %v4936_v34 = vmul.f32 -1.442695, %v2566_v16  ;;  %v4937_v36 = vmul.f32 -1.442695, %v2567_v30  ;;  %5766 = vtanh.f32 %v2564_v50 }
 0xacc   :  { %5768 = vpow2.f32 %v4934_v31  ;;  %v4938_v45 = vmul.f32 -1.442695, %v2568_v41  ;;  %v4939_v39 = vmul.f32 -1.442695, %v2569_v28  ;;  %v4940_v13 = vmul.f32 -1.442695, %v2570_v29 }
 0xacd   :  { %5770 = vpow2.f32 %v4935_v32  ;;  %v4941_v59 = vmul.f32 -1.442695, %v2571_v33 }
 0xace   :  { %5772 = vpow2.f32 %v4936_v34 }
 0xacf   :  { %5774 = vpow2.f32 %v4937_v36 }
 0xad0   :  { %5776 = vpow2.f32 %v4938_v45 }
 0xad1   :  { %5778 = vpow2.f32 %v4939_v39 }
 0xad2   :  { %5780 = vpow2.f32 %v4940_v13 }
 0xad3   :  { %5782 = vpow2.f32 %v4941_v59 }
 0xad4   :  { %5784 = vtanh.f32 %v2565_v8 }
 0xad5   :  { %v5767_v44 = vpop.eup %5766  ;;  %5786 = vtanh.f32 %v2566_v16 }
 0xad6   :  { %v5769_v40 = vpop.eup %5768  ;;  %5788 = vtanh.f32 %v2567_v30  ;;  %2662 = vrot.lane.b32.xlu0 %v5767_v44, %s6011_s20 }
 0xad7   :  { %v5771_v46 = vpop.eup %5770  ;;  %v2596_v42 = vadd.f32 1.0, %v5769_v40  ;;  %5790 = vtanh.f32 %v2568_v41 }
 0xad8   :  { %v5773_v43 = vpop.eup %5772  ;;  %v2597_v19 = vadd.f32 1.0, %v5771_v46  ;;  %5792 = vtanh.f32 %v2569_v28 }
 0xad9   :  { %v5775_v62 = vpop.eup %5774  ;;  %v2598_v10 = vadd.f32 1.0, %v5773_v43  ;;  %5794 = vrcp.f32 %v2596_v42 }
 0xada   :  { %v5777_v17 = vpop.eup %5776  ;;  %v2599_v11 = vadd.f32 1.0, %v5775_v62  ;;  %5796 = vrcp.f32 %v2597_v19 }
 0xadb   :  { %v5779_v48 = vpop.eup %5778  ;;  %v2600_v47 = vadd.f32 1.0, %v5777_v17  ;;  %5798 = vrcp.f32 %v2598_v10 }
 0xadc   :  { %v5781_v61 = vpop.eup %5780  ;;  %v2601_v60 = vadd.f32 1.0, %v5779_v48  ;;  %5800 = vrcp.f32 %v2599_v11 }
 0xadd   :  { %v5783_v49 = vpop.eup %5782  ;;  %v2602_v52 = vadd.f32 1.0, %v5781_v61  ;;  %5802 = vrcp.f32 %v2600_v47 }
 0xade   :  { %v5785_v37 = vpop.eup %5784  ;;  %v2603_v6 = vadd.f32 1.0, %v5783_v49  ;;  %5804 = vrcp.f32 %v2601_v60 }
 0xadf   :  { %v5787_v15 = vpop.eup %5786  ;;  %5806 = vrcp.f32 %v2602_v52  ;;  %2664 = vrot.lane.b32.xlu0 %v5785_v37, %s6011_s20 }
 0xae0   :  { %v5789_v18 = vpop.eup %5788  ;;  %5808 = vrcp.f32 %v2603_v6  ;;  %2666 = vrot.lane.b32.xlu1 %v5787_v15, %s6011_s20 }
 0xae1   :  { %v5791_v35 = vpop.eup %5790  ;;  %5810 = vtanh.f32 %v2570_v29 }
 0xae2   :  { %v5793_v21 = vpop.eup %5792  ;;  %5812 = vtanh.f32 %v2571_v33 }
 0xae3   :  { %v6759_v14 = vpop.eup %5794  ;;  %2670 = vrot.lane.b32.xlu0 %v5791_v35, %s6011_s20 }
 0xae4   :  { %v6762_v54 = vpop.eup %5796  ;;  %2668 = vrot.lane.b32.xlu1 %v5789_v18, %s6011_s20 }
 0xae5   :  { %v6765_v20 = vpop.eup %5798  ;;  %v2636_v25 = vrot.slane %v6762_v54, 7 }
 0xae6   :  { %v6768_v55 = vpop.eup %5800  ;;  %v2638_v27 = vrot.slane %v6765_v20, 6 }
 0xae7   :  { %v6771_v57 = vpop.eup %5802  ;;  %v2637_v24 = vsel %vm232_vm2, %v2636_v25, %v6759_v14  ;;  %v2640_v58 = vrot.slane %v6768_v55, 5 }
 0xae8   :  { %v6776_v22 = vpop.eup %5804  ;;  %2672 = vrot.lane.b32.xlu1 %v5793_v21, %s6011_s20  ;;  %v2639_v63 = vsel %vm235_vm3, %v2638_v27, %v2637_v24  ;;  %v2642_v2 = vrot.slane %v6771_v57, 4 }
 0xae9   :  { %v6781_v3 = vpop.eup %5806  ;;  %v2641_v50 = vsel %vm238_vm4, %v2640_v58, %v2639_v63  ;;  %v2644_v8 = vrot.slane %v6776_v22, 3 }
 0xaea   :  { %v6785_v16 = vpop.eup %5808  ;;  %v2643_v30 = vsel %vm241_vm5, %v2642_v2, %v2641_v50  ;;  %v2646_v41 = vrot.slane %v6781_v3, 2 }
 0xaeb   :  { %v5811_v28 = vpop.eup %5810  ;;  %v2645_v29 = vsel %vm244_vm6, %v2644_v8, %v2643_v30  ;;  %v2648_v33 = vrot.slane %v6785_v16, 1 }
 0xaec   :  { %v5813_v31 = vpop.eup %5812  ;;  %2674 = vrot.lane.b32.xlu0 %v5811_v28, %s6011_s20  ;;  %v2647_v32 = vsel %vm247_vm7, %v2646_v41, %v2645_v29 }
 0xaed   :  { %2676 = vrot.lane.b32.xlu1 %v5813_v31, %s6011_s20  ;;  %v2649_v34 = vsel %vm250_vm8, %v2648_v33, %v2647_v32  ;;  %v6826_v32 = vld [vmem:[%s7815_s6] ss:$0 sm:$0xff] }
 0xaf0   :  { %2650 = vrot.lane.b32.xlu0 %v2649_v34, %s6012_s2 }
 0xb48   :  { %v2663_v36 = vpop.permute.xlu0 %2662 }
 0xb49   :  { %v2686_v44 = vmul.f32 %v6759_v14, %v2663_v36 }
 0xb51   :  { %v2665_v45 = vpop.permute.xlu0 %2664 }
 0xb52   :  { %v2667_v39 = vpop.permute.xlu1 %2666  ;;  %v2687_v13 = vmul.f32 %v6762_v54, %v2665_v45 }
 0xb53   :  { %v2688_v59 = vmul.f32 %v6765_v20, %v2667_v39 }
 0xb54   :  { %v2702_v40 = vrot.slane %v2687_v13, 7 }
 0xb55   :  { %v2671_v46 = vpop.permute.xlu0 %2670  ;;  %v2704_v42 = vrot.slane %v2688_v59, 6 }
 0xb56   :  { %v2703_v43 = vsel %vm232_vm2, %v2702_v40, %v2686_v44  ;;  %v2669_v19 = vpop.permute.xlu1 %2668  ;;  %v2690_v62 = vmul.f32 %v6771_v57, %v2671_v46 }
 0xb57   :  { %v2689_v10 = vmul.f32 %v6768_v55, %v2669_v19  ;;  %v2705_v17 = vsel %vm235_vm3, %v2704_v42, %v2703_v43 }
 0xb58   :  { %v2708_v48 = vrot.slane %v2690_v62, 4 }
 0xb59   :  { %v2706_v11 = vrot.slane %v2689_v10, 5 }
 0xb5a   :  { %v2673_v47 = vpop.permute.xlu1 %2672 }
 0xb5b   :  { %v2707_v61 = vsel %vm238_vm4, %v2706_v11, %v2705_v17  ;;  %v2691_v60 = vmul.f32 %v6776_v22, %v2673_v47 }
 0xb5c   :  { %v2709_v49 = vsel %vm241_vm5, %v2708_v48, %v2707_v61 }
 0xb5d   :  { %v2710_v52 = vrot.slane %v2691_v60, 3 }
 0xb5e   :  { %v2675_v37 = vpop.permute.xlu0 %2674 }
 0xb5f   :  { %v2692_v6 = vmul.f32 %v6781_v3, %v2675_v37  ;;  %v2677_v15 = vpop.permute.xlu1 %2676  ;;  %v2711_v18 = vsel %vm244_vm6, %v2710_v52, %v2709_v49 }
 0xb60   :  { %v2693_v35 = vmul.f32 %v6785_v16, %v2677_v15 }
 0xb61   :  { %v2712_v21 = vrot.slane %v2692_v6, 2 }
 0xb62   :  { %v2714_v25 = vrot.slane %v2693_v35, 1  ;;  %v2651_v27 = vpop.permute.xlu0 %2650 }
 0xb63   :  { %v2713_v24 = vsel %vm247_vm7, %v2712_v21, %v2711_v18  ;;  %v2653_v58 = vmul.f32 %v2651_v27, %v6672_v1 }
 0xb64   :  { %v2715_v63 = vsel %vm250_vm8, %v2714_v25, %v2713_v24 }
 0xb65   :  { %v6812_v2 = vadd.f32 %v2715_v63, %v2653_v58 }
 0xb67   :  { %5814 = vtanh.f32 %v6812_v2 }
 0xb71   :  { %v5815_v50 = vpop.eup %5814 }
 0xb72   :  { %2727 = vrot.lane.b32.xlu1 %v5815_v50, %s6012_s2  ;;  %v2721_v8 = vrot.slane %v5815_v50, 2  ;;  %v2720_v30 = vrot.slane %v5815_v50, 1  ;;  %v2722_v41 = vrot.slane %v5815_v50, 3  ;;  %v2723_v28 = vrot.slane %v5815_v50, 4 }
 0xb73   :  { %v2724_v1 = vrot.slane %v5815_v50, 5  ;;  %v2725_v29 = vrot.slane %v5815_v50, 6  ;;  %v2726_v33 = vrot.slane %v5815_v50, 7 }
 0xb74   :  { %2731 = vrot.lane.b32.xlu0 %v2721_v8, %s6012_s2 }
 0xb76   :  { %2729 = vrot.lane.b32.xlu1 %v2720_v30, %s6012_s2 }
 0xb78   :  { %2733 = vrot.lane.b32.xlu0 %v2722_v41, %s6012_s2 }
 0xb7a   :  { %2735 = vrot.lane.b32.xlu1 %v2723_v28, %s6012_s2 }
 0xb7c   :  { %2737 = vrot.lane.b32.xlu0 %v2724_v1, %s6012_s2  ;;  %v3068_v1 = vld [vmem:[%s7810_s0 + $0x5] sm:$0x1] }
 0xb7e   :  { %2739 = vrot.lane.b32.xlu1 %v2725_v29, %s6012_s2  ;;  %v3069_v29 = vld [vmem:[%s7810_s0 + $0xd] sm:$0x1] }
 0xb80   :  { %2741 = vrot.lane.b32.xlu0 %v2726_v33, %s6012_s2  ;;  %v3070_v33 = vld [vmem:[%s7810_s0 + $0x15] sm:$0x1] }
 0xb85   :  { %v2327_v31 = vpop.f32.mrb[6].mxu0 }
 0xb86   :  { %v5514_v34 = vadd.f32 %v6826_v32, %v2327_v31  ;;  %v5234_v36 = vpop.f32.mrb[7].mxu0  ;;  %v3071_v31 = vld [vmem:[%s7810_s0 + $0x1d] sm:$0x1] }
 0xb87   :  { %v3073_v36 = vld [vmem:[%s7810_s0 + $0x2d] sm:$0x1] }
 0xb88   :  { %v4932_v45 = vmul.f32 -1.442695, %v5514_v34  ;;  %5816 = vtanh.f32 %v5514_v34  ;;  %v3072_v34 = vld [vmem:[%s7810_s0 + $0x25] sm:$0x1] }
 0xb8a   :  { %5818 = vpow2.f32 %v4932_v45  ;;  %v3074_v45 = vld [vmem:[%s7810_s0 + $0x35] sm:$0x1] }
 0xb92   :  { %v5817_v39 = vpop.eup %5816 }
 0xb93   :  { %2345 = vrot.lane.b32.xlu0 %v5817_v39, %s6011_s20  ;;  %v3075_v39 = vld [vmem:[%s7810_s0 + $0x3d] sm:$0x1] }
 0xb94   :  { %v5819_v13 = vpop.eup %5818 }
 0xb95   :  { %v2335_v59 = vadd.f32 1.0, %v5819_v13 }
 0xb97   :  { %5820 = vrcp.f32 %v2335_v59 }
 0xba1   :  { %v5821_v44 = vpop.eup %5820 }
 0xba2   :  { %2340 = vrot.lane.b32.xlu1 %v5821_v44, %s6012_s2 }
 0xbe4   :  { %v2728_v40 = vpop.permute.xlu1 %2727 }
 0xbe5   :  { %v2751_v10 = vmul.f32 %v6759_v14, %v2728_v40 }
 0xbe6   :  { %v2732_v46 = vpop.permute.xlu0 %2731 }
 0xbe7   :  { %v2753_v42 = vmul.f32 %v6765_v20, %v2732_v46 }
 0xbe8   :  { %v2730_v43 = vpop.permute.xlu1 %2729 }
 0xbe9   :  { %v2752_v19 = vmul.f32 %v6762_v54, %v2730_v43  ;;  %v2769_v48 = vrot.slane %v2753_v42, 6 }
 0xbea   :  { %v2734_v62 = vpop.permute.xlu0 %2733 }
 0xbeb   :  { %v2767_v17 = vrot.slane %v2752_v19, 7  ;;  %v2754_v11 = vmul.f32 %v6768_v55, %v2734_v62 }
 0xbec   :  { %v2736_v47 = vpop.permute.xlu1 %2735 }
 0xbed   :  { %v2768_v61 = vsel %vm232_vm2, %v2767_v17, %v2751_v10  ;;  %v2771_v60 = vrot.slane %v2754_v11, 5  ;;  %v2755_v49 = vmul.f32 %v6771_v57, %v2736_v47 }
 0xbee   :  { %v2770_v52 = vsel %vm235_vm3, %v2769_v48, %v2768_v61  ;;  %v2738_v37 = vpop.permute.xlu0 %2737 }
 0xbef   :  { %v2772_v20 = vsel %vm238_vm4, %v2771_v60, %v2770_v52  ;;  %v2773_v6 = vrot.slane %v2755_v49, 4  ;;  %v2756_v54 = vmul.f32 %v6776_v22, %v2738_v37 }
 0xbf0   :  { %v2740_v15 = vpop.permute.xlu1 %2739 }
 0xbf1   :  { %v2774_v14 = vsel %vm241_vm5, %v2773_v6, %v2772_v20  ;;  %v2775_v18 = vrot.slane %v2756_v54, 3  ;;  %v2757_v55 = vmul.f32 %v6781_v3, %v2740_v15 }
 0xbf2   :  { %v2742_v35 = vpop.permute.xlu0 %2741 }
 0xbf3   :  { %v2776_v21 = vsel %vm244_vm6, %v2775_v18, %v2774_v14  ;;  %v2777_v25 = vrot.slane %v2757_v55, 2  ;;  %v2758_v57 = vmul.f32 %v6785_v16, %v2742_v35 }
 0xbf5   :  { %v2779_v27 = vrot.slane %v2758_v57, 1  ;;  %v2778_v24 = vsel %vm247_vm7, %v2777_v25, %v2776_v21 }
 0xbf7   :  { %v2780_v58 = vsel %vm250_vm8, %v2779_v27, %v2778_v24 }
 0xbf8   :  { %2781 = vrot.lane.b32.xlu1 %v2780_v58, %s6013_s4 }
 0xc05   :  { %v2346_v22 = vpop.permute.xlu0 %2345 }
 0xc06   :  { %v2348_v50 = vmul.f32 %v5821_v44, %v2346_v22 }
 0xc14   :  { %v2341_v63 = vpop.permute.xlu1 %2340 }
 0xc15   :  { %v2343_v8 = vmul.f32 %v2341_v63, %v6703_v12 }
 0xc17   :  { %v6848_v30 = vadd.f32 %v2348_v50, %v2343_v8 }
 0xc19   :  { %5822 = vtanh.f32 %v6848_v30 }
 0xc23   :  { %v5823_v3 = vpop.eup %5822 }
 0xc24   :  { %2352 = vrot.lane.b32.xlu0 %v5823_v3, %s6012_s2 }
 0xc6a   :  { %v2782_v16 = vpop.permute.xlu1 %2781 }
 0xc6b   :  { %5255 = vmatmul.mubr.msk.f32.vlgmr.msra.gmra.mrb[10].mxu1 %vm35_vm0, %v2782_v16  ;;  %5277 = vmatmul.mubr.msk.f32.vlgmr.msra.gmra.mrb[8].mxu0 %vm35_vm0, %v2782_v16 }
 0xc6c   :  { %5453 = vmatpush3.bf16.msra.mxu1 %v6264_v53  ;;  %5265 = vmatprep.mubr.msk.f32.mxu1 %vm6009_vm1, %v6010_v4 }
 0xc6d   :  { %5454 = vmatprep.subr.bf16.mxu1 %v6008_v0  ;;  %5465 = vmatpush3.bf16.msra.mxu0 %v6228_v23 }
 0xc6e   :  { %5466 = vmatprep.subr.bf16.mxu0 %v6008_v0  ;;  %5287 = vmatprep.mubr.msk.f32.mxu0 %vm6009_vm1, %v6010_v4 }
 0xc70   :  { %5456 = vmatpush3.bf16.msra.mxu1 %v6275_v56 }
 0xc71   :  { %5475 = vmatprep.subr.bf16.mxu1 %v6008_v0  ;;  %5468 = vmatpush3.bf16.msra.mxu0 %v6235_v26 }
 0xc72   :  { %5469 = vmatprep.subr.bf16.mxu0 %v6008_v0 }
 0xc96   :  { %v2353_v12 = vpop.permute.xlu0 %2352 }
 0xc97   :  { %v6866_v41 = vmul.f32 %v5821_v44, %v2353_v12 }
 0xc99   :  { %2855 = vrot.lane.b32.xlu1 %v6866_v41, %s6013_s4 }
 0xd0b   :  { %v2856_v28 = vpop.permute.xlu1 %2855 }
 0xd0c   :  { %5266 = vmatmul.mubr.msk.f32.vlgmr.msra.gmra.mrb[10].mxu1 %vm35_vm0, %v2856_v28 }
 0xd0d   :  { %5477 = vmatpush3.bf16.msra.mxu1 %v6077_v5  ;;  %5309 = vmatprep.mubr.msk.f32.mxu1 %vm6009_vm1, %v6010_v4 }
 0xd0e   :  { %5478 = vmatprep.subr.bf16.mxu1 %v6008_v0 }
 0xd11   :  { %5480 = vmatpush3.bf16.msra.mxu1 %v6100_v9 }
 0xd12   :  { %5481 = vmatprep.subr.bf16.mxu1 %v6008_v0 }
 0xd3e   :  { %v3142_v13 = vpop.f32.mrb[8].mxu0 }
 0xd3f   :  { %v3147_v59 = vrot.slane %v3142_v13, 1  ;;  %v3148_v44 = vrot.slane %v3142_v13, 2  ;;  %v3149_v40 = vrot.slane %v3142_v13, 3  ;;  %v3150_v46 = vrot.slane %v3142_v13, 4  ;;  %v5278_v42 = vpop.f32.mrb[9].mxu0 }
 0xd40   :  { %v3151_v43 = vrot.slane %v3142_v13, 5  ;;  %v3152_v19 = vrot.slane %v3142_v13, 6  ;;  %v3153_v62 = vrot.slane %v3142_v13, 7  ;;  %v3162_v10 = vadd.f32 %v3142_v13, %v3068_v1 }
 0xd41   :  { %v3163_v17 = vadd.f32 %v3147_v59, %v3069_v29  ;;  %v3164_v11 = vadd.f32 %v3148_v44, %v3070_v33  ;;  %v3165_v48 = vadd.f32 %v3149_v40, %v3071_v31  ;;  %v3166_v47 = vadd.f32 %v3150_v46, %v3072_v34 }
 0xd42   :  { %v3167_v61 = vadd.f32 %v3151_v43, %v3073_v36  ;;  %v3168_v60 = vadd.f32 %v3152_v19, %v3074_v45  ;;  %v3169_v49 = vadd.f32 %v3153_v62, %v3075_v39  ;;  %v4946_v52 = vmul.f32 -1.442695, %v3162_v10 }
 0xd43   :  { %v4947_v37 = vmul.f32 -1.442695, %v3163_v17  ;;  %v4948_v20 = vmul.f32 -1.442695, %v3164_v11  ;;  %v4949_v6 = vmul.f32 -1.442695, %v3165_v48  ;;  %5824 = vtanh.f32 %v3162_v10 }
 0xd44   :  { %5826 = vpow2.f32 %v4946_v52  ;;  %v4950_v54 = vmul.f32 -1.442695, %v3166_v47  ;;  %v4951_v15 = vmul.f32 -1.442695, %v3167_v61  ;;  %v4952_v14 = vmul.f32 -1.442695, %v3168_v60 }
 0xd45   :  { %5828 = vpow2.f32 %v4947_v37  ;;  %v4953_v18 = vmul.f32 -1.442695, %v3169_v49 }
 0xd46   :  { %5830 = vpow2.f32 %v4948_v20 }
 0xd47   :  { %5832 = vpow2.f32 %v4949_v6 }
 0xd48   :  { %5834 = vpow2.f32 %v4950_v54 }
 0xd49   :  { %5836 = vpow2.f32 %v4951_v15 }
 0xd4a   :  { %5838 = vpow2.f32 %v4952_v14 }
 0xd4b   :  { %5840 = vpow2.f32 %v4953_v18 }
 0xd4c   :  { %5842 = vtanh.f32 %v3163_v17 }
 0xd4d   :  { %v5825_v55 = vpop.eup %5824  ;;  %5844 = vtanh.f32 %v3164_v11 }
 0xd4e   :  { %v5827_v35 = vpop.eup %5826  ;;  %5846 = vtanh.f32 %v3165_v48  ;;  %3260 = vrot.lane.b32.xlu0 %v5825_v55, %s6011_s20 }
 0xd4f   :  { %v5829_v21 = vpop.eup %5828  ;;  %v3194_v25 = vadd.f32 1.0, %v5827_v35  ;;  %5848 = vtanh.f32 %v3166_v47 }
 0xd50   :  { %v5831_v57 = vpop.eup %5830  ;;  %v3195_v27 = vadd.f32 1.0, %v5829_v21  ;;  %5850 = vtanh.f32 %v3167_v61 }
 0xd51   :  { %v5833_v24 = vpop.eup %5832  ;;  %v3196_v58 = vadd.f32 1.0, %v5831_v57  ;;  %5852 = vrcp.f32 %v3194_v25 }
 0xd52   :  { %v5835_v22 = vpop.eup %5834  ;;  %v3197_v63 = vadd.f32 1.0, %v5833_v24  ;;  %5854 = vrcp.f32 %v3195_v27 }
 0xd53   :  { %v5837_v50 = vpop.eup %5836  ;;  %v3198_v8 = vadd.f32 1.0, %v5835_v22  ;;  %5856 = vrcp.f32 %v3196_v58 }
 0xd54   :  { %v5839_v3 = vpop.eup %5838  ;;  %v3199_v16 = vadd.f32 1.0, %v5837_v50  ;;  %5858 = vrcp.f32 %v3197_v63 }
 0xd55   :  { %v5841_v12 = vpop.eup %5840  ;;  %v3200_v28 = vadd.f32 1.0, %v5839_v3  ;;  %5860 = vrcp.f32 %v3198_v8 }
 0xd56   :  { %v5843_v1 = vpop.eup %5842  ;;  %v3201_v29 = vadd.f32 1.0, %v5841_v12  ;;  %5862 = vrcp.f32 %v3199_v16 }
 0xd57   :  { %v5845_v33 = vpop.eup %5844  ;;  %5864 = vrcp.f32 %v3200_v28  ;;  %3262 = vrot.lane.b32.xlu0 %v5843_v1, %s6011_s20 }
 0xd58   :  { %v5847_v31 = vpop.eup %5846  ;;  %5866 = vrcp.f32 %v3201_v29  ;;  %3264 = vrot.lane.b32.xlu1 %v5845_v33, %s6011_s20 }
 0xd59   :  { %v5849_v34 = vpop.eup %5848  ;;  %5868 = vtanh.f32 %v3168_v60 }
 0xd5a   :  { %v5851_v36 = vpop.eup %5850  ;;  %5870 = vtanh.f32 %v3169_v49 }
 0xd5b   :  { %v6904_v45 = vpop.eup %5852  ;;  %3268 = vrot.lane.b32.xlu0 %v5849_v34, %s6011_s20 }
 0xd5c   :  { %v6907_v39 = vpop.eup %5854  ;;  %3266 = vrot.lane.b32.xlu1 %v5847_v31, %s6011_s20 }
 0xd5d   :  { %v6910_v13 = vpop.eup %5856  ;;  %v3234_v59 = vrot.slane %v6907_v39, 7 }
 0xd5e   :  { %v6913_v44 = vpop.eup %5858  ;;  %v3236_v40 = vrot.slane %v6910_v13, 6 }
 0xd5f   :  { %v6916_v46 = vpop.eup %5860  ;;  %v3235_v42 = vsel %vm232_vm2, %v3234_v59, %v6904_v45  ;;  %v3238_v43 = vrot.slane %v6913_v44, 5 }
 0xd60   :  { %v6921_v19 = vpop.eup %5862  ;;  %3270 = vrot.lane.b32.xlu1 %v5851_v36, %s6011_s20  ;;  %v3237_v62 = vsel %vm235_vm3, %v3236_v40, %v3235_v42  ;;  %v3240_v10 = vrot.slane %v6916_v46, 4 }
 0xd61   :  { %v6926_v17 = vpop.eup %5864  ;;  %v3239_v11 = vsel %vm238_vm4, %v3238_v43, %v3237_v62  ;;  %v3242_v48 = vrot.slane %v6921_v19, 3 }
 0xd62   :  { %v6930_v47 = vpop.eup %5866  ;;  %v3241_v61 = vsel %vm241_vm5, %v3240_v10, %v3239_v11  ;;  %v3244_v60 = vrot.slane %v6926_v17, 2 }
 0xd63   :  { %v5869_v49 = vpop.eup %5868  ;;  %v3243_v52 = vsel %vm244_vm6, %v3242_v48, %v3241_v61  ;;  %v3246_v37 = vrot.slane %v6930_v47, 1 }
 0xd64   :  { %v5871_v20 = vpop.eup %5870  ;;  %3272 = vrot.lane.b32.xlu0 %v5869_v49, %s6011_s20  ;;  %v3245_v6 = vsel %vm247_vm7, %v3244_v60, %v3243_v52 }
 0xd65   :  { %3274 = vrot.lane.b32.xlu1 %v5871_v20, %s6011_s20  ;;  %v3247_v54 = vsel %vm250_vm8, %v3246_v37, %v3245_v6 }
 0xd68   :  { %3248 = vrot.lane.b32.xlu0 %v3247_v54, %s6012_s2 }
 0xdc0   :  { %v3261_v15 = vpop.permute.xlu0 %3260 }
 0xdc1   :  { %v3284_v21 = vmul.f32 %v6904_v45, %v3261_v15 }
 0xdc9   :  { %v3263_v14 = vpop.permute.xlu0 %3262 }
 0xdca   :  { %v3265_v18 = vpop.permute.xlu1 %3264  ;;  %v3285_v55 = vmul.f32 %v6907_v39, %v3263_v14 }
 0xdcb   :  { %v3286_v35 = vmul.f32 %v6910_v13, %v3265_v18 }
 0xdcc   :  { %v3300_v25 = vrot.slane %v3285_v55, 7 }
 0xdcd   :  { %v3269_v57 = vpop.permute.xlu0 %3268  ;;  %v3302_v27 = vrot.slane %v3286_v35, 6 }
 0xdce   :  { %v3301_v24 = vsel %vm232_vm2, %v3300_v25, %v3284_v21  ;;  %v3267_v58 = vpop.permute.xlu1 %3266  ;;  %v3288_v22 = vmul.f32 %v6916_v46, %v3269_v57 }
 0xdcf   :  { %v3287_v63 = vmul.f32 %v6913_v44, %v3267_v58  ;;  %v3303_v50 = vsel %vm235_vm3, %v3302_v27, %v3301_v24 }
 0xdd0   :  { %v3306_v3 = vrot.slane %v3288_v22, 4 }
 0xdd1   :  { %v3304_v8 = vrot.slane %v3287_v63, 5 }
 0xdd2   :  { %v3271_v16 = vpop.permute.xlu1 %3270 }
 0xdd3   :  { %v3305_v12 = vsel %vm238_vm4, %v3304_v8, %v3303_v50  ;;  %v3289_v28 = vmul.f32 %v6921_v19, %v3271_v16 }
 0xdd4   :  { %v3307_v1 = vsel %vm241_vm5, %v3306_v3, %v3305_v12 }
 0xdd5   :  { %v3308_v29 = vrot.slane %v3289_v28, 3 }
 0xdd6   :  { %v3273_v33 = vpop.permute.xlu0 %3272 }
 0xdd7   :  { %v3290_v31 = vmul.f32 %v6926_v17, %v3273_v33  ;;  %v3275_v34 = vpop.permute.xlu1 %3274  ;;  %v3309_v36 = vsel %vm244_vm6, %v3308_v29, %v3307_v1 }
 0xdd8   :  { %v3291_v59 = vmul.f32 %v6930_v47, %v3275_v34 }
 0xdd9   :  { %v3310_v40 = vrot.slane %v3290_v31, 2 }
 0xdda   :  { %v3312_v42 = vrot.slane %v3291_v59, 1  ;;  %v3249_v43 = vpop.permute.xlu0 %3248 }
 0xddb   :  { %v3311_v62 = vsel %vm247_vm7, %v3310_v40, %v3309_v36  ;;  %v3251_v10 = vmul.f32 %v3249_v43, %v6812_v2 }
 0xddc   :  { %v3313_v11 = vsel %vm250_vm8, %v3312_v42, %v3311_v62 }
 0xddd   :  { %v6957_v48 = vadd.f32 %v3313_v11, %v3251_v10 }
 0xddf   :  { %v2925_v61 = vpop.f32.mrb[10].mxu1  ;;  %5872 = vtanh.f32 %v6957_v48 }
 0xde0   :  { %v5515_v60 = vadd.f32 %v6826_v32, %v2925_v61  ;;  %v5267_v49 = vpop.f32.mrb[11].mxu1 }
 0xde2   :  { %v4944_v52 = vmul.f32 -1.442695, %v5515_v60  ;;  %5874 = vtanh.f32 %v5515_v60 }
 0xde4   :  { %5876 = vpow2.f32 %v4944_v52 }
 0xde9   :  { %v5873_v37 = vpop.eup %5872 }
 0xdea   :  { %v3319_v2 = vrot.slane %v5873_v37, 2  ;;  %v3320_v15 = vrot.slane %v5873_v37, 3  ;;  %v3322_v14 = vrot.slane %v5873_v37, 5  ;;  %v3324_v55 = vrot.slane %v5873_v37, 7 }
 0xdeb   :  { %v3318_v35 = vrot.slane %v5873_v37, 1  ;;  %v3321_v21 = vrot.slane %v5873_v37, 4  ;;  %v3323_v25 = vrot.slane %v5873_v37, 6 }
 0xdec   :  { %v5875_v20 = vpop.eup %5874 }
 0xded   :  { %2943 = vrot.lane.b32.xlu0 %v5875_v20, %s6011_s20 }
 0xdee   :  { %v5877_v6 = vpop.eup %5876 }
 0xdef   :  { %v2933_v54 = vadd.f32 1.0, %v5877_v6  ;;  %v3666_v6 = vld [vmem:[%s7810_s0 + $0x6] sm:$0x1] }
 0xdf1   :  { %5878 = vrcp.f32 %v2933_v54  ;;  %3329 = vrot.lane.b32.xlu0 %v3319_v2, %s6012_s2  ;;  %v3667_v54 = vld [vmem:[%s7810_s0 + $0xe] sm:$0x1]  ;;  %v3669_v2 = vld [vmem:[%s7810_s0 + $0x1e] sm:$0x1] }
 0xdf5   :  { %3331 = vrot.lane.b32.xlu0 %v3320_v15, %s6012_s2  ;;  %v3671_v15 = vld [vmem:[%s7810_s0 + $0x2e] sm:$0x1] }
 0xdf9   :  { %3335 = vrot.lane.b32.xlu0 %v3322_v14, %s6012_s2  ;;  %v3672_v14 = vld [vmem:[%s7810_s0 + $0x36] sm:$0x1] }
 0xdfb   :  { %v5879_v18 = vpop.eup %5878 }
 0xdfc   :  { %2938 = vrot.lane.b32.xlu1 %v5879_v18, %s6012_s2 }
 0xdfd   :  { %3339 = vrot.lane.b32.xlu0 %v3324_v55, %s6012_s2 }
 0xe00   :  { %3325 = vrot.lane.b32.xlu1 %v5873_v37, %s6012_s2 }
 0xe04   :  { %3327 = vrot.lane.b32.xlu1 %v3318_v35, %s6012_s2 }
 0xe08   :  { %3333 = vrot.lane.b32.xlu1 %v3321_v21, %s6012_s2 }
 0xe0c   :  { %3337 = vrot.lane.b32.xlu1 %v3323_v25, %s6012_s2 }
 0xe5f   :  { %v2944_v57 = vpop.permute.xlu0 %2943 }
 0xe60   :  { %v2946_v58 = vmul.f32 %v5879_v18, %v2944_v57 }
 0xe63   :  { %v3330_v27 = vpop.permute.xlu0 %3329 }
 0xe64   :  { %v3351_v16 = vmul.f32 %v6910_v13, %v3330_v27 }
 0xe66   :  { %v3367_v31 = vrot.slane %v3351_v16, 6 }
 0xe67   :  { %v3332_v22 = vpop.permute.xlu0 %3331 }
 0xe68   :  { %v3352_v28 = vmul.f32 %v6913_v44, %v3332_v22 }
 0xe6a   :  { %v3369_v36 = vrot.slane %v3352_v28, 5 }
 0xe6b   :  { %v3336_v3 = vpop.permute.xlu0 %3335 }
 0xe6c   :  { %v3354_v42 = vmul.f32 %v6921_v19, %v3336_v3 }
 0xe6e   :  { %v2939_v24 = vpop.permute.xlu1 %2938  ;;  %v3373_v61 = vrot.slane %v3354_v42, 3 }
 0xe6f   :  { %v2941_v63 = vmul.f32 %v2939_v24, %v6848_v30  ;;  %v3340_v30 = vpop.permute.xlu0 %3339 }
 0xe71   :  { %v6972_v50 = vadd.f32 %v2946_v58, %v2941_v63 }
 0xe72   :  { %v3326_v8 = vpop.permute.xlu1 %3325 }
 0xe73   :  { %5880 = vtanh.f32 %v6972_v50  ;;  %v3349_v29 = vmul.f32 %v6904_v45, %v3326_v8 }
 0xe76   :  { %v3328_v12 = vpop.permute.xlu1 %3327 }
 0xe77   :  { %v3350_v1 = vmul.f32 %v6907_v39, %v3328_v12  ;;  %v3356_v39 = vmul.f32 %v6930_v47, %v3340_v30 }
 0xe79   :  { %v3365_v33 = vrot.slane %v3350_v1, 7 }
 0xe7a   :  { %v3334_v34 = vpop.permute.xlu1 %3333 }
 0xe7b   :  { %v3366_v59 = vsel %vm232_vm2, %v3365_v33, %v3349_v29  ;;  %v3353_v40 = vmul.f32 %v6916_v46, %v3334_v34  ;;  %v3377_v46 = vrot.slane %v3356_v39, 1 }
 0xe7c   :  { %v3368_v13 = vsel %vm235_vm3, %v3367_v31, %v3366_v59 }
 0xe7d   :  { %v5881_v43 = vpop.eup %5880  ;;  %v3370_v44 = vsel %vm238_vm4, %v3369_v36, %v3368_v13  ;;  %v3371_v62 = vrot.slane %v3353_v40, 4 }
 0xe7e   :  { %v3338_v45 = vpop.permute.xlu1 %3337  ;;  %2950 = vrot.lane.b32.xlu1 %v5881_v43, %s6012_s2 }
 0xe7f   :  { %v3372_v10 = vsel %vm241_vm5, %v3371_v62, %v3370_v44  ;;  %v3355_v11 = vmul.f32 %v6926_v17, %v3338_v45 }
 0xe80   :  { %v3374_v19 = vsel %vm244_vm6, %v3373_v61, %v3372_v10 }
 0xe81   :  { %v3375_v60 = vrot.slane %v3355_v11, 2 }
 0xe83   :  { %v3376_v49 = vsel %vm247_vm7, %v3375_v60, %v3374_v19 }
 0xe84   :  { %v3378_v52 = vsel %vm250_vm8, %v3377_v46, %v3376_v49 }
 0xe85   :  { %3379 = vrot.lane.b32.xlu0 %v3378_v52, %s6013_s4 }
 0xef0   :  { %v2951_v37 = vpop.permute.xlu1 %2950 }
 0xef1   :  { %v6992_v47 = vmul.f32 %v5879_v18, %v2951_v37  ;;  %v3673_v18 = vld [vmem:[%s7810_s0 + $0x3e] sm:$0x1] }
 0xef3   :  { %3453 = vrot.lane.b32.xlu1 %v6992_v47, %s6013_s4 }
 0xef7   :  { %v3380_v20 = vpop.permute.xlu0 %3379 }
 0xef8   :  { %5288 = vmatmul.mubr.msk.f32.vlgmr.msra.gmra.mrb[10].mxu0 %vm35_vm0, %v3380_v20  ;;  %5310 = vmatmul.mubr.msk.f32.vlgmr.msra.gmra.mrb[12].mxu1 %vm35_vm0, %v3380_v20 }
 0xef9   :  { %5471 = vmatpush3.bf16.msra.mxu0 %v6264_v53  ;;  %5298 = vmatprep.mubr.msk.f32.mxu0 %vm6009_vm1, %v6010_v4 }
 0xefa   :  { %5472 = vmatprep.subr.bf16.mxu0 %v6008_v0  ;;  %5483 = vmatpush3.bf16.msra.mxu1 %v6228_v23 }
 0xefb   :  { %5484 = vmatprep.subr.bf16.mxu1 %v6008_v0  ;;  %5320 = vmatprep.mubr.msk.f32.mxu1 %vm6009_vm1, %v6010_v4 }
 0xefd   :  { %5474 = vmatpush3.bf16.msra.mxu0 %v6275_v56 }
 0xefe   :  { %5493 = vmatprep.subr.bf16.mxu0 %v6008_v0  ;;  %5486 = vmatpush3.bf16.msra.mxu1 %v6235_v26 }
 0xeff   :  { %5487 = vmatprep.subr.bf16.mxu1 %v6008_v0 }
 0xf65   :  { %v3454_v17 = vpop.permute.xlu1 %3453 }
 0xf66   :  { %5299 = vmatmul.mubr.msk.f32.vlgmr.msra.gmra.mrb[10].mxu0 %vm35_vm0, %v3454_v17 }
 0xf67   :  { %5495 = vmatpush3.bf16.msra.mxu0 %v6077_v5  ;;  %5342 = vmatprep.mubr.msk.f32.mxu0 %vm6009_vm1, %v6010_v4  ;;  %v3668_v5 = vld [vmem:[%s7810_s0 + $0x16] sm:$0x1] }
 0xf68   :  { %5496 = vmatprep.subr.bf16.mxu0 %v6008_v0 }
 0xf6b   :  { %5498 = vmatpush3.bf16.msra.mxu0 %v6100_v9  ;;  %v3670_v9 = vld [vmem:[%s7810_s0 + $0x26] sm:$0x1] }
 0xf6c   :  { %5499 = vmatprep.subr.bf16.mxu0 %v6008_v0 }
 0xfcb   :  { %v3740_v55 = vpop.f32.mrb[12].mxu1 }
 0xfcc   :  { %v3745_v35 = vrot.slane %v3740_v55, 1  ;;  %v3746_v21 = vrot.slane %v3740_v55, 2  ;;  %v3747_v25 = vrot.slane %v3740_v55, 3  ;;  %v3748_v57 = vrot.slane %v3740_v55, 4  ;;  %v5311_v27 = vpop.f32.mrb[13].mxu1 }
 0xfcd   :  { %v3749_v24 = vrot.slane %v3740_v55, 5  ;;  %v3750_v58 = vrot.slane %v3740_v55, 6  ;;  %v3751_v22 = vrot.slane %v3740_v55, 7  ;;  %v3760_v63 = vadd.f32 %v3740_v55, %v3666_v6 }
 0xfce   :  { %v3761_v8 = vadd.f32 %v3745_v35, %v3667_v54  ;;  %v3762_v3 = vadd.f32 %v3746_v21, %v3668_v5  ;;  %v3763_v16 = vadd.f32 %v3747_v25, %v3669_v2  ;;  %v3764_v12 = vadd.f32 %v3748_v57, %v3670_v9 }
 0xfcf   :  { %v3765_v28 = vadd.f32 %v3749_v24, %v3671_v15  ;;  %v3766_v1 = vadd.f32 %v3750_v58, %v3672_v14  ;;  %v3767_v29 = vadd.f32 %v3751_v22, %v3673_v18  ;;  %v4958_v33 = vmul.f32 -1.442695, %v3760_v63 }
 0xfd0   :  { %v4959_v31 = vmul.f32 -1.442695, %v3761_v8  ;;  %v4960_v34 = vmul.f32 -1.442695, %v3762_v3  ;;  %v4961_v36 = vmul.f32 -1.442695, %v3763_v16  ;;  %5882 = vtanh.f32 %v3760_v63 }
 0xfd1   :  { %5884 = vpow2.f32 %v4958_v33  ;;  %v4962_v30 = vmul.f32 -1.442695, %v3764_v12  ;;  %v4963_v59 = vmul.f32 -1.442695, %v3765_v28  ;;  %v4964_v40 = vmul.f32 -1.442695, %v3766_v1 }
 0xfd2   :  { %5886 = vpow2.f32 %v4959_v31  ;;  %v4965_v42 = vmul.f32 -1.442695, %v3767_v29 }
 0xfd3   :  { %5888 = vpow2.f32 %v4960_v34 }
 0xfd4   :  { %5890 = vpow2.f32 %v4961_v36 }
 0xfd5   :  { %5892 = vpow2.f32 %v4962_v30 }
 0xfd6   :  { %5894 = vpow2.f32 %v4963_v59 }
 0xfd7   :  { %5896 = vpow2.f32 %v4964_v40 }
 0xfd8   :  { %5898 = vpow2.f32 %v4965_v42 }
 0xfd9   :  { %5900 = vtanh.f32 %v3761_v8 }
 0xfda   :  { %v5883_v13 = vpop.eup %5882  ;;  %5902 = vtanh.f32 %v3762_v3 }
 0xfdb   :  { %v5885_v43 = vpop.eup %5884  ;;  %5904 = vtanh.f32 %v3763_v16  ;;  %3858 = vrot.lane.b32.xlu0 %v5883_v13, %s6011_s20 }
 0xfdc   :  { %v5887_v44 = vpop.eup %5886  ;;  %v3792_v62 = vadd.f32 1.0, %v5885_v43  ;;  %5906 = vtanh.f32 %v3764_v12 }
 0xfdd   :  { %v5889_v39 = vpop.eup %5888  ;;  %v3793_v45 = vadd.f32 1.0, %v5887_v44  ;;  %5908 = vtanh.f32 %v3765_v28 }
 0xfde   :  { %v5891_v10 = vpop.eup %5890  ;;  %v3794_v11 = vadd.f32 1.0, %v5889_v39  ;;  %5910 = vrcp.f32 %v3792_v62 }
 0xfdf   :  { %v5893_v61 = vpop.eup %5892  ;;  %v3795_v60 = vadd.f32 1.0, %v5891_v10  ;;  %5912 = vrcp.f32 %v3793_v45 }
 0xfe0   :  { %v5895_v46 = vpop.eup %5894  ;;  %v3796_v19 = vadd.f32 1.0, %v5893_v61  ;;  %5914 = vrcp.f32 %v3794_v11 }
 0xfe1   :  { %v5897_v49 = vpop.eup %5896  ;;  %v3797_v52 = vadd.f32 1.0, %v5895_v46  ;;  %5916 = vrcp.f32 %v3795_v60 }
 0xfe2   :  { %v5899_v37 = vpop.eup %5898  ;;  %v3798_v20 = vadd.f32 1.0, %v5897_v49  ;;  %5918 = vrcp.f32 %v3796_v19 }
 0xfe3   :  { %v5901_v17 = vpop.eup %5900  ;;  %v3799_v6 = vadd.f32 1.0, %v5899_v37  ;;  %5920 = vrcp.f32 %v3797_v52 }
 0xfe4   :  { %v5903_v54 = vpop.eup %5902  ;;  %5922 = vrcp.f32 %v3798_v20  ;;  %3860 = vrot.lane.b32.xlu0 %v5901_v17, %s6011_s20 }
 0xfe5   :  { %v5905_v5 = vpop.eup %5904  ;;  %5924 = vrcp.f32 %v3799_v6  ;;  %3862 = vrot.lane.b32.xlu1 %v5903_v54, %s6011_s20 }
 0xfe6   :  { %v5907_v2 = vpop.eup %5906  ;;  %5926 = vtanh.f32 %v3766_v1 }
 0xfe7   :  { %v5909_v9 = vpop.eup %5908  ;;  %5928 = vtanh.f32 %v3767_v29 }
 0xfe8   :  { %v7044_v15 = vpop.eup %5910  ;;  %3866 = vrot.lane.b32.xlu0 %v5907_v2, %s6011_s20 }
 0xfe9   :  { %v7047_v14 = vpop.eup %5912  ;;  %3864 = vrot.lane.b32.xlu1 %v5905_v5, %s6011_s20 }
 0xfea   :  { %v7050_v18 = vpop.eup %5914  ;;  %v3832_v55 = vrot.slane %v7047_v14, 7 }
 0xfeb   :  { %v7053_v35 = vpop.eup %5916  ;;  %v3834_v21 = vrot.slane %v7050_v18, 6 }
 0xfec   :  { %v7056_v25 = vpop.eup %5918  ;;  %v3833_v57 = vsel %vm232_vm2, %v3832_v55, %v7044_v15  ;;  %v3836_v27 = vrot.slane %v7053_v35, 5 }
 0xfed   :  { %v7061_v24 = vpop.eup %5920  ;;  %3868 = vrot.lane.b32.xlu1 %v5909_v9, %s6011_s20  ;;  %v3835_v58 = vsel %vm235_vm3, %v3834_v21, %v3833_v57  ;;  %v3838_v22 = vrot.slane %v7056_v25, 4 }
 0xfee   :  { %v7066_v63 = vpop.eup %5922  ;;  %v3837_v8 = vsel %vm238_vm4, %v3836_v27, %v3835_v58  ;;  %v3840_v3 = vrot.slane %v7061_v24, 3 }
 0xfef   :  { %v7070_v16 = vpop.eup %5924  ;;  %v3839_v12 = vsel %vm241_vm5, %v3838_v22, %v3837_v8  ;;  %v3842_v28 = vrot.slane %v7066_v63, 2 }
 0xff0   :  { %v5927_v1 = vpop.eup %5926  ;;  %v3841_v29 = vsel %vm244_vm6, %v3840_v3, %v3839_v12  ;;  %v3844_v33 = vrot.slane %v7070_v16, 1 }
 0xff1   :  { %v5929_v31 = vpop.eup %5928  ;;  %3870 = vrot.lane.b32.xlu0 %v5927_v1, %s6011_s20  ;;  %v3843_v34 = vsel %vm247_vm7, %v3842_v28, %v3841_v29 }
 0xff2   :  { %3872 = vrot.lane.b32.xlu1 %v5929_v31, %s6011_s20  ;;  %v3845_v36 = vsel %vm250_vm8, %v3844_v33, %v3843_v34 }
 0xff5   :  { %3846 = vrot.lane.b32.xlu0 %v3845_v36, %s6012_s2 }
0x1039   :  { %v3523_v30 = vpop.f32.mrb[10].mxu0 }
0x103a   :  { %v5516_v59 = vadd.f32 %v6826_v32, %v3523_v30  ;;  %v5300_v40 = vpop.f32.mrb[11].mxu0 }
0x103c   :  { %v4956_v42 = vmul.f32 -1.442695, %v5516_v59  ;;  %5930 = vtanh.f32 %v5516_v59 }
0x103e   :  { %5932 = vpow2.f32 %v4956_v42 }
0x1046   :  { %v5931_v13 = vpop.eup %5930 }
0x1047   :  { %3541 = vrot.lane.b32.xlu0 %v5931_v13, %s6011_s20 }
0x1048   :  { %v5933_v43 = vpop.eup %5932 }
0x1049   :  { %v3531_v44 = vadd.f32 1.0, %v5933_v43 }
0x104b   :  { %5934 = vrcp.f32 %v3531_v44 }
0x104d   :  { %v3859_v62 = vpop.permute.xlu0 %3858 }
0x104e   :  { %v3882_v61 = vmul.f32 %v7044_v15, %v3859_v62 }
0x1055   :  { %v7083_v39 = vpop.eup %5934 }
0x1056   :  { %v3861_v45 = vpop.permute.xlu0 %3860  ;;  %3536 = vrot.lane.b32.xlu1 %v7083_v39, %s6012_s2 }
0x1057   :  { %v3863_v10 = vpop.permute.xlu1 %3862  ;;  %v3883_v32 = vmul.f32 %v7047_v14, %v3861_v45 }
0x1058   :  { %v3884_v11 = vmul.f32 %v7050_v18, %v3863_v10 }
0x1059   :  { %v3898_v60 = vrot.slane %v3883_v32, 7 }
0x105a   :  { %v3867_v46 = vpop.permute.xlu0 %3866  ;;  %v3900_v19 = vrot.slane %v3884_v11, 6 }
0x105b   :  { %v3899_v49 = vsel %vm232_vm2, %v3898_v60, %v3882_v61  ;;  %v3865_v52 = vpop.permute.xlu1 %3864  ;;  %v3886_v37 = vmul.f32 %v7056_v25, %v3867_v46 }
0x105c   :  { %v3885_v20 = vmul.f32 %v7053_v35, %v3865_v52  ;;  %v3901_v17 = vsel %vm235_vm3, %v3900_v19, %v3899_v49 }
0x105d   :  { %v3904_v54 = vrot.slane %v3886_v37, 4 }
0x105e   :  { %v3902_v6 = vrot.slane %v3885_v20, 5 }
0x105f   :  { %v3869_v5 = vpop.permute.xlu1 %3868 }
0x1060   :  { %v3903_v2 = vsel %vm238_vm4, %v3902_v6, %v3901_v17  ;;  %v3887_v9 = vmul.f32 %v7061_v24, %v3869_v5 }
0x1061   :  { %v3905_v55 = vsel %vm241_vm5, %v3904_v54, %v3903_v2 }
0x1062   :  { %v3906_v21 = vrot.slane %v3887_v9, 3 }
0x1063   :  { %v3871_v57 = vpop.permute.xlu0 %3870 }
0x1064   :  { %v3888_v27 = vmul.f32 %v7066_v63, %v3871_v57  ;;  %v3873_v58 = vpop.permute.xlu1 %3872  ;;  %v3907_v22 = vsel %vm244_vm6, %v3906_v21, %v3905_v55 }
0x1065   :  { %v3889_v8 = vmul.f32 %v7070_v16, %v3873_v58 }
0x1066   :  { %v3908_v3 = vrot.slane %v3888_v27, 2 }
0x1067   :  { %v3910_v12 = vrot.slane %v3889_v8, 1  ;;  %v3847_v28 = vpop.permute.xlu0 %3846 }
0x1068   :  { %v3909_v1 = vsel %vm247_vm7, %v3908_v3, %v3907_v22  ;;  %v3849_v29 = vmul.f32 %v3847_v28, %v6957_v48 }
0x1069   :  { %v3911_v33 = vsel %vm250_vm8, %v3910_v12, %v3909_v1  ;;  %v4266_v1 = vld [vmem:[%s7810_s0 + $0x17] sm:$0x1] }
0x106a   :  { %v7103_v31 = vadd.f32 %v3911_v33, %v3849_v29  ;;  %v4268_v29 = vld [vmem:[%s7810_s0 + $0x27] sm:$0x1]  ;;  %v4269_v33 = vld [vmem:[%s7810_s0 + $0x2f] sm:$0x1] }
0x106c   :  { %5936 = vtanh.f32 %v7103_v31 }
0x1076   :  { %v5937_v34 = vpop.eup %5936 }
0x1077   :  { %3923 = vrot.lane.b32.xlu1 %v5937_v34, %s6012_s2  ;;  %v3917_v36 = vrot.slane %v5937_v34, 2  ;;  %v3916_v30 = vrot.slane %v5937_v34, 1  ;;  %v3918_v59 = vrot.slane %v5937_v34, 3  ;;  %v3919_v40 = vrot.slane %v5937_v34, 4 }
0x1078   :  { %v3920_v48 = vrot.slane %v5937_v34, 5  ;;  %v3921_v42 = vrot.slane %v5937_v34, 6  ;;  %v3922_v13 = vrot.slane %v5937_v34, 7  ;;  %v4270_v34 = vld [vmem:[%s7810_s0 + $0x37] sm:$0x1] }
0x1079   :  { %3927 = vrot.lane.b32.xlu0 %v3917_v36, %s6012_s2  ;;  %v4271_v36 = vld [vmem:[%s7810_s0 + $0x3f] sm:$0x1] }
0x107b   :  { %3925 = vrot.lane.b32.xlu1 %v3916_v30, %s6012_s2 }
0x107d   :  { %3929 = vrot.lane.b32.xlu0 %v3918_v59, %s6012_s2 }
0x107f   :  { %3931 = vrot.lane.b32.xlu1 %v3919_v40, %s6012_s2 }
0x1081   :  { %3933 = vrot.lane.b32.xlu0 %v3920_v48, %s6012_s2 }
0x1083   :  { %3935 = vrot.lane.b32.xlu1 %v3921_v42, %s6012_s2 }
0x1085   :  { %3937 = vrot.lane.b32.xlu0 %v3922_v13, %s6012_s2 }
0x10b9   :  { %v3542_v43 = vpop.permute.xlu0 %3541 }
0x10ba   :  { %v3544_v62 = vmul.f32 %v7083_v39, %v3542_v43 }
0x10c8   :  { %v3537_v44 = vpop.permute.xlu1 %3536 }
0x10c9   :  { %v3539_v45 = vmul.f32 %v3537_v44, %v6972_v50 }
0x10cb   :  { %v7116_v10 = vadd.f32 %v3544_v62, %v3539_v45 }
0x10cd   :  { %5938 = vtanh.f32 %v7116_v10 }
0x10d7   :  { %v5939_v32 = vpop.eup %5938 }
0x10d8   :  { %3548 = vrot.lane.b32.xlu1 %v5939_v32, %s6012_s2 }
0x10e9   :  { %v3924_v11 = vpop.permute.xlu1 %3923 }
0x10ea   :  { %v3947_v52 = vmul.f32 %v7044_v15, %v3924_v11 }
0x10eb   :  { %v3928_v61 = vpop.permute.xlu0 %3927 }
0x10ec   :  { %v3949_v60 = vmul.f32 %v7050_v18, %v3928_v61 }
0x10ed   :  { %v3926_v46 = vpop.permute.xlu1 %3925 }
0x10ee   :  { %v3948_v19 = vmul.f32 %v7047_v14, %v3926_v46  ;;  %v3965_v20 = vrot.slane %v3949_v60, 6 }
0x10ef   :  { %v3930_v49 = vpop.permute.xlu0 %3929 }
0x10f0   :  { %v3963_v37 = vrot.slane %v3948_v19, 7  ;;  %v3950_v50 = vmul.f32 %v7053_v35, %v3930_v49 }
0x10f1   :  { %v3932_v17 = vpop.permute.xlu1 %3931 }
0x10f2   :  { %v3964_v6 = vsel %vm232_vm2, %v3963_v37, %v3947_v52  ;;  %v3967_v54 = vrot.slane %v3950_v50, 5  ;;  %v3951_v5 = vmul.f32 %v7056_v25, %v3932_v17 }
0x10f3   :  { %v3966_v2 = vsel %vm235_vm3, %v3965_v20, %v3964_v6  ;;  %v3934_v9 = vpop.permute.xlu0 %3933 }
0x10f4   :  { %v3968_v18 = vsel %vm238_vm4, %v3967_v54, %v3966_v2  ;;  %v3969_v55 = vrot.slane %v3951_v5, 4  ;;  %v3952_v14 = vmul.f32 %v7061_v24, %v3934_v9 }
0x10f5   :  { %v3936_v21 = vpop.permute.xlu1 %3935 }
0x10f6   :  { %v3970_v15 = vsel %vm241_vm5, %v3969_v55, %v3968_v18  ;;  %v3971_v57 = vrot.slane %v3952_v14, 3  ;;  %v3953_v35 = vmul.f32 %v7066_v63, %v3936_v21 }
0x10f7   :  { %v3938_v27 = vpop.permute.xlu0 %3937 }
0x10f8   :  { %v3972_v58 = vsel %vm244_vm6, %v3971_v57, %v3970_v15  ;;  %v3973_v22 = vrot.slane %v3953_v35, 2  ;;  %v3954_v25 = vmul.f32 %v7070_v16, %v3938_v27 }
0x10fa   :  { %v3974_v8 = vsel %vm247_vm7, %v3973_v22, %v3972_v58  ;;  %v3975_v3 = vrot.slane %v3954_v25, 1 }
0x10fc   :  { %v3976_v12 = vsel %vm250_vm8, %v3975_v3, %v3974_v8 }
0x10fd   :  { %3977 = vrot.lane.b32.xlu0 %v3976_v12, %s6013_s4 }
0x114a   :  { %v3549_v24 = vpop.permute.xlu1 %3548 }
0x114b   :  { %v7137_v28 = vmul.f32 %v7083_v39, %v3549_v24  ;;  %v4264_v39 = vld [vmem:[%s7810_s0 + $0x7] sm:$0x1] }
0x114d   :  { %4051 = vrot.lane.b32.xlu1 %v7137_v28, %s6013_s4 }
0x116f   :  { %v3978_v63 = vpop.permute.xlu0 %3977 }
0x1170   :  { %5321 = vmatmul.mubr.msk.f32.vlgmr.msra.gmra.mrb[14].mxu1 %vm35_vm0, %v3978_v63  ;;  %5343 = vmatmul.mubr.msk.f32.vlgmr.msra.gmra.mrb[12].mxu0 %vm35_vm0, %v3978_v63 }
0x1171   :  { %5489 = vmatpush3.bf16.msra.mxu1 %v6264_v53  ;;  %5331 = vmatprep.mubr.msk.f32.mxu1 %vm6009_vm1, %v6010_v4 }
0x1172   :  { %5490 = vmatprep.subr.bf16.mxu1 %v6008_v0  ;;  %5501 = vmatpush3.bf16.msra.mxu0 %v6228_v23  ;;  %v4265_v23 = vld [vmem:[%s7810_s0 + $0xf] sm:$0x1] }
0x1173   :  { %5502 = vmatprep.subr.bf16.mxu0 %v6008_v0  ;;  %5353 = vmatprep.mubr.msk.f32.mxu0 %vm6009_vm1, %v6010_v4 }
0x1175   :  { %5492 = vmatpush3.bf16.msra.mxu1 %v6275_v56 }
0x1176   :  { %5504 = vmatpush3.bf16.msra.mxu0 %v6235_v26  ;;  %v4267_v26 = vld [vmem:[%s7810_s0 + $0x1f] sm:$0x1] }
0x1177   :  { %5505 = vmatprep.subr.bf16.mxu0 %v6008_v0 }
0x11bf   :  { %v4052_v16 = vpop.permute.xlu1 %4051 }
0x11c0   :  { %5332 = vmatmul.mubr.msk.f32.vlgmr.msra.gmra.mrb[14].mxu1 %vm35_vm0, %v4052_v16 }
0x1243   :  { %v4338_v30 = vpop.f32.mrb[12].mxu0 }
0x1244   :  { %v4343_v59 = vrot.slane %v4338_v30, 1  ;;  %v4344_v40 = vrot.slane %v4338_v30, 2  ;;  %v4345_v48 = vrot.slane %v4338_v30, 3  ;;  %v4346_v42 = vrot.slane %v4338_v30, 4  ;;  %v5344_v13 = vpop.f32.mrb[13].mxu0 }
0x1245   :  { %v4347_v43 = vrot.slane %v4338_v30, 5  ;;  %v4348_v44 = vrot.slane %v4338_v30, 6  ;;  %v4349_v62 = vrot.slane %v4338_v30, 7  ;;  %v4358_v45 = vadd.f32 %v4338_v30, %v4264_v39 }
0x1246   :  { %v4359_v32 = vadd.f32 %v4343_v59, %v4265_v23  ;;  %v4360_v11 = vadd.f32 %v4344_v40, %v4266_v1  ;;  %v4361_v61 = vadd.f32 %v4345_v48, %v4267_v26  ;;  %v4362_v60 = vadd.f32 %v4346_v42, %v4268_v29 }
0x1247   :  { %v4363_v46 = vadd.f32 %v4347_v43, %v4269_v33  ;;  %v4364_v19 = vadd.f32 %v4348_v44, %v4270_v34  ;;  %v4365_v49 = vadd.f32 %v4349_v62, %v4271_v36  ;;  %v4970_v52 = vmul.f32 -1.442695, %v4358_v45 }
0x1248   :  { %v4971_v37 = vmul.f32 -1.442695, %v4359_v32  ;;  %v4972_v50 = vmul.f32 -1.442695, %v4360_v11  ;;  %v4973_v20 = vmul.f32 -1.442695, %v4361_v61  ;;  %5940 = vtanh.f32 %v4358_v45 }
0x1249   :  { %5942 = vpow2.f32 %v4970_v52  ;;  %v4974_v17 = vmul.f32 -1.442695, %v4362_v60  ;;  %v4975_v6 = vmul.f32 -1.442695, %v4363_v46  ;;  %v4976_v54 = vmul.f32 -1.442695, %v4364_v19 }
0x124a   :  { %5944 = vpow2.f32 %v4971_v37  ;;  %v4977_v5 = vmul.f32 -1.442695, %v4365_v49 }
0x124b   :  { %5946 = vpow2.f32 %v4972_v50 }
0x124c   :  { %5948 = vpow2.f32 %v4973_v20  ;;  %v7222_v20 = vld [vmem:[%s7815_s6] ss:$0 sm:$0xff] }
0x124d   :  { %5950 = vpow2.f32 %v4974_v17 }
0x124e   :  { %5952 = vpow2.f32 %v4975_v6 }
0x124f   :  { %5954 = vpow2.f32 %v4976_v54 }
0x1250   :  { %5956 = vpow2.f32 %v4977_v5 }
0x1251   :  { %5958 = vtanh.f32 %v4359_v32 }
0x1252   :  { %v5941_v2 = vpop.eup %5940  ;;  %5960 = vtanh.f32 %v4360_v11 }
0x1253   :  { %v5943_v9 = vpop.eup %5942  ;;  %5962 = vtanh.f32 %v4361_v61  ;;  %4456 = vrot.lane.b32.xlu0 %v5941_v2, %s6011_s20 }
0x1254   :  { %v5945_v18 = vpop.eup %5944  ;;  %v4390_v55 = vadd.f32 1.0, %v5943_v9  ;;  %5964 = vtanh.f32 %v4362_v60 }
0x1255   :  { %v5947_v14 = vpop.eup %5946  ;;  %v4391_v21 = vadd.f32 1.0, %v5945_v18  ;;  %5966 = vtanh.f32 %v4363_v46 }
0x1256   :  { %v5949_v15 = vpop.eup %5948  ;;  %v4392_v57 = vadd.f32 1.0, %v5947_v14  ;;  %5968 = vrcp.f32 %v4390_v55 }
0x1257   :  { %v5951_v35 = vpop.eup %5950  ;;  %v4393_v27 = vadd.f32 1.0, %v5949_v15  ;;  %5970 = vrcp.f32 %v4391_v21 }
0x1258   :  { %v5953_v58 = vpop.eup %5952  ;;  %v4394_v22 = vadd.f32 1.0, %v5951_v35  ;;  %5972 = vrcp.f32 %v4392_v57 }
0x1259   :  { %v5955_v25 = vpop.eup %5954  ;;  %v4395_v8 = vadd.f32 1.0, %v5953_v58  ;;  %5974 = vrcp.f32 %v4393_v27 }
0x125a   :  { %v5957_v3 = vpop.eup %5956  ;;  %v4396_v12 = vadd.f32 1.0, %v5955_v25  ;;  %5976 = vrcp.f32 %v4394_v22 }
0x125b   :  { %v5959_v24 = vpop.eup %5958  ;;  %v4397_v63 = vadd.f32 1.0, %v5957_v3  ;;  %5978 = vrcp.f32 %v4395_v8 }
0x125c   :  { %v5961_v16 = vpop.eup %5960  ;;  %5980 = vrcp.f32 %v4396_v12  ;;  %4458 = vrot.lane.b32.xlu0 %v5959_v24, %s6011_s20 }
0x125d   :  { %v5963_v39 = vpop.eup %5962  ;;  %5982 = vrcp.f32 %v4397_v63  ;;  %4460 = vrot.lane.b32.xlu1 %v5961_v16, %s6011_s20 }
0x125e   :  { %v5965_v23 = vpop.eup %5964  ;;  %5984 = vtanh.f32 %v4364_v19 }
0x125f   :  { %v5967_v1 = vpop.eup %5966  ;;  %5986 = vtanh.f32 %v4365_v49 }
0x1260   :  { %v7182_v26 = vpop.eup %5968  ;;  %4464 = vrot.lane.b32.xlu0 %v5965_v23, %s6011_s20 }
0x1261   :  { %v7185_v29 = vpop.eup %5970  ;;  %4462 = vrot.lane.b32.xlu1 %v5963_v39, %s6011_s20 }
0x1262   :  { %v7188_v33 = vpop.eup %5972  ;;  %v4430_v34 = vrot.slane %v7185_v29, 7 }
0x1263   :  { %v7191_v36 = vpop.eup %5974  ;;  %v4432_v30 = vrot.slane %v7188_v33, 6 }
0x1264   :  { %v7194_v59 = vpop.eup %5976  ;;  %v4431_v40 = vsel %vm232_vm2, %v4430_v34, %v7182_v26  ;;  %v4434_v48 = vrot.slane %v7191_v36, 5 }
0x1265   :  { %v7199_v42 = vpop.eup %5978  ;;  %4466 = vrot.lane.b32.xlu1 %v5967_v1, %s6011_s20  ;;  %v4433_v13 = vsel %vm235_vm3, %v4432_v30, %v4431_v40  ;;  %v4436_v43 = vrot.slane %v7194_v59, 4 }
0x1266   :  { %v7204_v44 = vpop.eup %5980  ;;  %v4435_v62 = vsel %vm238_vm4, %v4434_v48, %v4433_v13  ;;  %v4438_v45 = vrot.slane %v7199_v42, 3 }
0x1267   :  { %v7208_v32 = vpop.eup %5982  ;;  %v4437_v11 = vsel %vm241_vm5, %v4436_v43, %v4435_v62  ;;  %v4440_v61 = vrot.slane %v7204_v44, 2 }
0x1268   :  { %v5985_v60 = vpop.eup %5984  ;;  %v4439_v46 = vsel %vm244_vm6, %v4438_v45, %v4437_v11  ;;  %v4442_v19 = vrot.slane %v7208_v32, 1 }
0x1269   :  { %v5987_v49 = vpop.eup %5986  ;;  %4468 = vrot.lane.b32.xlu0 %v5985_v60, %s6011_s20  ;;  %v4441_v52 = vsel %vm247_vm7, %v4440_v61, %v4439_v46 }
0x126a   :  { %4470 = vrot.lane.b32.xlu1 %v5987_v49, %s6011_s20  ;;  %v4443_v37 = vsel %vm250_vm8, %v4442_v19, %v4441_v52 }
0x126d   :  { %4444 = vrot.lane.b32.xlu0 %v4443_v37, %s6012_s2 }
0x1293   :  { %v4121_v50 = vpop.f32.mrb[14].mxu1 }
0x1294   :  { %v5517_v17 = vadd.f32 %v7222_v20, %v4121_v50  ;;  %v5333_v6 = vpop.f32.mrb[15].mxu1 }
0x1296   :  { %v4968_v54 = vmul.f32 -1.442695, %v5517_v17  ;;  %5988 = vtanh.f32 %v5517_v17 }
0x1298   :  { %5990 = vpow2.f32 %v4968_v54 }
0x12a0   :  { %v5989_v5 = vpop.eup %5988 }
0x12a1   :  { %4139 = vrot.lane.b32.xlu0 %v5989_v5, %s6011_s20 }
0x12a2   :  { %v5991_v2 = vpop.eup %5990 }
0x12a3   :  { %v4129_v9 = vadd.f32 1.0, %v5991_v2 }
0x12a5   :  { %5992 = vrcp.f32 %v4129_v9 }
0x12af   :  { %v7226_v18 = vpop.eup %5992 }
0x12b0   :  { %4134 = vrot.lane.b32.xlu1 %v7226_v18, %s6012_s2 }
0x12c5   :  { %v4457_v55 = vpop.permute.xlu0 %4456 }
0x12c6   :  { %v4480_v35 = vmul.f32 %v7182_v26, %v4457_v55 }
0x12ce   :  { %v4459_v14 = vpop.permute.xlu0 %4458 }
0x12cf   :  { %v4461_v21 = vpop.permute.xlu1 %4460  ;;  %v4481_v15 = vmul.f32 %v7185_v29, %v4459_v14 }
0x12d0   :  { %v4482_v57 = vmul.f32 %v7188_v33, %v4461_v21 }
0x12d1   :  { %v4496_v27 = vrot.slane %v4481_v15, 7 }
0x12d2   :  { %v4465_v58 = vpop.permute.xlu0 %4464  ;;  %v4498_v22 = vrot.slane %v4482_v57, 6 }
0x12d3   :  { %v4497_v25 = vsel %vm232_vm2, %v4496_v27, %v4480_v35  ;;  %v4463_v8 = vpop.permute.xlu1 %4462  ;;  %v4484_v3 = vmul.f32 %v7194_v59, %v4465_v58 }
0x12d4   :  { %v4483_v12 = vmul.f32 %v7191_v36, %v4463_v8  ;;  %v4499_v24 = vsel %vm235_vm3, %v4498_v22, %v4497_v25 }
0x12d5   :  { %v4502_v16 = vrot.slane %v4484_v3, 4 }
0x12d6   :  { %v4500_v63 = vrot.slane %v4483_v12, 5 }
0x12d7   :  { %v4467_v39 = vpop.permute.xlu1 %4466 }
0x12d8   :  { %v4501_v23 = vsel %vm238_vm4, %v4500_v63, %v4499_v24  ;;  %v4485_v1 = vmul.f32 %v7199_v42, %v4467_v39 }
0x12d9   :  { %v4503_v34 = vsel %vm241_vm5, %v4502_v16, %v4501_v23 }
0x12da   :  { %v4504_v30 = vrot.slane %v4485_v1, 3 }
0x12db   :  { %v4469_v40 = vpop.permute.xlu0 %4468 }
0x12dc   :  { %v4486_v48 = vmul.f32 %v7204_v44, %v4469_v40  ;;  %v4471_v13 = vpop.permute.xlu1 %4470  ;;  %v4505_v43 = vsel %vm244_vm6, %v4504_v30, %v4503_v34 }
0x12dd   :  { %v4487_v62 = vmul.f32 %v7208_v32, %v4471_v13 }
0x12de   :  { %v4506_v45 = vrot.slane %v4486_v48, 2 }
0x12df   :  { %v4508_v11 = vrot.slane %v4487_v62, 1  ;;  %v4445_v61 = vpop.permute.xlu0 %4444 }
0x12e0   :  { %v4507_v60 = vsel %vm247_vm7, %v4506_v45, %v4505_v43  ;;  %v4447_v46 = vmul.f32 %v4445_v61, %v7103_v31 }
0x12e1   :  { %v4509_v19 = vsel %vm250_vm8, %v4508_v11, %v4507_v60 }
0x12e2   :  { %v4511_v49 = vadd.f32 %v4509_v19, %v4447_v46  ;;  %v566_v46 = vlaneseq }
0x12e4   :  { %5994 = vtanh.f32 %v4511_v49  ;;  %4864 = vst.msk [vmem:[%s7812_s9] sm:$0xff] %vm35_vm0, %v4511_v49  ;;  %v567_v49 = vshrl.u32 %v566_v46, 7 }
0x12ee   :  { %v5995_v52 = vpop.eup %5994 }
0x12ef   :  { %4521 = vrot.lane.b32.xlu1 %v5995_v52, %s6012_s2  ;;  %v4515_v37 = vrot.slane %v5995_v52, 2  ;;  %v4514_v50 = vrot.slane %v5995_v52, 1  ;;  %v4516_v17 = vrot.slane %v5995_v52, 3  ;;  %v4517_v31 = vrot.slane %v5995_v52, 4 }
0x12f0   :  { %v4518_v6 = vrot.slane %v5995_v52, 5  ;;  %v4519_v54 = vrot.slane %v5995_v52, 6  ;;  %v4520_v5 = vrot.slane %v5995_v52, 7 }
0x12f1   :  { %4525 = vrot.lane.b32.xlu0 %v4515_v37, %s6012_s2 }
0x12f3   :  { %4523 = vrot.lane.b32.xlu1 %v4514_v50, %s6012_s2 }
0x12f5   :  { %4527 = vrot.lane.b32.xlu0 %v4516_v17, %s6012_s2 }
0x12f7   :  { %4529 = vrot.lane.b32.xlu1 %v4517_v31, %s6012_s2 }
0x12f9   :  { %4531 = vrot.lane.b32.xlu0 %v4518_v6, %s6012_s2 }
0x12fb   :  { %4533 = vrot.lane.b32.xlu1 %v4519_v54, %s6012_s2 }
0x12fd   :  { %4535 = vrot.lane.b32.xlu0 %v4520_v5, %s6012_s2  ;;  %v7306_v5 = vsub.s32 0, %v567_v49 }
0x1313   :  { %v4140_v2 = vpop.permute.xlu0 %4139 }
0x1314   :  { %v4142_v55 = vmul.f32 %v7226_v18, %v4140_v2 }
0x1322   :  { %v4135_v9 = vpop.permute.xlu1 %4134 }
0x1323   :  { %v4137_v14 = vmul.f32 %v4135_v9, %v7116_v10 }
0x1325   :  { %v7260_v21 = vadd.f32 %v4142_v55, %v4137_v14 }
0x1327   :  { %5996 = vtanh.f32 %v7260_v21 }
0x1331   :  { %v5997_v15 = vpop.eup %5996 }
0x1332   :  { %4146 = vrot.lane.b32.xlu1 %v5997_v15, %s6012_s2 }
0x1361   :  { %v4522_v57 = vpop.permute.xlu1 %4521 }
0x1362   :  { %v4545_v8 = vmul.f32 %v7182_v26, %v4522_v57  ;;  %v1161_v57 = vcombine.high %v6577_v38, %v6577_v38 }
0x1363   :  { %v4526_v35 = vpop.permute.xlu0 %4525 }
0x1364   :  { %v4547_v27 = vmul.f32 %v7188_v33, %v4526_v35 }
0x1365   :  { %v4524_v58 = vpop.permute.xlu1 %4523 }
0x1366   :  { %v4546_v22 = vmul.f32 %v7185_v29, %v4524_v58  ;;  %v4563_v12 = vrot.slane %v4547_v27, 6 }
0x1367   :  { %v4528_v25 = vpop.permute.xlu0 %4527 }
0x1368   :  { %v4561_v3 = vrot.slane %v4546_v22, 7  ;;  %v4548_v10 = vmul.f32 %v7191_v36, %v4528_v25 }
0x1369   :  { %v4530_v24 = vpop.permute.xlu1 %4529 }
0x136a   :  { %v4562_v63 = vsel %vm232_vm2, %v4561_v3, %v4545_v8  ;;  %v4565_v16 = vrot.slane %v4548_v10, 5  ;;  %v4549_v39 = vmul.f32 %v7194_v59, %v4530_v24 }
0x136b   :  { %v4564_v23 = vsel %vm235_vm3, %v4563_v12, %v4562_v63  ;;  %v4532_v1 = vpop.permute.xlu0 %4531 }
0x136c   :  { %v4566_v33 = vsel %vm238_vm4, %v4565_v16, %v4564_v23  ;;  %v4567_v34 = vrot.slane %v4549_v39, 4  ;;  %v4550_v29 = vmul.f32 %v7199_v42, %v4532_v1 }
0x136d   :  { %v4534_v30 = vpop.permute.xlu1 %4533 }
0x136e   :  { %v4568_v26 = vsel %vm241_vm5, %v4567_v34, %v4566_v33  ;;  %v4569_v40 = vrot.slane %v4550_v29, 3  ;;  %v4551_v36 = vmul.f32 %v7204_v44, %v4534_v30  ;;  %v1759_v30 = vcombine.high %v6721_v51, %v6721_v51 }
0x136f   :  { %v4536_v48 = vpop.permute.xlu0 %4535 }
0x1370   :  { %v4570_v13 = vsel %vm244_vm6, %v4569_v40, %v4568_v26  ;;  %v4571_v43 = vrot.slane %v4551_v36, 2  ;;  %v4552_v59 = vmul.f32 %v7208_v32, %v4536_v48 }
0x1372   :  { %v4572_v62 = vsel %vm247_vm7, %v4571_v43, %v4570_v13  ;;  %v4573_v45 = vrot.slane %v4552_v59, 1 }
0x1374   :  { %v4574_v11 = vsel %vm250_vm8, %v4573_v45, %v4572_v62 }
0x1375   :  { %4575 = vrot.lane.b32.xlu0 %v4574_v11, %s6013_s4 }
0x13a4   :  { %v4147_v42 = vpop.permute.xlu1 %4146 }
0x13a5   :  { %v7281_v61 = vmul.f32 %v7226_v18, %v4147_v42  ;;  %v6014_v18 = vmov 1966171168  }
0x13a6   :  { %v564_v60 = vunpack.c.l.s4 %v6014_v18 }
0x13a7   :  { %4649 = vrot.lane.b32.xlu1 %v7281_v61, %s6013_s4 }
0x13a8   :  { %v565_v19 = vunpack.c.0.s8 %v564_v60 }
0x13aa   :  { %v7296_v52 = vsub.s32 %v565_v19, %v567_v49 }
0x13ac   :  { %v1175_v25 = vrot.slane %v1161_v57, %v7296_v52  ;;  %v1766_v23 = vrot.slane %v6721_v51, %v7296_v52  ;;  %v1773_v43 = vrot.slane %v1759_v30, %v7296_v52  ;;  %v2364_v60 = vrot.slane %v6866_v41, %v7296_v52 }
0x13ae   :  { %v1191_v24 = vrot.slane %v1175_v25, %v7296_v52  ;;  %v1782_v26 = vrot.slane %v1766_v23, %v7296_v52  ;;  %v1789_v42 = vrot.slane %v1773_v43, %v7296_v52 }
0x13b0   :  { %v1229_v1 = vrot.slane %v1191_v24, %v7306_v5  ;;  %v1207_v33 = vcombine.high %v1191_v24, %v1191_v24  ;;  %v1811_v59 = vrot.slane %v1782_v26, %v7306_v5  ;;  %v1804_v62 = vcombine.high %v1782_v26, %v1782_v26 }
0x13b1   :  { %v1827_v46 = vrot.slane %v1789_v42, %v7306_v5  ;;  %v1805_v19 = vcombine.high %v1789_v42, %v1789_v42  ;;  %v7402_v24 = vrot.slane %v6992_v47, %v7296_v52 }
0x13b2   :  { %v1237_v40 = vrot.slane %v1207_v33, %v7306_v5  ;;  %v1819_v11 = vrot.slane %v1804_v62, %v7306_v5 }
0x13e7   :  { %v4576_v44 = vpop.permute.xlu0 %4575 }
0x13e8   :  { %4863 = vst.msk [vmem:[%s7809_s8] sm:$0xff] %vm35_vm0, %v4576_v44  ;;  %5354 = vmatmul.mubr.msk.f32.vlgmr.msra.gmra.mrb[14].mxu0 %vm35_vm0, %v4576_v44  ;;  %v1177_v44 = vcombine.high %v1175_v25, %v1175_v25 }
0x13e9   :  { %5507 = vmatpush3.bf16.msra.mxu0 %v6264_v53  ;;  %5364 = vmatprep.mubr.msk.f32.mxu0 %vm6009_vm1, %v6010_v4  ;;  %v562_v4 = vcombine.high %v6437_v7, %v6437_v7 }
0x13ea   :  { %5508 = vmatprep.subr.bf16.mxu0 %v6008_v0  ;;  %v569_v0 = vrot.slane %v6437_v7, %v7296_v52  ;;  %v1168_v7 = vrot.slane %v6577_v38, %v7296_v52 }
0x13eb   :  { %v576_v31 = vrot.slane %v562_v4, %v7296_v52 }
0x13ec   :  { %v1184_v35 = vrot.slane %v1168_v7, %v7296_v52  ;;  %v577_v58 = vcombine.high %v569_v0, %v569_v0  ;;  %v1176_v36 = vcombine.high %v1168_v7, %v1168_v7 }
0x13ed   :  { %5510 = vmatpush3.bf16.msra.mxu0 %v6275_v56  ;;  %v585_v56 = vrot.slane %v569_v0, %v7296_v52  ;;  %v592_v55 = vrot.slane %v576_v31, %v7296_v52  ;;  %v578_v63 = vcombine.high %v576_v31, %v576_v31  ;;  %v1774_v0 = vcombine.high %v1766_v23, %v1766_v23 }
0x13ee   :  { %v1213_v8 = vrot.slane %v1184_v35, %v7306_v5  ;;  %v1206_v3 = vcombine.high %v1184_v35, %v1184_v35  ;;  %v599_v10 = vrot.slane %v577_v58, %v7296_v52  ;;  %v1198_v45 = vrot.slane %v1176_v36, %v7296_v52 }
0x13ef   :  { %v607_v6 = vcombine.high %v585_v56, %v585_v56  ;;  %v630_v14 = vrot.slane %v592_v55, %v7306_v5  ;;  %v608_v15 = vcombine.high %v592_v55, %v592_v55  ;;  %v614_v38 = vrot.slane %v585_v56, %v7306_v5 }
0x13f0   :  { %v1221_v12 = vrot.slane %v1206_v3, %v7306_v5  ;;  %v618_v16 = vrot.slane %v599_v10, %v7306_v5  ;;  %v609_v39 = vcombine.high %v599_v10, %v599_v10  ;;  %v606_v29 = vrot.slane %v578_v63, %v7296_v52 }
0x13f1   :  { %v622_v9 = vrot.slane %v607_v6, %v7306_v5  ;;  %v638_v27 = vrot.slane %v608_v15, %v7306_v5  ;;  %v1208_v18 = vcombine.high %v1198_v45, %v1198_v45  ;;  %v1775_v55 = vcombine.high %v1773_v43, %v1773_v43 }
0x13f2   :  { %v626_v34 = vrot.slane %v609_v39, %v7306_v5  ;;  %v634_v48 = vrot.slane %v606_v29, %v7306_v5  ;;  %v610_v13 = vcombine.high %v606_v29, %v606_v29  ;;  %v2955_v39 = vcombine.high %v6992_v47, %v6992_v47 }
0x13f3   :  { %v1225_v49 = vrot.slane %v1208_v18, %v7306_v5  ;;  %v1803_v35 = vrot.slane %v1775_v55, %v7296_v52  ;;  %v2970_v23 = vcombine.high %v7402_v24, %v7402_v24  ;;  %v7425_v36 = vrot.slane %v7137_v28, %v7296_v52 }
0x13f4   :  { %v642_v51 = vrot.slane %v610_v13, %v7306_v5  ;;  %v3553_v43 = vcombine.high %v7137_v28, %v7137_v28  ;;  %v7448_v18 = vrot.slane %v7281_v61, %v7296_v52 }
0x13f5   :  { %v1831_v58 = vrot.slane %v1803_v35, %v7306_v5  ;;  %v1807_v25 = vcombine.high %v1803_v35, %v1803_v35  ;;  %v2992_v30 = vrot.slane %v2970_v23, %v7296_v52  ;;  %v2978_v23 = vrot.slane %v7402_v24, %v7296_v52 }
0x13f7   :  { %v3011_v26 = vrot.slane %v2992_v30, %v7306_v5  ;;  %v3007_v24 = vrot.slane %v2978_v23, %v7306_v5 }
0x1419   :  { %v4650_v32 = vpop.permute.xlu1 %4649 }
0x141a   :  { %5365 = vmatmul.mubr.msk.f32.vlgmr.msra.gmra.mrb[14].mxu0 %vm35_vm0, %v4650_v32  ;;  %v1217_v32 = vrot.slane %v1198_v45, %v7306_v5  ;;  %v7437_v45 = vrot.slane %v3553_v43, %v7296_v52 }
0x141c   :  { %v3569_v28 = vcombine.high %v7437_v45, %v7437_v45 }
0x14ed   :  { %v4719_v37 = vpop.f32.mrb[14].mxu0 }
0x14ee   :  { %v5518_v53 = vadd.f32 %v7222_v20, %v4719_v37  ;;  %v5366_v50 = vpop.f32.mrb[15].mxu0  ;;  %v1205_v37 = vrot.slane %v1177_v44, %v7296_v52 }
0x14ef   :  { %v2380_v50 = vrot.slane %v2364_v60, %v7296_v52 }
0x14f0   :  { %v4980_v17 = vmul.f32 -1.442695, %v5518_v53  ;;  %5998 = vtanh.f32 %v5518_v53  ;;  %v2357_v53 = vcombine.high %v6866_v41, %v6866_v41  ;;  %v1233_v4 = vrot.slane %v1205_v37, %v7306_v5 }
0x14f1   :  { %v1209_v56 = vcombine.high %v1205_v37, %v1205_v37  ;;  %v2409_v6 = vrot.slane %v2380_v50, %v7306_v5 }
0x14f2   :  { %6000 = vpow2.f32 %v4980_v17  ;;  %v1835_v17 = vrot.slane %v1805_v19, %v7306_v5  ;;  %v2371_v31 = vrot.slane %v2357_v53, %v7296_v52  ;;  %v4151_v19 = vcombine.high %v7281_v61, %v7281_v61 }
0x14f3   :  { %v1241_v41 = vrot.slane %v1209_v56, %v7306_v5 }
0x14fa   :  { %v5999_v54 = vpop.eup %5998 }
0x14fb   :  { %4737 = vrot.lane.b32.xlu1 %v5999_v54, %s6011_s20  ;;  %v2402_v54 = vcombine.high %v2380_v50, %v2380_v50  ;;  %v7460_v50 = vrot.slane %v4151_v19, %v7296_v52 }
0x14fc   :  { %v6001_v20 = vpop.eup %6000 }
0x14fd   :  { %v4727_v2 = vadd.f32 1.0, %v6001_v20  ;;  %v1796_v20 = vrot.slane %v1774_v0, %v7296_v52  ;;  %v4167_v61 = vcombine.high %v7460_v50, %v7460_v50 }
0x14ff   :  { %6002 = vrcp.f32 %v4727_v2  ;;  %647 = vrot.lane.b32.xlu1 %v622_v9, %s6013_s4  ;;  %v2417_v2 = vrot.slane %v2402_v54, %v7306_v5  ;;  %v7381_v9 = vrot.slane %v2371_v31, %v7296_v52  ;;  %v1815_v7 = vrot.slane %v1796_v20, %v7306_v5 }
0x1501   :  { %v2425_v15 = vrot.slane %v7381_v9, %v7306_v5 }
0x1503   :  { %651 = vrot.lane.b32.xlu1 %v630_v14, %s6013_s4  ;;  %v1806_v14 = vcombine.high %v1796_v20, %v1796_v20 }
0x1505   :  { %v1823_v57 = vrot.slane %v1806_v14, %v7306_v5 }
0x1507   :  { %655 = vrot.lane.b32.xlu1 %v638_v27, %s6013_s4  ;;  %v2372_v27 = vcombine.high %v2364_v60, %v2364_v60 }
0x1509   :  { %v7320_v22 = vpop.eup %6002  ;;  %v2394_v3 = vrot.slane %v2372_v27, %v7296_v52 }
0x150a   :  { %4732 = vrot.lane.b32.xlu0 %v7320_v22, %s6012_s2 }
0x150b   :  { %1242 = vrot.lane.b32.xlu1 %v1213_v8, %s6013_s4  ;;  %v1839_v8 = vrot.slane %v1807_v25, %v7306_v5  ;;  %v2413_v10 = vrot.slane %v2394_v3, %v7306_v5 }
0x150e   :  { %643 = vrot.lane.b32.xlu0 %v614_v38, %s6013_s4  ;;  %v2373_v38 = vcombine.high %v2371_v31, %v2371_v31 }
0x150f   :  { %1246 = vrot.lane.b32.xlu1 %v1221_v12, %s6013_s4  ;;  %v2404_v12 = vcombine.high %v2394_v3, %v2394_v3 }
0x1511   :  { %v2421_v63 = vrot.slane %v2404_v12, %v7306_v5  ;;  %v2403_v12 = vcombine.high %v7381_v9, %v7381_v9 }
0x1512   :  { %645 = vrot.lane.b32.xlu0 %v618_v16, %s6013_s4  ;;  %v2401_v16 = vrot.slane %v2373_v38, %v7296_v52 }
0x1513   :  { %1250 = vrot.lane.b32.xlu1 %v1229_v1, %s6013_s4  ;;  %v2433_v9 = vrot.slane %v2403_v12, %v7306_v5 }
0x1514   :  { %v2429_v1 = vrot.slane %v2401_v16, %v7306_v5  ;;  %v2405_v33 = vcombine.high %v2401_v16, %v2401_v16 }
0x1516   :  { %649 = vrot.lane.b32.xlu0 %v626_v34, %s6013_s4  ;;  %v7414_v34 = vrot.slane %v2955_v39, %v7296_v52  ;;  %v2437_v29 = vrot.slane %v2405_v33, %v7306_v5 }
0x1517   :  { %1254 = vrot.lane.b32.xlu1 %v1237_v40, %s6013_s4  ;;  %v3002_v40 = vcombine.high %v2992_v30, %v2992_v30 }
0x1518   :  { %v2971_v47 = vcombine.high %v7414_v34, %v7414_v34 }
0x151a   :  { %653 = vrot.lane.b32.xlu0 %v634_v48, %s6013_s4  ;;  %v3019_v48 = vrot.slane %v3002_v40, %v7306_v5  ;;  %v2999_v13 = vrot.slane %v2971_v47, %v7296_v52  ;;  %v2985_v40 = vrot.slane %v7414_v34, %v7296_v52 }
0x151b   :  { %1840 = vrot.lane.b32.xlu1 %v1811_v59, %s6013_s4  ;;  %v3568_v59 = vcombine.high %v7425_v36, %v7425_v36 }
0x151c   :  { %v3027_v62 = vrot.slane %v2999_v13, %v7306_v5  ;;  %v3023_v43 = vrot.slane %v2985_v40, %v7306_v5 }
0x151e   :  { %657 = vrot.lane.b32.xlu0 %v642_v51, %s6013_s4  ;;  %v3003_v51 = vcombine.high %v2999_v13, %v2999_v13 }
0x151f   :  { %1844 = vrot.lane.b32.xlu1 %v1819_v11, %s6013_s4  ;;  %v3590_v11 = vrot.slane %v3568_v59, %v7296_v52  ;;  %v3001_v59 = vcombine.high %v2985_v40, %v2985_v40 }
0x1520   :  { %v3035_v42 = vrot.slane %v3003_v51, %v7306_v5  ;;  %v3576_v51 = vrot.slane %v7425_v36, %v7296_v52 }
0x1521   :  { %v3609_v44 = vrot.slane %v3590_v11, %v7306_v5 }
0x1522   :  { %1244 = vrot.lane.b32.xlu0 %v1217_v32, %s6013_s4  ;;  %v3600_v32 = vcombine.high %v3590_v11, %v3590_v11  ;;  %v3031_v11 = vrot.slane %v3001_v59, %v7306_v5  ;;  %v3605_v36 = vrot.slane %v3576_v51, %v7306_v5 }
0x1523   :  { %1848 = vrot.lane.b32.xlu1 %v1827_v46, %s6013_s4  ;;  %v3597_v46 = vrot.slane %v3569_v28, %v7296_v52 }
0x1524   :  { %v3617_v60 = vrot.slane %v3600_v32, %v7306_v5 }
0x1525   :  { %v3625_v37 = vrot.slane %v3597_v46, %v7306_v5  ;;  %v3601_v53 = vcombine.high %v3597_v46, %v3597_v46  ;;  %v3583_v46 = vrot.slane %v7437_v45, %v7296_v52  ;;  %v4174_v45 = vrot.slane %v7448_v18, %v7296_v52 }
0x1526   :  { %1248 = vrot.lane.b32.xlu0 %v1225_v49, %s6013_s4  ;;  %v4166_v49 = vcombine.high %v7448_v18, %v7448_v18  ;;  %v4181_v18 = vrot.slane %v7460_v50, %v7296_v52 }
0x1527   :  { %1852 = vrot.lane.b32.xlu1 %v1835_v17, %s6013_s4  ;;  %v3633_v0 = vrot.slane %v3601_v53, %v7306_v5  ;;  %v3599_v53 = vcombine.high %v3583_v46, %v3583_v46 }
0x1528   :  { %v4188_v17 = vrot.slane %v4166_v49, %v7296_v52 }
0x152a   :  { %1252 = vrot.lane.b32.xlu0 %v1233_v4, %s6013_s4  ;;  %v4207_v56 = vrot.slane %v4188_v17, %v7306_v5  ;;  %v4198_v31 = vcombine.high %v4188_v17, %v4188_v17 }
0x152b   :  { %2438 = vrot.lane.b32.xlu1 %v2409_v6, %s6013_s4 }
0x152c   :  { %v4215_v54 = vrot.slane %v4198_v31, %v7306_v5 }
0x152e   :  { %1256 = vrot.lane.b32.xlu0 %v1241_v41, %s6013_s4  ;;  %v4195_v41 = vrot.slane %v4167_v61, %v7296_v52  ;;  %v4196_v61 = vcombine.high %v4174_v45, %v4174_v45 }
0x152f   :  { %2442 = vrot.lane.b32.xlu1 %v2417_v2, %s6013_s4 }
0x1530   :  { %v4223_v2 = vrot.slane %v4195_v41, %v7306_v5  ;;  %v4199_v55 = vcombine.high %v4195_v41, %v4195_v41  ;;  %v4219_v41 = vrot.slane %v4181_v18, %v7306_v5 }
0x1532   :  { %1842 = vrot.lane.b32.xlu0 %v1815_v7, %s6013_s4 }
0x1533   :  { %2446 = vrot.lane.b32.xlu1 %v2425_v15, %s6013_s4  ;;  %v4231_v15 = vrot.slane %v4199_v55, %v7306_v5 }
0x1536   :  { %1846 = vrot.lane.b32.xlu0 %v1823_v57, %s6013_s4 }
0x153a   :  { %1850 = vrot.lane.b32.xlu0 %v1831_v58, %s6013_s4 }
0x153e   :  { %1854 = vrot.lane.b32.xlu0 %v1839_v8, %s6013_s4 }
0x1542   :  { %2440 = vrot.lane.b32.xlu0 %v2413_v10, %s6013_s4 }
0x1546   :  { %2444 = vrot.lane.b32.xlu0 %v2421_v63, %s6013_s4 }
0x154a   :  { %2448 = vrot.lane.b32.xlu0 %v2429_v1, %s6013_s4 }
0x154e   :  { %2452 = vrot.lane.b32.xlu0 %v2437_v29, %s6013_s4  ;;  %v3000_v29 = vcombine.high %v2978_v23, %v2978_v23 }
0x1552   :  { %3038 = vrot.lane.b32.xlu0 %v3011_v26, %s6013_s4  ;;  %v3015_v26 = vrot.slane %v3000_v29, %v7306_v5 }
0x1556   :  { %3042 = vrot.lane.b32.xlu0 %v3019_v48, %s6013_s4 }
0x155a   :  { %3046 = vrot.lane.b32.xlu0 %v3027_v62, %s6013_s4 }
0x155e   :  { %3050 = vrot.lane.b32.xlu0 %v3035_v42, %s6013_s4 }
0x1562   :  { %3636 = vrot.lane.b32.xlu0 %v3609_v44, %s6013_s4  ;;  %v3598_v44 = vcombine.high %v3576_v51, %v3576_v51 }
0x1564   :  { %v3613_v19 = vrot.slane %v3598_v44, %v7306_v5 }
0x1566   :  { %3640 = vrot.lane.b32.xlu0 %v3617_v60, %s6013_s4 }
0x156a   :  { %3644 = vrot.lane.b32.xlu0 %v3625_v37, %s6013_s4  ;;  %v3621_v37 = vrot.slane %v3583_v46, %v7306_v5 }
0x156d   :  { %v4738_v4 = vpop.permute.xlu1 %4737 }
0x156e   :  { %3648 = vrot.lane.b32.xlu0 %v3633_v0, %s6013_s4  ;;  %v4740_v57 = vmul.f32 %v7320_v22, %v4738_v4  ;;  %v3629_v0 = vrot.slane %v3599_v53, %v7306_v5 }
0x1571   :  { %v648_v6 = vpop.permute.xlu1 %647 }
0x1572   :  { %670 = vst.msk [vmem:[%s7816_s7 + $0x10] sm:$0x1] %vm667_vm9, %v648_v6  ;;  %4234 = vrot.lane.b32.xlu0 %v4207_v56, %s6013_s4  ;;  %v4203_v56 = vrot.slane %v4174_v45, %v7306_v5  ;;  %v4211_v6 = vrot.slane %v4196_v61, %v7306_v5 }
0x1575   :  { %v652_v20 = vpop.permute.xlu1 %651 }
0x1576   :  { %672 = vst.msk [vmem:[%s7816_s7 + $0x20] sm:$0x1] %vm667_vm9, %v652_v20  ;;  %4238 = vrot.lane.b32.xlu0 %v4215_v54, %s6013_s4  ;;  %v4197_v20 = vcombine.high %v4181_v18, %v4181_v18 }
0x1578   :  { %v4227_v50 = vrot.slane %v4197_v20, %v7306_v5 }
0x1579   :  { %v656_v7 = vpop.permute.xlu1 %655 }
0x157a   :  { %674 = vst.msk [vmem:[%s7816_s7 + $0x30] sm:$0x1] %vm667_vm9, %v656_v7  ;;  %4242 = vrot.lane.b32.xlu0 %v4223_v2, %s6013_s4 }
0x157c   :  { %v4733_v14 = vpop.permute.xlu0 %4732 }
0x157d   :  { %v4735_v35 = vmul.f32 %v4733_v14, %v7260_v21  ;;  %v1243_v27 = vpop.permute.xlu1 %1242 }
0x157e   :  { %1266 = vst.msk [vmem:[%s7816_s7 + $0x1] sm:$0x1] %vm667_vm9, %v1243_v27  ;;  %4246 = vrot.lane.b32.xlu0 %v4231_v15, %s6013_s4 }
0x157f   :  { %v4741_v58 = vadd.f32 %v4740_v57, %v4735_v35 }
0x1580   :  { %v644_v25 = vpop.permute.xlu0 %643 }
0x1581   :  { %6004 = vtanh.f32 %v4741_v58  ;;  %4982 = vst.msk [vmem:[%s7812_s9 + $0x8] sm:$0xff] %vm35_vm0, %v4741_v58  ;;  %v1247_v21 = vpop.permute.xlu1 %1246 }
0x1582   :  { %668 = vst.msk [vmem:[%s7816_s7] sm:$0x1] %vm667_vm9, %v644_v25  ;;  %1268 = vst.msk [vmem:[%s7816_s7 + $0x11] sm:$0x1] %vm667_vm9, %v1247_v21 }
0x1584   :  { %v646_v8 = vpop.permute.xlu0 %645 }
0x1585   :  { %669 = vst.msk [vmem:[%s7816_s7 + $0x8] sm:$0x1] %vm667_vm9, %v646_v8  ;;  %v1251_v3 = vpop.permute.xlu1 %1250 }
0x1586   :  { %1270 = vst.msk [vmem:[%s7816_s7 + $0x21] sm:$0x1] %vm667_vm9, %v1251_v3 }
0x1588   :  { %v650_v38 = vpop.permute.xlu0 %649 }
0x1589   :  { %671 = vst.msk [vmem:[%s7816_s7 + $0x18] sm:$0x1] %vm667_vm9, %v650_v38  ;;  %v1255_v10 = vpop.permute.xlu1 %1254 }
0x158a   :  { %1272 = vst.msk [vmem:[%s7816_s7 + $0x31] sm:$0x1] %vm667_vm9, %v1255_v10 }
0x158b   :  { %v6005_v63 = vpop.eup %6004 }
0x158c   :  { %v654_v16 = vpop.permute.xlu0 %653  ;;  %4744 = vrot.lane.b32.xlu1 %v6005_v63, %s6012_s2 }
0x158d   :  { %673 = vst.msk [vmem:[%s7816_s7 + $0x28] sm:$0x1] %vm667_vm9, %v654_v16  ;;  %v1841_v39 = vpop.permute.xlu1 %1840 }
0x158e   :  { %1864 = vst.msk [vmem:[%s7816_s7 + $0x2] sm:$0x1] %vm667_vm9, %v1841_v39 }
0x1590   :  { %v658_v1 = vpop.permute.xlu0 %657  ;;  %2450 = vrot.lane.b32.xlu1 %v2433_v9, %s6013_s4 }
0x1591   :  { %675 = vst.msk [vmem:[%s7816_s7 + $0x38] sm:$0x1] %vm667_vm9, %v658_v1  ;;  %v1845_v33 = vpop.permute.xlu1 %1844 }
0x1592   :  { %1866 = vst.msk [vmem:[%s7816_s7 + $0x12] sm:$0x1] %vm667_vm9, %v1845_v33 }
0x1594   :  { %v1245_v30 = vpop.permute.xlu0 %1244  ;;  %3036 = vrot.lane.b32.xlu1 %v3007_v24, %s6013_s4 }
0x1595   :  { %1267 = vst.msk [vmem:[%s7816_s7 + $0x9] sm:$0x1] %vm667_vm9, %v1245_v30  ;;  %v1849_v47 = vpop.permute.xlu1 %1848 }
0x1596   :  { %1868 = vst.msk [vmem:[%s7816_s7 + $0x22] sm:$0x1] %vm667_vm9, %v1849_v47 }
0x1598   :  { %v1249_v48 = vpop.permute.xlu0 %1248  ;;  %3040 = vrot.lane.b32.xlu1 %v3015_v26, %s6013_s4 }
0x1599   :  { %1269 = vst.msk [vmem:[%s7816_s7 + $0x19] sm:$0x1] %vm667_vm9, %v1249_v48  ;;  %v1853_v13 = vpop.permute.xlu1 %1852 }
0x159a   :  { %1870 = vst.msk [vmem:[%s7816_s7 + $0x32] sm:$0x1] %vm667_vm9, %v1853_v13 }
0x159c   :  { %v1253_v62 = vpop.permute.xlu0 %1252  ;;  %3044 = vrot.lane.b32.xlu1 %v3023_v43, %s6013_s4 }
0x159d   :  { %1271 = vst.msk [vmem:[%s7816_s7 + $0x29] sm:$0x1] %vm667_vm9, %v1253_v62  ;;  %v2439_v34 = vpop.permute.xlu1 %2438 }
0x159e   :  { %2462 = vst.msk [vmem:[%s7816_s7 + $0x3] sm:$0x1] %vm667_vm9, %v2439_v34 }
0x15a0   :  { %v1257_v42 = vpop.permute.xlu0 %1256  ;;  %3048 = vrot.lane.b32.xlu1 %v3031_v11, %s6013_s4 }
0x15a1   :  { %1273 = vst.msk [vmem:[%s7816_s7 + $0x39] sm:$0x1] %vm667_vm9, %v1257_v42  ;;  %v2443_v28 = vpop.permute.xlu1 %2442 }
0x15a2   :  { %2464 = vst.msk [vmem:[%s7816_s7 + $0x13] sm:$0x1] %vm667_vm9, %v2443_v28 }
0x15a4   :  { %v1843_v32 = vpop.permute.xlu0 %1842  ;;  %3634 = vrot.lane.b32.xlu1 %v3605_v36, %s6013_s4 }
0x15a5   :  { %1865 = vst.msk [vmem:[%s7816_s7 + $0xa] sm:$0x1] %vm667_vm9, %v1843_v32  ;;  %v2447_v60 = vpop.permute.xlu1 %2446 }
0x15a6   :  { %2466 = vst.msk [vmem:[%s7816_s7 + $0x23] sm:$0x1] %vm667_vm9, %v2447_v60 }
0x15a8   :  { %v1847_v49 = vpop.permute.xlu0 %1846  ;;  %3638 = vrot.lane.b32.xlu1 %v3613_v19, %s6013_s4 }
0x15a9   :  { %1867 = vst.msk [vmem:[%s7816_s7 + $0x1a] sm:$0x1] %vm667_vm9, %v1847_v49 }
0x15ac   :  { %v1851_v17 = vpop.permute.xlu0 %1850  ;;  %3642 = vrot.lane.b32.xlu1 %v3621_v37, %s6013_s4 }
0x15ad   :  { %1869 = vst.msk [vmem:[%s7816_s7 + $0x2a] sm:$0x1] %vm667_vm9, %v1851_v17 }
0x15b0   :  { %v1855_v4 = vpop.permute.xlu0 %1854  ;;  %3646 = vrot.lane.b32.xlu1 %v3629_v0, %s6013_s4 }
0x15b1   :  { %1871 = vst.msk [vmem:[%s7816_s7 + $0x3a] sm:$0x1] %vm667_vm9, %v1855_v4 }
0x15b4   :  { %v2441_v31 = vpop.permute.xlu0 %2440  ;;  %4232 = vrot.lane.b32.xlu1 %v4203_v56, %s6013_s4 }
0x15b5   :  { %2463 = vst.msk [vmem:[%s7816_s7 + $0xb] sm:$0x1] %vm667_vm9, %v2441_v31 }
0x15b8   :  { %v2445_v54 = vpop.permute.xlu0 %2444  ;;  %4236 = vrot.lane.b32.xlu1 %v4211_v6, %s6013_s4 }
0x15b9   :  { %2465 = vst.msk [vmem:[%s7816_s7 + $0x1b] sm:$0x1] %vm667_vm9, %v2445_v54 }
0x15bc   :  { %v2449_v2 = vpop.permute.xlu0 %2448  ;;  %4240 = vrot.lane.b32.xlu1 %v4219_v41, %s6013_s4 }
0x15bd   :  { %2467 = vst.msk [vmem:[%s7816_s7 + $0x2b] sm:$0x1] %vm667_vm9, %v2449_v2 }
0x15c0   :  { %v2453_v55 = vpop.permute.xlu0 %2452  ;;  %4244 = vrot.lane.b32.xlu1 %v4227_v50, %s6013_s4 }
0x15c1   :  { %2469 = vst.msk [vmem:[%s7816_s7 + $0x3b] sm:$0x1] %vm667_vm9, %v2453_v55 }
0x15c4   :  { %v3039_v7 = vpop.permute.xlu0 %3038 }
0x15c5   :  { %3061 = vst.msk [vmem:[%s7816_s7 + $0xc] sm:$0x1] %vm667_vm9, %v3039_v7 }
0x15c8   :  { %v3043_v14 = vpop.permute.xlu0 %3042 }
0x15c9   :  { %3063 = vst.msk [vmem:[%s7816_s7 + $0x1c] sm:$0x1] %vm667_vm9, %v3043_v14 }
0x15cc   :  { %v3047_v15 = vpop.permute.xlu0 %3046 }
0x15cd   :  { %3065 = vst.msk [vmem:[%s7816_s7 + $0x2c] sm:$0x1] %vm667_vm9, %v3047_v15 }
0x15d0   :  { %v3051_v57 = vpop.permute.xlu0 %3050 }
0x15d1   :  { %3067 = vst.msk [vmem:[%s7816_s7 + $0x3c] sm:$0x1] %vm667_vm9, %v3051_v57 }
0x15d4   :  { %v3637_v35 = vpop.permute.xlu0 %3636 }
0x15d5   :  { %3659 = vst.msk [vmem:[%s7816_s7 + $0xd] sm:$0x1] %vm667_vm9, %v3637_v35 }
0x15d8   :  { %v3641_v27 = vpop.permute.xlu0 %3640 }
0x15d9   :  { %3661 = vst.msk [vmem:[%s7816_s7 + $0x1d] sm:$0x1] %vm667_vm9, %v3641_v27 }
0x15dc   :  { %v3645_v58 = vpop.permute.xlu0 %3644 }
0x15dd   :  { %3663 = vst.msk [vmem:[%s7816_s7 + $0x2d] sm:$0x1] %vm667_vm9, %v3645_v58 }
0x15e0   :  { %v3649_v25 = vpop.permute.xlu0 %3648 }
0x15e1   :  { %3665 = vst.msk [vmem:[%s7816_s7 + $0x3d] sm:$0x1] %vm667_vm9, %v3649_v25 }
0x15e4   :  { %v4235_v21 = vpop.permute.xlu0 %4234 }
0x15e5   :  { %4257 = vst.msk [vmem:[%s7816_s7 + $0xe] sm:$0x1] %vm667_vm9, %v4235_v21 }
0x15e8   :  { %v4239_v8 = vpop.permute.xlu0 %4238 }
0x15e9   :  { %4259 = vst.msk [vmem:[%s7816_s7 + $0x1e] sm:$0x1] %vm667_vm9, %v4239_v8 }
0x15ec   :  { %v4243_v3 = vpop.permute.xlu0 %4242 }
0x15ed   :  { %4261 = vst.msk [vmem:[%s7816_s7 + $0x2e] sm:$0x1] %vm667_vm9, %v4243_v3 }
0x15f0   :  { %v4247_v38 = vpop.permute.xlu0 %4246 }
0x15f1   :  { %4263 = vst.msk [vmem:[%s7816_s7 + $0x3e] sm:$0x1] %vm667_vm9, %v4247_v38 }
0x15fe   :  { %v4745_v10 = vpop.permute.xlu1 %4744 }
0x15ff   :  { %v4747_v12 = vmul.f32 %v7320_v22, %v4745_v10 }
0x1601   :  { %v4749_v63 = vcombine.high %v4747_v12, %v4747_v12  ;;  %v4756_v16 = vrot.slane %v4747_v12, %v7296_v52 }
0x1602   :  { %v2451_v39 = vpop.permute.xlu1 %2450 }
0x1603   :  { %v4763_v23 = vrot.slane %v4749_v63, %v7296_v52  ;;  %v4764_v9 = vcombine.high %v4756_v16, %v4756_v16  ;;  %v4772_v1 = vrot.slane %v4756_v16, %v7296_v52  ;;  %2468 = vst.msk [vmem:[%s7816_s7 + $0x33] sm:$0x1] %vm667_vm9, %v2451_v39 }
0x1605   :  { %v4786_v33 = vrot.slane %v4764_v9, %v7296_v52  ;;  %v4794_v24 = vcombine.high %v4772_v1, %v4772_v1  ;;  %v4801_v22 = vrot.slane %v4772_v1, %v7306_v5  ;;  %v4765_v30 = vcombine.high %v4763_v23, %v4763_v23 }
0x1606   :  { %v3037_v29 = vpop.permute.xlu1 %3036  ;;  %v4779_v40 = vrot.slane %v4763_v23, %v7296_v52 }
0x1607   :  { %3060 = vst.msk [vmem:[%s7816_s7 + $0x4] sm:$0x1] %vm667_vm9, %v3037_v29  ;;  %v4805_v47 = vrot.slane %v4786_v33, %v7306_v5  ;;  %v4796_v26 = vcombine.high %v4786_v33, %v4786_v33  ;;  %4830 = vrot.lane.b32.xlu1 %v4801_v22, %s6013_s4  ;;  %v4809_v13 = vrot.slane %v4794_v24, %v7306_v5 }
0x1608   :  { %v4793_v59 = vrot.slane %v4765_v30, %v7296_v52  ;;  %v4817_v34 = vrot.slane %v4779_v40, %v7306_v5  ;;  %v4795_v51 = vcombine.high %v4779_v40, %v4779_v40 }
0x1609   :  { %4832 = vrot.lane.b32.xlu0 %v4805_v47, %s6013_s4  ;;  %v4813_v43 = vrot.slane %v4796_v26, %v7306_v5 }
0x160a   :  { %v3041_v48 = vpop.permute.xlu1 %3040  ;;  %v4821_v11 = vrot.slane %v4793_v59, %v7306_v5  ;;  %v4797_v42 = vcombine.high %v4793_v59, %v4793_v59  ;;  %v4825_v28 = vrot.slane %v4795_v51, %v7306_v5 }
0x160b   :  { %3062 = vst.msk [vmem:[%s7816_s7 + $0x14] sm:$0x1] %vm667_vm9, %v3041_v48  ;;  %4834 = vrot.lane.b32.xlu1 %v4809_v13, %s6013_s4 }
0x160c   :  { %v4829_v44 = vrot.slane %v4797_v42, %v7306_v5 }
0x160d   :  { %4836 = vrot.lane.b32.xlu0 %v4813_v43, %s6013_s4 }
0x160e   :  { %v3045_v62 = vpop.permute.xlu1 %3044 }
0x160f   :  { %3064 = vst.msk [vmem:[%s7816_s7 + $0x24] sm:$0x1] %vm667_vm9, %v3045_v62  ;;  %4838 = vrot.lane.b32.xlu1 %v4817_v34, %s6013_s4 }
0x1611   :  { %4840 = vrot.lane.b32.xlu0 %v4821_v11, %s6013_s4 }
0x1612   :  { %v3049_v52 = vpop.permute.xlu1 %3048 }
0x1613   :  { %3066 = vst.msk [vmem:[%s7816_s7 + $0x34] sm:$0x1] %vm667_vm9, %v3049_v52  ;;  %4842 = vrot.lane.b32.xlu1 %v4825_v28, %s6013_s4 }
0x1615   :  { %4844 = vrot.lane.b32.xlu0 %v4829_v44, %s6013_s4 }
0x1616   :  { %v3635_v36 = vpop.permute.xlu1 %3634 }
0x1617   :  { %3658 = vst.msk [vmem:[%s7816_s7 + $0x5] sm:$0x1] %vm667_vm9, %v3635_v36  ;;  %4865 = vrot.lane.b32.xlu1 %v4747_v12, %s6013_s4 }
0x161a   :  { %v3639_v32 = vpop.permute.xlu1 %3638 }
0x161b   :  { %3660 = vst.msk [vmem:[%s7816_s7 + $0x15] sm:$0x1] %vm667_vm9, %v3639_v32 }
0x161e   :  { %v3643_v60 = vpop.permute.xlu1 %3642 }
0x161f   :  { %3662 = vst.msk [vmem:[%s7816_s7 + $0x25] sm:$0x1] %vm667_vm9, %v3643_v60 }
0x1622   :  { %v3647_v5 = vpop.permute.xlu1 %3646 }
0x1623   :  { %3664 = vst.msk [vmem:[%s7816_s7 + $0x35] sm:$0x1] %vm667_vm9, %v3647_v5 }
0x1626   :  { %v4233_v46 = vpop.permute.xlu1 %4232 }
0x1627   :  { %4256 = vst.msk [vmem:[%s7816_s7 + $0x6] sm:$0x1] %vm667_vm9, %v4233_v46 }
0x162a   :  { %v4237_v19 = vpop.permute.xlu1 %4236 }
0x162b   :  { %4258 = vst.msk [vmem:[%s7816_s7 + $0x16] sm:$0x1] %vm667_vm9, %v4237_v19 }
0x162e   :  { %v4241_v49 = vpop.permute.xlu1 %4240 }
0x162f   :  { %4260 = vst.msk [vmem:[%s7816_s7 + $0x26] sm:$0x1] %vm667_vm9, %v4241_v49 }
0x1632   :  { %v4245_v37 = vpop.permute.xlu1 %4244 }
0x1633   :  { %4262 = vst.msk [vmem:[%s7816_s7 + $0x36] sm:$0x1] %vm667_vm9, %v4245_v37 }
0x1679   :  { %v4831_v53 = vpop.permute.xlu1 %4830 }
0x167a   :  { %4854 = vst.msk [vmem:[%s7816_s7 + $0x7] sm:$0x1] %vm667_vm9, %v4831_v53 }
0x167b   :  { %v4833_v17 = vpop.permute.xlu0 %4832 }
0x167c   :  { %4855 = vst.msk [vmem:[%s7816_s7 + $0xf] sm:$0x1] %vm667_vm9, %v4833_v17 }
0x167d   :  { %v4835_v45 = vpop.permute.xlu1 %4834 }
0x167e   :  { %4856 = vst.msk [vmem:[%s7816_s7 + $0x17] sm:$0x1] %vm667_vm9, %v4835_v45 }
0x167f   :  { %v4837_v0 = vpop.permute.xlu0 %4836 }
0x1680   :  { %4857 = vst.msk [vmem:[%s7816_s7 + $0x1f] sm:$0x1] %vm667_vm9, %v4837_v0 }
0x1681   :  { %v4839_v4 = vpop.permute.xlu1 %4838 }
0x1682   :  { %4858 = vst.msk [vmem:[%s7816_s7 + $0x27] sm:$0x1] %vm667_vm9, %v4839_v4 }
0x1683   :  { %v4841_v61 = vpop.permute.xlu0 %4840 }
0x1684   :  { %4859 = vst.msk [vmem:[%s7816_s7 + $0x2f] sm:$0x1] %vm667_vm9, %v4841_v61 }
0x1685   :  { %v4843_v56 = vpop.permute.xlu1 %4842 }
0x1686   :  { %4860 = vst.msk [vmem:[%s7816_s7 + $0x37] sm:$0x1] %vm667_vm9, %v4843_v56 }
0x1687   :  { %v4845_v31 = vpop.permute.xlu0 %4844 }
0x1688   :  { %4861 = vst.msk [vmem:[%s7816_s7 + $0x3f] sm:$0x1] %vm667_vm9, %v4845_v31 }
0x1689   :  { %v4866_v18 = vpop.permute.xlu1 %4865 }
0x168a   :  { %4981 = vst.msk [vmem:[%s7809_s8 + $0x8] sm:$0xff] %vm35_vm0, %v4866_v18 }

</bundles_post_ra>
